<compile_context>
chip_gen: v7x
topology: tpu7x:2x2x1
jax: 0.10.0
libtpu: 0.0.40
codegen_flags: <defaults>
</compile_context>

<pallas_src>
import functools

import jax
import jax.numpy as jnp
from jax.experimental import pallas as pl
from jax.experimental.pallas import tpu as pltpu


def _bn_kernel(x_ref, gb_ref, o_ref, *, eps, inv_count, chunk):
    # x_ref/o_ref: (cb, L)   gb_ref: (cb, 2) with columns [gamma, beta]
    cb = x_ref.shape[0]
    n_chunks = cb // chunk

    def body(ci, carry):
        r0 = pl.multiple_of(ci * chunk, chunk)
        x = x_ref[pl.ds(r0, chunk), :].astype(jnp.float32)        # (chunk, L)
        # Two-pass, numerically safe per-channel batch statistics.
        mean = jnp.sum(x, axis=1, keepdims=True) * inv_count       # (chunk, 1)
        d = x - mean
        var = jnp.sum(d * d, axis=1, keepdims=True) * inv_count    # (chunk, 1)
        inv_std = jax.lax.rsqrt(var + eps)
        gb = gb_ref[pl.ds(r0, chunk), :]                           # (chunk, 2)
        scale = gb[:, 0:1] * inv_std
        bias = gb[:, 1:2] - mean * scale
        o_ref[pl.ds(r0, chunk), :] = (x * scale + bias).astype(o_ref.dtype)
        return carry

    jax.lax.fori_loop(0, n_chunks, body, 0, unroll=True)


def _pick_channel_block(c, num_blocks=2):
    """Split C into `num_blocks` equal multiple-of-8 blocks if possible."""
    if c % num_blocks == 0 and (c // num_blocks) % 8 == 0:
        return c // num_blocks
    return c  # single full-extent block (always legal)


def _pick_chunk(cb, lanes):
    """Largest multiple-of-8 divisor of cb that keeps a chunk within ~32 vregs."""
    if cb % 8 != 0:
        return cb
    l_pad = ((lanes + 127) // 128) * 128
    max_rows = max(8, (32 * 1024) // l_pad)   # chunk * l_pad <= 32 f32 vregs
    best = 8
    for d in range(8, cb + 1, 8):
        if cb % d == 0 and d <= max_rows:
            best = d
    return best


def batchnorm2d_pallas(x_nchw, gamma, beta, eps=1e-3):
    """Training-mode BatchNorm2d forward (batch stats over N,H,W per channel)."""
    n, c, h, w = x_nchw.shape
    hw = h * w
    if n == 1:
        x2d = x_nchw.reshape(c, hw)  # free: NCHW with N=1 is contiguous (C, HW)
    else:
        # One-time relayout so the batch statistic is a single lane reduction.
        x2d = jnp.transpose(x_nchw.reshape(n, c, hw), (1, 0, 2)).reshape(c, n * hw)
    l = x2d.shape[1]

    gb = jnp.stack(
        [gamma.astype(jnp.float32), beta.astype(jnp.float32)], axis=1)  # (C, 2)

    cb = _pick_channel_block(c, num_blocks=2)
    grid = (c // cb,)
    chunk = _pick_chunk(cb, l)

    kernel = functools.partial(
        _bn_kernel, eps=float(eps), inv_count=1.0 / float(n * hw), chunk=chunk)

    cost = pl.CostEstimate(
        flops=6 * n * c * hw,
        transcendentals=c,
        bytes_accessed=2 * x2d.size * x2d.dtype.itemsize + gb.size * 4,
    )

    out2d = pl.pallas_call(
        kernel,
        out_shape=jax.ShapeDtypeStruct((c, l), x2d.dtype),
        grid=grid,
        in_specs=[
            pl.BlockSpec((cb, l), lambda i: (i, 0)),
            pl.BlockSpec((cb, 2), lambda i: (i, 0)),
        ],
        out_specs=pl.BlockSpec((cb, l), lambda i: (i, 0)),
        compiler_params=pltpu.CompilerParams(
            dimension_semantics=("parallel",),
        ),
        cost_estimate=cost,
    )(x2d, gb)

    if n == 1:
        return out2d.reshape(n, c, h, w)
    return jnp.transpose(out2d.reshape(c, n, hw), (1, 0, 2)).reshape(n, c, h, w)


# TODO(synk): running_mean / running_var momentum updates (training-mode side
# effect of torch BatchNorm2d) are not produced; only the forward output is.


if __name__ == "__main__":
    # Shape implied by the module: x466 = randn([1, 1344, 14, 14]), C = 1344.
    N, C, H, W = 1, 1344, 14, 14
    key = jax.random.PRNGKey(0)
    kx, kg, kb, ko = jax.random.split(key, 4)

    # Non-centered, per-channel-shifted data so the two-pass variance path is
    # actually exercised (E[x^2]-E[x]^2 would cancel badly here).
    offs = 3.0 * jax.random.normal(ko, (1, C, 1, 1), dtype=jnp.float32)
    x = jax.random.normal(kx, (N, C, H, W), dtype=jnp.float32) + offs
    # PyTorch default init is gamma=1, beta=0; perturb so the affine path is
    # actually exercised.
    gamma = 1.0 + 0.1 * jax.random.normal(kg, (C,), dtype=jnp.float32)
    beta = 0.1 * jax.random.normal(kb, (C,), dtype=jnp.float32)

    out = batchnorm2d_pallas(x, gamma, beta, eps=1e-3)
    out = jax.block_until_ready(out)

    # Reference: training-mode batch statistics, like torch BatchNorm2d.forward.
    mean = jnp.mean(x, axis=(0, 2, 3), keepdims=True)
    var = jnp.mean((x - mean) ** 2, axis=(0, 2, 3), keepdims=True)
    ref = (x - mean) / jnp.sqrt(var + 1e-3) * gamma.reshape(1, C, 1, 1) \
        + beta.reshape(1, C, 1, 1)

    assert out.shape == (N, C, H, W)
    err = float(jnp.max(jnp.abs(out - ref)))
    assert err < 1e-3, f"mismatch vs reference: {err}"

    print("KERNEL_OK")
</pallas_src>

<mosaic_0001>
module attributes {stable_mosaic.version = 11 : i64} {
  func.func @_bn_kernel(%arg0: i32, %arg1: memref<672x196xf32, #tpu.memory_space<vmem>>, %arg2: memref<672x2xf32, #tpu.memory_space<vmem>>, %arg3: memref<672x196xf32, #tpu.memory_space<vmem>>) attributes {dimension_semantics = [#tpu.dimension_semantics<parallel>], iteration_bounds = array<i64: 2>, scalar_prefetch = 0 : i64, scratch_operands = 0 : i64, tpu.core_type = #tpu.core_type<tc>, window_params = [{transform_indices = @transform_0, window_bounds = array<i64: 672, 196>}, {transform_indices = @transform_1, window_bounds = array<i64: 672, 2>}, {transform_indices = @transform_2, window_bounds = array<i64: 672, 196>}]} {
    %c0_i32 = arith.constant 0 : i32
    %c112_i32 = arith.constant 112 : i32
    %0 = arith.muli %c0_i32, %c112_i32 : i32
    %1 = tpu.assume_multiple %0, 112 : i32
    %2 = arith.index_cast %1 : i32 to index
    %c0 = arith.constant 0 : index
    %3 = vector.load %arg1[%2, %c0] : memref<672x196xf32, #tpu.memory_space<vmem>>, vector<112x196xf32>
    %cst = arith.constant dense<0.000000e+00> : vector<112xf32>
    %4 = vector.multi_reduction <add>, %3, %cst [1] : vector<112x196xf32> to vector<112xf32>
    %5 = vector.shape_cast %4 : vector<112xf32> to vector<112x1xf32>
    %cst_0 = arith.constant 0.00510204071 : f32
    %6 = vector.broadcast %cst_0 : f32 to vector<112x1xf32>
    %7 = arith.mulf %5, %6 : vector<112x1xf32>
    %8 = vector.broadcast %7 : vector<112x1xf32> to vector<112x196xf32>
    %9 = arith.subf %3, %8 : vector<112x196xf32>
    %10 = arith.mulf %9, %9 : vector<112x196xf32>
    %cst_1 = arith.constant dense<0.000000e+00> : vector<112xf32>
    %11 = vector.multi_reduction <add>, %10, %cst_1 [1] : vector<112x196xf32> to vector<112xf32>
    %12 = vector.shape_cast %11 : vector<112xf32> to vector<112x1xf32>
    %cst_2 = arith.constant 0.00510204071 : f32
    %13 = vector.broadcast %cst_2 : f32 to vector<112x1xf32>
    %14 = arith.mulf %12, %13 : vector<112x1xf32>
    %cst_3 = arith.constant 1.000000e-03 : f32
    %15 = vector.broadcast %cst_3 : f32 to vector<112x1xf32>
    %16 = arith.addf %14, %15 : vector<112x1xf32>
    %17 = math.rsqrt %16 : vector<112x1xf32>
    %18 = arith.index_cast %1 : i32 to index
    %c0_4 = arith.constant 0 : index
    %19 = vector.load %arg2[%18, %c0_4] : memref<672x2xf32, #tpu.memory_space<vmem>>, vector<112x2xf32>
    %20 = vector.extract_strided_slice %19 {offsets = [0, 0], sizes = [112, 1], strides = [1, 1]} : vector<112x2xf32> to vector<112x1xf32>
    %21 = arith.mulf %20, %17 : vector<112x1xf32>
    %22 = vector.extract_strided_slice %19 {offsets = [0, 1], sizes = [112, 1], strides = [1, 1]} : vector<112x2xf32> to vector<112x1xf32>
    %23 = arith.mulf %7, %21 : vector<112x1xf32>
    %24 = arith.subf %22, %23 : vector<112x1xf32>
    %25 = vector.broadcast %21 : vector<112x1xf32> to vector<112x196xf32>
    %26 = arith.mulf %3, %25 : vector<112x196xf32>
    %27 = vector.broadcast %24 : vector<112x1xf32> to vector<112x196xf32>
    %28 = arith.addf %26, %27 : vector<112x196xf32>
    %29 = arith.index_cast %1 : i32 to index
    %c0_5 = arith.constant 0 : index
    %30 = vector.load %arg3[%29, %c0_5] : memref<672x196xf32, #tpu.memory_space<vmem>>, vector<112x196xf32>
    tpu.vector_store %arg3[%29, %c0_5], %28 {strides = array<i32>} : memref<672x196xf32, #tpu.memory_space<vmem>>, vector<112x196xf32>,
    %c1_i32 = arith.constant 1 : i32
    %c112_i32_6 = arith.constant 112 : i32
    %31 = arith.muli %c1_i32, %c112_i32_6 : i32
    %32 = tpu.assume_multiple %31, 112 : i32
    %33 = arith.index_cast %32 : i32 to index
    %c0_7 = arith.constant 0 : index
    %34 = vector.load %arg1[%33, %c0_7] : memref<672x196xf32, #tpu.memory_space<vmem>>, vector<112x196xf32>
    %cst_8 = arith.constant dense<0.000000e+00> : vector<112xf32>
    %35 = vector.multi_reduction <add>, %34, %cst_8 [1] : vector<112x196xf32> to vector<112xf32>
    %36 = vector.shape_cast %35 : vector<112xf32> to vector<112x1xf32>
    %cst_9 = arith.constant 0.00510204071 : f32
    %37 = vector.broadcast %cst_9 : f32 to vector<112x1xf32>
    %38 = arith.mulf %36, %37 : vector<112x1xf32>
    %39 = vector.broadcast %38 : vector<112x1xf32> to vector<112x196xf32>
    %40 = arith.subf %34, %39 : vector<112x196xf32>
    %41 = arith.mulf %40, %40 : vector<112x196xf32>
    %cst_10 = arith.constant dense<0.000000e+00> : vector<112xf32>
    %42 = vector.multi_reduction <add>, %41, %cst_10 [1] : vector<112x196xf32> to vector<112xf32>
    %43 = vector.shape_cast %42 : vector<112xf32> to vector<112x1xf32>
    %cst_11 = arith.constant 0.00510204071 : f32
    %44 = vector.broadcast %cst_11 : f32 to vector<112x1xf32>
    %45 = arith.mulf %43, %44 : vector<112x1xf32>
    %cst_12 = arith.constant 1.000000e-03 : f32
    %46 = vector.broadcast %cst_12 : f32 to vector<112x1xf32>
    %47 = arith.addf %45, %46 : vector<112x1xf32>
    %48 = math.rsqrt %47 : vector<112x1xf32>
    %49 = arith.index_cast %32 : i32 to index
    %c0_13 = arith.constant 0 : index
    %50 = vector.load %arg2[%49, %c0_13] : memref<672x2xf32, #tpu.memory_space<vmem>>, vector<112x2xf32>
    %51 = vector.extract_strided_slice %50 {offsets = [0, 0], sizes = [112, 1], strides = [1, 1]} : vector<112x2xf32> to vector<112x1xf32>
    %52 = arith.mulf %51, %48 : vector<112x1xf32>
    %53 = vector.extract_strided_slice %50 {offsets = [0, 1], sizes = [112, 1], strides = [1, 1]} : vector<112x2xf32> to vector<112x1xf32>
    %54 = arith.mulf %38, %52 : vector<112x1xf32>
    %55 = arith.subf %53, %54 : vector<112x1xf32>
    %56 = vector.broadcast %52 : vector<112x1xf32> to vector<112x196xf32>
    %57 = arith.mulf %34, %56 : vector<112x196xf32>
    %58 = vector.broadcast %55 : vector<112x1xf32> to vector<112x196xf32>
    %59 = arith.addf %57, %58 : vector<112x196xf32>
    %60 = arith.index_cast %32 : i32 to index
    %c0_14 = arith.constant 0 : index
    %61 = vector.load %arg3[%60, %c0_14] : memref<672x196xf32, #tpu.memory_space<vmem>>, vector<112x196xf32>
    tpu.vector_store %arg3[%60, %c0_14], %59 {strides = array<i32>} : memref<672x196xf32, #tpu.memory_space<vmem>>, vector<112x196xf32>,
    %c2_i32 = arith.constant 2 : i32
    %c112_i32_15 = arith.constant 112 : i32
    %62 = arith.muli %c2_i32, %c112_i32_15 : i32
    %63 = tpu.assume_multiple %62, 112 : i32
    %64 = arith.index_cast %63 : i32 to index
    %c0_16 = arith.constant 0 : index
    %65 = vector.load %arg1[%64, %c0_16] : memref<672x196xf32, #tpu.memory_space<vmem>>, vector<112x196xf32>
    %cst_17 = arith.constant dense<0.000000e+00> : vector<112xf32>
    %66 = vector.multi_reduction <add>, %65, %cst_17 [1] : vector<112x196xf32> to vector<112xf32>
    %67 = vector.shape_cast %66 : vector<112xf32> to vector<112x1xf32>
    %cst_18 = arith.constant 0.00510204071 : f32
    %68 = vector.broadcast %cst_18 : f32 to vector<112x1xf32>
    %69 = arith.mulf %67, %68 : vector<112x1xf32>
    %70 = vector.broadcast %69 : vector<112x1xf32> to vector<112x196xf32>
    %71 = arith.subf %65, %70 : vector<112x196xf32>
    %72 = arith.mulf %71, %71 : vector<112x196xf32>
    %cst_19 = arith.constant dense<0.000000e+00> : vector<112xf32>
    %73 = vector.multi_reduction <add>, %72, %cst_19 [1] : vector<112x196xf32> to vector<112xf32>
    %74 = vector.shape_cast %73 : vector<112xf32> to vector<112x1xf32>
    %cst_20 = arith.constant 0.00510204071 : f32
    %75 = vector.broadcast %cst_20 : f32 to vector<112x1xf32>
    %76 = arith.mulf %74, %75 : vector<112x1xf32>
    %cst_21 = arith.constant 1.000000e-03 : f32
    %77 = vector.broadcast %cst_21 : f32 to vector<112x1xf32>
    %78 = arith.addf %76, %77 : vector<112x1xf32>
    %79 = math.rsqrt %78 : vector<112x1xf32>
    %80 = arith.index_cast %63 : i32 to index
    %c0_22 = arith.constant 0 : index
    %81 = vector.load %arg2[%80, %c0_22] : memref<672x2xf32, #tpu.memory_space<vmem>>, vector<112x2xf32>
    %82 = vector.extract_strided_slice %81 {offsets = [0, 0], sizes = [112, 1], strides = [1, 1]} : vector<112x2xf32> to vector<112x1xf32>
    %83 = arith.mulf %82, %79 : vector<112x1xf32>
    %84 = vector.extract_strided_slice %81 {offsets = [0, 1], sizes = [112, 1], strides = [1, 1]} : vector<112x2xf32> to vector<112x1xf32>
    %85 = arith.mulf %69, %83 : vector<112x1xf32>
    %86 = arith.subf %84, %85 : vector<112x1xf32>
    %87 = vector.broadcast %83 : vector<112x1xf32> to vector<112x196xf32>
    %88 = arith.mulf %65, %87 : vector<112x196xf32>
    %89 = vector.broadcast %86 : vector<112x1xf32> to vector<112x196xf32>
    %90 = arith.addf %88, %89 : vector<112x196xf32>
    %91 = arith.index_cast %63 : i32 to index
    %c0_23 = arith.constant 0 : index
    %92 = vector.load %arg3[%91, %c0_23] : memref<672x196xf32, #tpu.memory_space<vmem>>, vector<112x196xf32>
    tpu.vector_store %arg3[%91, %c0_23], %90 {strides = array<i32>} : memref<672x196xf32, #tpu.memory_space<vmem>>, vector<112x196xf32>,
    %c3_i32 = arith.constant 3 : i32
    %c112_i32_24 = arith.constant 112 : i32
    %93 = arith.muli %c3_i32, %c112_i32_24 : i32
    %94 = tpu.assume_multiple %93, 112 : i32
    %95 = arith.index_cast %94 : i32 to index
    %c0_25 = arith.constant 0 : index
    %96 = vector.load %arg1[%95, %c0_25] : memref<672x196xf32, #tpu.memory_space<vmem>>, vector<112x196xf32>
    %cst_26 = arith.constant dense<0.000000e+00> : vector<112xf32>
    %97 = vector.multi_reduction <add>, %96, %cst_26 [1] : vector<112x196xf32> to vector<112xf32>
    %98 = vector.shape_cast %97 : vector<112xf32> to vector<112x1xf32>
    %cst_27 = arith.constant 0.00510204071 : f32
    %99 = vector.broadcast %cst_27 : f32 to vector<112x1xf32>
    %100 = arith.mulf %98, %99 : vector<112x1xf32>
    %101 = vector.broadcast %100 : vector<112x1xf32> to vector<112x196xf32>
    %102 = arith.subf %96, %101 : vector<112x196xf32>
    %103 = arith.mulf %102, %102 : vector<112x196xf32>
    %cst_28 = arith.constant dense<0.000000e+00> : vector<112xf32>
    %104 = vector.multi_reduction <add>, %103, %cst_28 [1] : vector<112x196xf32> to vector<112xf32>
    %105 = vector.shape_cast %104 : vector<112xf32> to vector<112x1xf32>
    %cst_29 = arith.constant 0.00510204071 : f32
    %106 = vector.broadcast %cst_29 : f32 to vector<112x1xf32>
    %107 = arith.mulf %105, %106 : vector<112x1xf32>
    %cst_30 = arith.constant 1.000000e-03 : f32
    %108 = vector.broadcast %cst_30 : f32 to vector<112x1xf32>
    %109 = arith.addf %107, %108 : vector<112x1xf32>
    %110 = math.rsqrt %109 : vector<112x1xf32>
    %111 = arith.index_cast %94 : i32 to index
    %c0_31 = arith.constant 0 : index
    %112 = vector.load %arg2[%111, %c0_31] : memref<672x2xf32, #tpu.memory_space<vmem>>, vector<112x2xf32>
    %113 = vector.extract_strided_slice %112 {offsets = [0, 0], sizes = [112, 1], strides = [1, 1]} : vector<112x2xf32> to vector<112x1xf32>
    %114 = arith.mulf %113, %110 : vector<112x1xf32>
    %115 = vector.extract_strided_slice %112 {offsets = [0, 1], sizes = [112, 1], strides = [1, 1]} : vector<112x2xf32> to vector<112x1xf32>
    %116 = arith.mulf %100, %114 : vector<112x1xf32>
    %117 = arith.subf %115, %116 : vector<112x1xf32>
    %118 = vector.broadcast %114 : vector<112x1xf32> to vector<112x196xf32>
    %119 = arith.mulf %96, %118 : vector<112x196xf32>
    %120 = vector.broadcast %117 : vector<112x1xf32> to vector<112x196xf32>
    %121 = arith.addf %119, %120 : vector<112x196xf32>
    %122 = arith.index_cast %94 : i32 to index
    %c0_32 = arith.constant 0 : index
    %123 = vector.load %arg3[%122, %c0_32] : memref<672x196xf32, #tpu.memory_space<vmem>>, vector<112x196xf32>
    tpu.vector_store %arg3[%122, %c0_32], %121 {strides = array<i32>} : memref<672x196xf32, #tpu.memory_space<vmem>>, vector<112x196xf32>,
    %c4_i32 = arith.constant 4 : i32
    %c112_i32_33 = arith.constant 112 : i32
    %124 = arith.muli %c4_i32, %c112_i32_33 : i32
    %125 = tpu.assume_multiple %124, 112 : i32
    %126 = arith.index_cast %125 : i32 to index
    %c0_34 = arith.constant 0 : index
    %127 = vector.load %arg1[%126, %c0_34] : memref<672x196xf32, #tpu.memory_space<vmem>>, vector<112x196xf32>
    %cst_35 = arith.constant dense<0.000000e+00> : vector<112xf32>
    %128 = vector.multi_reduction <add>, %127, %cst_35 [1] : vector<112x196xf32> to vector<112xf32>
    %129 = vector.shape_cast %128 : vector<112xf32> to vector<112x1xf32>
    %cst_36 = arith.constant 0.00510204071 : f32
    %130 = vector.broadcast %cst_36 : f32 to vector<112x1xf32>
    %131 = arith.mulf %129, %130 : vector<112x1xf32>
    %132 = vector.broadcast %131 : vector<112x1xf32> to vector<112x196xf32>
    %133 = arith.subf %127, %132 : vector<112x196xf32>
    %134 = arith.mulf %133, %133 : vector<112x196xf32>
    %cst_37 = arith.constant dense<0.000000e+00> : vector<112xf32>
    %135 = vector.multi_reduction <add>, %134, %cst_37 [1] : vector<112x196xf32> to vector<112xf32>
    %136 = vector.shape_cast %135 : vector<112xf32> to vector<112x1xf32>
    %cst_38 = arith.constant 0.00510204071 : f32
    %137 = vector.broadcast %cst_38 : f32 to vector<112x1xf32>
    %138 = arith.mulf %136, %137 : vector<112x1xf32>
    %cst_39 = arith.constant 1.000000e-03 : f32
    %139 = vector.broadcast %cst_39 : f32 to vector<112x1xf32>
    %140 = arith.addf %138, %139 : vector<112x1xf32>
    %141 = math.rsqrt %140 : vector<112x1xf32>
    %142 = arith.index_cast %125 : i32 to index
    %c0_40 = arith.constant 0 : index
    %143 = vector.load %arg2[%142, %c0_40] : memref<672x2xf32, #tpu.memory_space<vmem>>, vector<112x2xf32>
    %144 = vector.extract_strided_slice %143 {offsets = [0, 0], sizes = [112, 1], strides = [1, 1]} : vector<112x2xf32> to vector<112x1xf32>
    %145 = arith.mulf %144, %141 : vector<112x1xf32>
    %146 = vector.extract_strided_slice %143 {offsets = [0, 1], sizes = [112, 1], strides = [1, 1]} : vector<112x2xf32> to vector<112x1xf32>
    %147 = arith.mulf %131, %145 : vector<112x1xf32>
    %148 = arith.subf %146, %147 : vector<112x1xf32>
    %149 = vector.broadcast %145 : vector<112x1xf32> to vector<112x196xf32>
    %150 = arith.mulf %127, %149 : vector<112x196xf32>
    %151 = vector.broadcast %148 : vector<112x1xf32> to vector<112x196xf32>
    %152 = arith.addf %150, %151 : vector<112x196xf32>
    %153 = arith.index_cast %125 : i32 to index
    %c0_41 = arith.constant 0 : index
    %154 = vector.load %arg3[%153, %c0_41] : memref<672x196xf32, #tpu.memory_space<vmem>>, vector<112x196xf32>
    tpu.vector_store %arg3[%153, %c0_41], %152 {strides = array<i32>} : memref<672x196xf32, #tpu.memory_space<vmem>>, vector<112x196xf32>,
    %c5_i32 = arith.constant 5 : i32
    %c112_i32_42 = arith.constant 112 : i32
    %155 = arith.muli %c5_i32, %c112_i32_42 : i32
    %156 = tpu.assume_multiple %155, 112 : i32
    %157 = arith.index_cast %156 : i32 to index
    %c0_43 = arith.constant 0 : index
    %158 = vector.load %arg1[%157, %c0_43] : memref<672x196xf32, #tpu.memory_space<vmem>>, vector<112x196xf32>
    %cst_44 = arith.constant dense<0.000000e+00> : vector<112xf32>
    %159 = vector.multi_reduction <add>, %158, %cst_44 [1] : vector<112x196xf32> to vector<112xf32>
    %160 = vector.shape_cast %159 : vector<112xf32> to vector<112x1xf32>
    %cst_45 = arith.constant 0.00510204071 : f32
    %161 = vector.broadcast %cst_45 : f32 to vector<112x1xf32>
    %162 = arith.mulf %160, %161 : vector<112x1xf32>
    %163 = vector.broadcast %162 : vector<112x1xf32> to vector<112x196xf32>
    %164 = arith.subf %158, %163 : vector<112x196xf32>
    %165 = arith.mulf %164, %164 : vector<112x196xf32>
    %cst_46 = arith.constant dense<0.000000e+00> : vector<112xf32>
    %166 = vector.multi_reduction <add>, %165, %cst_46 [1] : vector<112x196xf32> to vector<112xf32>
    %167 = vector.shape_cast %166 : vector<112xf32> to vector<112x1xf32>
    %cst_47 = arith.constant 0.00510204071 : f32
    %168 = vector.broadcast %cst_47 : f32 to vector<112x1xf32>
    %169 = arith.mulf %167, %168 : vector<112x1xf32>
    %cst_48 = arith.constant 1.000000e-03 : f32
    %170 = vector.broadcast %cst_48 : f32 to vector<112x1xf32>
    %171 = arith.addf %169, %170 : vector<112x1xf32>
    %172 = math.rsqrt %171 : vector<112x1xf32>
    %173 = arith.index_cast %156 : i32 to index
    %c0_49 = arith.constant 0 : index
    %174 = vector.load %arg2[%173, %c0_49] : memref<672x2xf32, #tpu.memory_space<vmem>>, vector<112x2xf32>
    %175 = vector.extract_strided_slice %174 {offsets = [0, 0], sizes = [112, 1], strides = [1, 1]} : vector<112x2xf32> to vector<112x1xf32>
    %176 = arith.mulf %175, %172 : vector<112x1xf32>
    %177 = vector.extract_strided_slice %174 {offsets = [0, 1], sizes = [112, 1], strides = [1, 1]} : vector<112x2xf32> to vector<112x1xf32>
    %178 = arith.mulf %162, %176 : vector<112x1xf32>
    %179 = arith.subf %177, %178 : vector<112x1xf32>
    %180 = vector.broadcast %176 : vector<112x1xf32> to vector<112x196xf32>
    %181 = arith.mulf %158, %180 : vector<112x196xf32>
    %182 = vector.broadcast %179 : vector<112x1xf32> to vector<112x196xf32>
    %183 = arith.addf %181, %182 : vector<112x196xf32>
    %184 = arith.index_cast %156 : i32 to index
    %c0_50 = arith.constant 0 : index
    %185 = vector.load %arg3[%184, %c0_50] : memref<672x196xf32, #tpu.memory_space<vmem>>, vector<112x196xf32>
    tpu.vector_store %arg3[%184, %c0_50], %183 {strides = array<i32>} : memref<672x196xf32, #tpu.memory_space<vmem>>, vector<112x196xf32>,
    %c6_i32 = arith.constant 6 : i32
    return
  }
  func.func @transform_0(%arg0: i32) -> (i32, i32) {
    %c0_i32 = arith.constant 0 : i32
    %c0_i32_0 = arith.constant 0 : i32
    return %arg0, %c0_i32 : i32, i32
  }
  func.func @transform_1(%arg0: i32) -> (i32, i32) {
    %c0_i32 = arith.constant 0 : i32
    %c0_i32_0 = arith.constant 0 : i32
    return %arg0, %c0_i32 : i32, i32
  }
  func.func @transform_2(%arg0: i32) -> (i32, i32) {
    %c0_i32 = arith.constant 0 : i32
    %c0_i32_0 = arith.constant 0 : i32
    return %arg0, %c0_i32 : i32, i32
  }
}

</mosaic_0001>

<bundles_post_ra>
// kernel: tpu_custom_call.1
= control target key start
LH: loop header
LB: loop body
LE: loop exit
PB: predicated region body
PF: predicated region fallthrough
CT: control target
= control target key end

     0   :  { %s4637_s9 = smov 0   ;;  %s7799_s0 = inlined_call_operand.vmem [shape: f32[1344,196], index: 0, kind: input, shape index: {}]   ;;  %s7800_s1 = inlined_call_operand.vmem [shape: f32[1344,2], index: 1, kind: input, shape index: {}]   ;;  %s7801_s2 = inlined_call_operand.vmem [shape: f32[1344,196], index: 2, kind: output, shape index: {}]  }
   0x1 LB: > { %s3818_s10 = sadd.s32 4294967295, %s4617_s9   ;;  %p3822_p0 = scmp.ge.s32.totalorder %s4617_s9, 1  ;;  %s4617_s9 = sphi %s4637_s9, %s12_s9  }
   0x2   : > { %p125_p1 = scmp.lt.s32.totalorder %s4617_s9, 3 }
   0x4   : > { %p126_p2 = pnand %p3822_p0, %p125_p1 }
   0x6   : > { %129 = sbr.rel (%p126_p2) target bundleno = 2061 (0x80d), region = 28 }
   0xd   : > { %s154_s11 = smul.u32 84, %s3818_s10  ;;  %vm205_vm0 = vcmask 556032   ;;  %s4619_s20 = smov 1  }
   0xf   : > { %p155_p3 = scmp.lt.s32.totalorder %s154_s11, 167 }
  0x11   : > { %s8269_s11 = smov (!%p155_p3, %s154_s11), 167 }
  0x12   : > { %s4180_s12 = sshll.u32 %s8269_s11, 4  ;;  %s3825_s16 = sshll.u32 %s8269_s11, 3 }
  0x13   : > { %s4653_s15 = scalar_lea.vmem %s7799_s0, %s4180_s12  ;;  %s5396_s19 = scalar_lea.vmem %s7800_s1, %s3825_s16 }
  0x14   : > { %v4656_v0 = vld [vmem:[%s4653_s15] sm:$0xff]  ;;  %v4659_v1 = vld [vmem:[%s4653_s15 + $0x8] sm:$0xff]  ;;  %v4670_v5 = vld [vmem:[%s4653_s15 + $0x10] sm:$0xff]  ;;  %s6968_s23 = scalar_lea.vmem %s7801_s2, %s4180_s12 }
  0x15   : > { %v4662_v2 = vld [vmem:[%s4653_s15 + $0x20] sm:$0xff]  ;;  %v206_v3 = vsel %vm205_vm0, %v4659_v1, 0.0  ;;  %v4667_v4 = vld [vmem:[%s4653_s15 + $0x28] sm:$0xff]  ;;  %v4673_v6 = vld [vmem:[%s4653_s15 + $0x18] sm:$0xff] }
  0x16   : > { %v207_v7 = vadd.f32 %v206_v3, %v4656_v0  ;;  %v214_v8 = vsel %vm205_vm0, %v4667_v4, 0.0  ;;  %v210_v9 = vsel %vm205_vm0, %v4673_v6, 0.0  ;;  %v4681_v10 = vld [vmem:[%s4653_s15 + $0x30] sm:$0xff]  ;;  %v4684_v11 = vld [vmem:[%s4653_s15 + $0x38] sm:$0xff]  ;;  %v4690_v14 = vld [vmem:[%s4653_s15 + $0x48] sm:$0xff] }
  0x17   : > { %v215_v12 = vadd.f32 %v214_v8, %v4662_v2  ;;  %v218_v13 = vsel %vm205_vm0, %v4684_v11, 0.0  ;;  %v4693_v15 = vld [vmem:[%s4653_s15 + $0x58] sm:$0xff]  ;;  %v211_v16 = vadd.f32 %v210_v9, %v4670_v5  ;;  %v4698_v18 = vld [vmem:[%s4653_s15 + $0x40] sm:$0xff]  ;;  %v222_v19 = vsel %vm205_vm0, %v4690_v14, 0.0  ;;  %v4703_v20 = vld [vmem:[%s4653_s15 + $0x50] sm:$0xff] }
  0x18   : > { %208 = vadd.xlane.f32.xlu0 %v207_v7  ;;  %v219_v17 = vadd.f32 %v218_v13, %v4681_v10  ;;  %v226_v21 = vsel %vm205_vm0, %v4693_v15, 0.0  ;;  %v4708_v22 = vld [vmem:[%s4653_s15 + $0x68] sm:$0xff]  ;;  %v4711_v23 = vld [vmem:[%s4653_s15 + $0x78] sm:$0xff]  ;;  %v223_v24 = vadd.f32 %v222_v19, %v4698_v18  ;;  %v4716_v26 = vld [vmem:[%s4653_s15 + $0x60] sm:$0xff] }
  0x19   : > { %216 = vadd.xlane.f32.xlu1 %v215_v12  ;;  %v227_v25 = vadd.f32 %v226_v21, %v4703_v20  ;;  %v230_v27 = vsel %vm205_vm0, %v4708_v22, 0.0  ;;  %v4721_v28 = vld [vmem:[%s4653_s15 + $0x70] sm:$0xff]  ;;  %v234_v29 = vsel %vm205_vm0, %v4711_v23, 0.0  ;;  %v4726_v30 = vld [vmem:[%s4653_s15 + $0x88] sm:$0xff]  ;;  %v4729_v31 = vld [vmem:[%s4653_s15 + $0x98] sm:$0xff] }
  0x1a   : > { %v231_v32 = vadd.f32 %v230_v27, %v4716_v26  ;;  %v235_v33 = vadd.f32 %v234_v29, %v4721_v28  ;;  %v4734_v34 = vld [vmem:[%s4653_s15 + $0x80] sm:$0xff]  ;;  %v238_v35 = vsel %vm205_vm0, %v4726_v30, 0.0  ;;  %v4739_v36 = vld [vmem:[%s4653_s15 + $0x90] sm:$0xff]  ;;  %v242_v37 = vsel %vm205_vm0, %v4729_v31, 0.0  ;;  %v4744_v38 = vld [vmem:[%s4653_s15 + $0xa8] sm:$0xff] }
  0x1b   : > { %v4747_v39 = vld [vmem:[%s4653_s15 + $0xb8] sm:$0xff]  ;;  %v239_v40 = vadd.f32 %v238_v35, %v4734_v34  ;;  %v243_v41 = vadd.f32 %v242_v37, %v4739_v36  ;;  %v4752_v42 = vld [vmem:[%s4653_s15 + $0xa0] sm:$0xff]  ;;  %v246_v43 = vsel %vm205_vm0, %v4744_v38, 0.0  ;;  %v4757_v44 = vld [vmem:[%s4653_s15 + $0xb0] sm:$0xff] }
  0x1c   : > { %212 = vadd.xlane.f32.xlu0 %v211_v16  ;;  %v250_v45 = vsel %vm205_vm0, %v4747_v39, 0.0  ;;  %v4762_v46 = vld [vmem:[%s4653_s15 + $0xc8] sm:$0xff]  ;;  %v4765_v47 = vld [vmem:[%s4653_s15 + $0xd8] sm:$0xff]  ;;  %v247_v48 = vadd.f32 %v246_v43, %v4752_v42  ;;  %v4770_v50 = vld [vmem:[%s4653_s15 + $0xc0] sm:$0xff] }
  0x1d   : > { %220 = vadd.xlane.f32.xlu1 %v219_v17  ;;  %v251_v49 = vadd.f32 %v250_v45, %v4757_v44  ;;  %v254_v51 = vsel %vm205_vm0, %v4762_v46, 0.0  ;;  %v4775_v52 = vld [vmem:[%s4653_s15 + $0xd0] sm:$0xff]  ;;  %v258_v53 = vsel %vm205_vm0, %v4765_v47, 0.0  ;;  %v4780_v54 = vld [vmem:[%s4653_s15 + $0xe8] sm:$0xff]  ;;  %v4783_v55 = vld [vmem:[%s4653_s15 + $0xf8] sm:$0xff] }
  0x1e   : > { %v255_v56 = vadd.f32 %v254_v51, %v4770_v50  ;;  %v259_v57 = vadd.f32 %v258_v53, %v4775_v52  ;;  %v4788_v58 = vld [vmem:[%s4653_s15 + $0xe0] sm:$0xff]  ;;  %v799_v59 = vsel %vm205_vm0, %v4780_v54, 0.0  ;;  %v4793_v60 = vld [vmem:[%s4653_s15 + $0xf0] sm:$0xff]  ;;  %v803_v61 = vsel %vm205_vm0, %v4783_v55, 0.0  ;;  %v4798_v62 = vld [vmem:[%s4653_s15 + $0x108] sm:$0xff] }
  0x1f   : > { %v4801_v63 = vld [vmem:[%s4653_s15 + $0x138] sm:$0xff]  ;;  %v800_v3 = vadd.f32 %v4788_v58, %v799_v59  ;;  %v804_v7 = vadd.f32 %v4793_v60, %v803_v61  ;;  %v4806_v8 = vld [vmem:[%s4653_s15 + $0x100] sm:$0xff]  ;;  %v807_v9 = vsel %vm205_vm0, %v4798_v62, 0.0  ;;  %v4814_v13 = vld [vmem:[%s4653_s15 + $0x130] sm:$0xff] }
  0x20   : > { %224 = vadd.xlane.f32.xlu0 %v223_v24  ;;  %v4811_v12 = vld [vmem:[%s4653_s15 + $0x118] sm:$0xff]  ;;  %v819_v16 = vsel %vm205_vm0, %v4801_v63, 0.0  ;;  %v808_v19 = vadd.f32 %v4806_v8, %v807_v9  ;;  %v4823_v21 = vld [vmem:[%s4653_s15 + $0x110] sm:$0xff]  ;;  %v4829_v27 = vld [vmem:[%s4653_s15 + $0x128] sm:$0xff] }
  0x21   : > { %228 = vadd.xlane.f32.xlu1 %v227_v25  ;;  %v4819_v17 = vld [vmem:[%s4653_s15 + $0x158] sm:$0xff]  ;;  %v811_v24 = vsel %vm205_vm0, %v4811_v12, 0.0  ;;  %v820_v25 = vadd.f32 %v4814_v13, %v819_v16  ;;  %v4832_v29 = vld [vmem:[%s4653_s15 + $0x150] sm:$0xff]  ;;  %v4841_v37 = vld [vmem:[%s4653_s15 + $0x120] sm:$0xff] }
  0x22   : > { %v812_v35 = vadd.f32 %v4823_v21, %v811_v24  ;;  %v4847_v43 = vld [vmem:[%s4653_s15 + $0x148] sm:$0xff]  ;;  %v4850_v45 = vld [vmem:[%s4653_s15 + $0x170] sm:$0xff]  ;;  %v4859_v53 = vld [vmem:[%s4653_s15 + $0x140] sm:$0xff] }
  0x23   : > { %v4865_v59 = vld [vmem:[%s4653_s15 + $0x168] sm:$0xff]  ;;  %v4868_v61 = vld [vmem:[%s4653_s15 + $0x190] sm:$0xff]  ;;  %v4877_v16 = vld [vmem:[%s4653_s15 + $0x160] sm:$0xff] }
  0x24   : > { %232 = vadd.xlane.f32.xlu0 %v231_v32  ;;  %v827_v32 = vsel %vm205_vm0, %v4819_v17, 0.0  ;;  %7914 = vst [vmem:[#allocation2_spill] sm:$0xff] %v4865_v59 }
  0x25   : > { %236 = vadd.xlane.f32.xlu1 %v235_v33  ;;  %v4837_v33 = vld [vmem:[%s4653_s15 + $0x178] sm:$0xff] }
  0x28   : > { %240 = vadd.xlane.f32.xlu0 %v239_v40  ;;  %v815_v40 = vsel %vm205_vm0, %v4829_v27, 0.0 }
  0x29   : > { %244 = vadd.xlane.f32.xlu1 %v243_v41  ;;  %v828_v41 = vadd.f32 %v4832_v29, %v827_v32  ;;  %v816_v51 = vadd.f32 %v4841_v37, %v815_v40  ;;  %v4886_v32 = vld [vmem:[%s4653_s15 + $0x1b0] sm:$0xff] }
  0x2a   : > { %7917 = vst [vmem:[#allocation5_spill] sm:$0xff] %v4886_v32 }
  0x2c   : > { %248 = vadd.xlane.f32.xlu0 %v247_v48  ;;  %v835_v48 = vsel %vm205_vm0, %v4837_v33, 0.0 }
  0x2d   : > { %252 = vadd.xlane.f32.xlu1 %v251_v49  ;;  %v4855_v49 = vld [vmem:[%s4653_s15 + $0x198] sm:$0xff] }
  0x30   : > { %256 = vadd.xlane.f32.xlu0 %v255_v56  ;;  %v823_v56 = vsel %vm205_vm0, %v4847_v43, 0.0 }
  0x31   : > { %260 = vadd.xlane.f32.xlu1 %v259_v57  ;;  %v836_v57 = vadd.f32 %v4850_v45, %v835_v48  ;;  %v824_v9 = vadd.f32 %v4859_v53, %v823_v56  ;;  %v4898_v56 = vld [vmem:[%s4653_s15 + $0x1a8] sm:$0xff] }
  0x32   : > { %7919 = vst [vmem:[#allocation7_spill] sm:$0xff] %v4898_v56 }
  0x34   : > { %801 = vadd.xlane.f32.xlu0 %v800_v3  ;;  %v843_v3 = vsel %vm205_vm0, %v4855_v49, 0.0 }
  0x35   : > { %805 = vadd.xlane.f32.xlu1 %v804_v7  ;;  %v4873_v7 = vld [vmem:[%s4653_s15 + $0x1b8] sm:$0xff]  ;;  %v844_v24 = vadd.f32 %v4868_v61, %v843_v3  ;;  %v4902_v3 = vld [vmem:[%s4653_s15 + $0x1a0] sm:$0xff] }
  0x36   : > { %7915 = vst [vmem:[#allocation3_spill] sm:$0xff] %v4873_v7  ;;  %7920 = vst [vmem:[#allocation8_spill] sm:$0xff] %v4902_v3 }
  0x38   : > { %809 = vadd.xlane.f32.xlu0 %v808_v19  ;;  %v831_v19 = vsel %vm205_vm0, %v4865_v59, 0.0 }
  0x39   : > { %821 = vadd.xlane.f32.xlu1 %v820_v25  ;;  %v4883_v25 = vld [vmem:[%s4653_s15 + $0x188] sm:$0xff]  ;;  %v832_v40 = vadd.f32 %v4877_v16, %v831_v19 }
  0x3a   : > { %7916 = vst [vmem:[#allocation4_spill] sm:$0xff] %v4883_v25  ;;  %v839_v48 = vsel %vm205_vm0, %v4883_v25, 0.0 }
  0x3c   : > { %813 = vadd.xlane.f32.xlu0 %v812_v35  ;;  %v851_v35 = vsel %vm205_vm0, %v4873_v7, 0.0 }
  0x3d   : > { %829 = vadd.xlane.f32.xlu1 %v828_v41  ;;  %v4892_v41 = vld [vmem:[%s4653_s15 + $0x180] sm:$0xff] }
  0x3e   : > { %7918 = vst [vmem:[#allocation6_spill] sm:$0xff] %v4892_v41 }
  0x40   : > { %817 = vadd.xlane.f32.xlu0 %v816_v51  ;;  %v852_v51 = vadd.f32 %v4886_v32, %v851_v35 }
  0x41   : > { %837 = vadd.xlane.f32.xlu1 %v836_v57  ;;  %v840_v57 = vadd.f32 %v4892_v41, %v839_v48 }
  0x44   : > { %825 = vadd.xlane.f32.xlu0 %v824_v9  ;;  %v847_v9 = vsel %vm205_vm0, %v4898_v56, 0.0 }
  0x45   : > { %845 = vadd.xlane.f32.xlu1 %v844_v24  ;;  %v848_v19 = vadd.f32 %v4902_v3, %v847_v9 }
  0x48   : > { %833 = vadd.xlane.f32.xlu0 %v832_v40 }
  0x49   : > { %853 = vadd.xlane.f32.xlu1 %v852_v51 }
  0x4c   : > { %841 = vadd.xlane.f32.xlu0 %v840_v57 }
  0x50   : > { %849 = vadd.xlane.f32.xlu0 %v848_v19 }
  0xa5   : > { %v209_v24 = vpop.xlane.xlu0 %208 }
  0xa6   : > { %v4907_v7 = vmul.f32 0.0051020407, %v209_v24  ;;  %v217_v25 = vpop.xlane.xlu1 %216 }
  0xa7   : > { %v4909_v35 = vmul.f32 0.0051020407, %v217_v25 }
  0xa8   : > { %7921 = vst [vmem:[#allocation9_spill] sm:$0xff] %v4907_v7  ;;  %v276_v40 = vsub.f32 %v4656_v0, %v4907_v7  ;;  %v277_v48 = vsub.f32 %v4659_v1, %v4907_v7 }
  0xa9   : > { %7922 = vst [vmem:[#allocation10_spill] sm:$0xff] %v4909_v35  ;;  %v213_v51 = vpop.xlane.xlu0 %212  ;;  %v280_v56 = vsub.f32 %v4662_v2, %v4909_v35  ;;  %v281_v57 = vsub.f32 %v4667_v4, %v4909_v35 }
  0xaa   : > { %v4919_v9 = vmul.f32 0.0051020407, %v213_v51  ;;  %v221_v19 = vpop.xlane.xlu1 %220  ;;  %v304_v24 = vmul.f32 %v276_v40, %v276_v40  ;;  %v305_v3 = vmul.f32 %v277_v48, %v277_v48 }
  0xab   : > { %v4921_v25 = vmul.f32 0.0051020407, %v221_v19  ;;  %v308_v41 = vmul.f32 %v280_v56, %v280_v56  ;;  %v309_v32 = vmul.f32 %v281_v57, %v281_v57 }
  0xac   : > { %v332_v0 = vsel %vm205_vm0, %v305_v3, 0.0  ;;  %v278_v1 = vsub.f32 %v4670_v5, %v4919_v9  ;;  %v279_v2 = vsub.f32 %v4673_v6, %v4919_v9 }
  0xad   : > { %v225_v7 = vpop.xlane.xlu0 %224  ;;  %v333_v59 = vadd.f32 %v332_v0, %v304_v24  ;;  %v340_v4 = vsel %vm205_vm0, %v309_v32, 0.0  ;;  %v282_v40 = vsub.f32 %v4681_v10, %v4921_v25  ;;  %v283_v48 = vsub.f32 %v4684_v11, %v4921_v25 }
  0xae   : > { %v4933_v56 = vmul.f32 0.0051020407, %v225_v7  ;;  %v229_v51 = vpop.xlane.xlu1 %228  ;;  %v306_v3 = vmul.f32 %v278_v1, %v278_v1  ;;  %v307_v57 = vmul.f32 %v279_v2, %v279_v2  ;;  %v341_v19 = vadd.f32 %v340_v4, %v308_v41 }
  0xaf   : > { %334 = vadd.xlane.f32.xlu0 %v333_v59  ;;  %v4935_v5 = vmul.f32 0.0051020407, %v229_v51  ;;  %v310_v6 = vmul.f32 %v282_v40, %v282_v40  ;;  %v311_v35 = vmul.f32 %v283_v48, %v283_v48 }
  0xb0   : > { %v336_v24 = vsel %vm205_vm0, %v307_v57, 0.0  ;;  %v284_v32 = vsub.f32 %v4698_v18, %v4933_v56  ;;  %v285_v10 = vsub.f32 %v4690_v14, %v4933_v56 }
  0xb1   : > { %7923 = vst [vmem:[#allocation11_spill] sm:$0xff] %v4935_v5  ;;  %v233_v11 = vpop.xlane.xlu0 %232  ;;  %v337_v7 = vadd.f32 %v336_v24, %v306_v3  ;;  %v344_v0 = vsel %vm205_vm0, %v311_v35, 0.0  ;;  %v286_v59 = vsub.f32 %v4703_v20, %v4935_v5  ;;  %v287_v41 = vsub.f32 %v4693_v15, %v4935_v5 }
  0xb2   : > { %v4947_v1 = vmul.f32 0.0051020407, %v233_v11  ;;  %v237_v2 = vpop.xlane.xlu1 %236  ;;  %v312_v4 = vmul.f32 %v284_v32, %v284_v32  ;;  %v313_v40 = vmul.f32 %v285_v10, %v285_v10  ;;  %v345_v14 = vadd.f32 %v344_v0, %v310_v6 }
  0xb3   : > { %342 = vadd.xlane.f32.xlu0 %v341_v19  ;;  %338 = vadd.xlane.f32.xlu1 %v337_v7  ;;  %v4949_v18 = vmul.f32 0.0051020407, %v237_v2  ;;  %v314_v48 = vmul.f32 %v286_v59, %v286_v59  ;;  %v315_v51 = vmul.f32 %v287_v41, %v287_v41 }
  0xb4   : > { %7924 = vst [vmem:[#allocation12_spill] sm:$0xff] %v4947_v1  ;;  %v348_v35 = vsel %vm205_vm0, %v313_v40, 0.0  ;;  %v288_v20 = vsub.f32 %v4716_v26, %v4947_v1  ;;  %v289_v15 = vsub.f32 %v4708_v22, %v4947_v1 }
  0xb5   : > { %7925 = vst [vmem:[#allocation13_spill] sm:$0xff] %v4949_v18  ;;  %v241_v3 = vpop.xlane.xlu0 %240  ;;  %v349_v57 = vadd.f32 %v348_v35, %v312_v4  ;;  %v352_v24 = vsel %vm205_vm0, %v315_v51, 0.0  ;;  %v290_v19 = vsub.f32 %v4721_v28, %v4949_v18  ;;  %v291_v6 = vsub.f32 %v4711_v23, %v4949_v18 }
  0xb6   : > { %v4961_v32 = vmul.f32 0.0051020407, %v241_v3  ;;  %v245_v10 = vpop.xlane.xlu1 %244  ;;  %v316_v11 = vmul.f32 %v288_v20, %v288_v20  ;;  %v317_v7 = vmul.f32 %v289_v15, %v289_v15  ;;  %v353_v22 = vadd.f32 %v352_v24, %v314_v48 }
  0xb7   : > { %346 = vadd.xlane.f32.xlu1 %v345_v14  ;;  %350 = vadd.xlane.f32.xlu0 %v349_v57  ;;  %v4963_v26 = vmul.f32 0.0051020407, %v245_v10  ;;  %v318_v0 = vmul.f32 %v290_v19, %v290_v19  ;;  %v319_v59 = vmul.f32 %v291_v6, %v291_v6 }
  0xb8   : > { %7926 = vst [vmem:[#allocation14_spill] sm:$0xff] %v4961_v32  ;;  %v356_v41 = vsel %vm205_vm0, %v317_v7, 0.0  ;;  %v292_v28 = vsub.f32 %v4734_v34, %v4961_v32  ;;  %v293_v23 = vsub.f32 %v4726_v30, %v4961_v32 }
  0xb9   : > { %7927 = vst [vmem:[#allocation15_spill] sm:$0xff] %v4963_v26  ;;  %v249_v2 = vpop.xlane.xlu0 %248  ;;  %v357_v4 = vadd.f32 %v356_v41, %v316_v11  ;;  %v360_v40 = vsel %vm205_vm0, %v319_v59, 0.0  ;;  %v294_v14 = vsub.f32 %v4739_v36, %v4963_v26  ;;  %v295_v48 = vsub.f32 %v4729_v31, %v4963_v26 }
  0xba   : > { %v4975_v51 = vmul.f32 0.0051020407, %v249_v2  ;;  %v253_v35 = vpop.xlane.xlu1 %252  ;;  %v320_v20 = vmul.f32 %v292_v28, %v292_v28  ;;  %v321_v15 = vmul.f32 %v293_v23, %v293_v23  ;;  %v361_v30 = vadd.f32 %v360_v40, %v318_v0 }
  0xbb   : > { %354 = vadd.xlane.f32.xlu1 %v353_v22  ;;  %358 = vadd.xlane.f32.xlu0 %v357_v4  ;;  %v4977_v34 = vmul.f32 0.0051020407, %v253_v35  ;;  %v322_v3 = vmul.f32 %v294_v14, %v294_v14  ;;  %v323_v57 = vmul.f32 %v295_v48, %v295_v48 }
  0xbc   : > { %7928 = vst [vmem:[#allocation16_spill] sm:$0xff] %v4975_v51  ;;  %v364_v24 = vsel %vm205_vm0, %v321_v15, 0.0  ;;  %v296_v36 = vsub.f32 %v4752_v42, %v4975_v51  ;;  %v297_v31 = vsub.f32 %v4744_v38, %v4975_v51 }
  0xbd   : > { %7929 = vst [vmem:[#allocation17_spill] sm:$0xff] %v4977_v34  ;;  %v257_v19 = vpop.xlane.xlu0 %256  ;;  %v365_v6 = vadd.f32 %v364_v24, %v320_v20  ;;  %v368_v10 = vsel %vm205_vm0, %v323_v57, 0.0  ;;  %v298_v11 = vsub.f32 %v4757_v44, %v4977_v34  ;;  %v299_v7 = vsub.f32 %v4747_v39, %v4977_v34 }
  0xbe   : > { %v4989_v22 = vmul.f32 0.0051020407, %v257_v19  ;;  %v261_v0 = vpop.xlane.xlu1 %260  ;;  %v324_v59 = vmul.f32 %v296_v36, %v296_v36  ;;  %v325_v41 = vmul.f32 %v297_v31, %v297_v31  ;;  %v369_v38 = vadd.f32 %v368_v10, %v322_v3 }
  0xbf   : > { %362 = vadd.xlane.f32.xlu1 %v361_v30  ;;  %366 = vadd.xlane.f32.xlu0 %v365_v6  ;;  %v4991_v42 = vmul.f32 0.0051020407, %v261_v0  ;;  %v326_v28 = vmul.f32 %v298_v11, %v298_v11  ;;  %v327_v23 = vmul.f32 %v299_v7, %v299_v7 }
  0xc0   : > { %7930 = vst [vmem:[#allocation18_spill] sm:$0xff] %v4989_v22  ;;  %v372_v2 = vsel %vm205_vm0, %v325_v41, 0.0  ;;  %v300_v44 = vsub.f32 %v4770_v50, %v4989_v22  ;;  %v301_v39 = vsub.f32 %v4762_v46, %v4989_v22 }
  0xc1   : > { %7931 = vst [vmem:[#allocation19_spill] sm:$0xff] %v4991_v42  ;;  %v802_v4 = vpop.xlane.xlu0 %801  ;;  %v373_v40 = vadd.f32 %v372_v2, %v324_v59  ;;  %v376_v14 = vsel %vm205_vm0, %v327_v23, 0.0  ;;  %v302_v48 = vsub.f32 %v4775_v52, %v4991_v42  ;;  %v303_v35 = vsub.f32 %v4765_v47, %v4991_v42 }
  0xc2   : > { %v5003_v20 = vmul.f32 0.0051020407, %v802_v4  ;;  %v806_v15 = vpop.xlane.xlu1 %805  ;;  %v328_v30 = vmul.f32 %v300_v44, %v300_v44  ;;  %v329_v3 = vmul.f32 %v301_v39, %v301_v39  ;;  %v377_v46 = vadd.f32 %v376_v14, %v326_v28 }
  0xc3   : > { %370 = vadd.xlane.f32.xlu1 %v369_v38  ;;  %374 = vadd.xlane.f32.xlu0 %v373_v40  ;;  %v5005_v50 = vmul.f32 0.0051020407, %v806_v15  ;;  %v330_v57 = vmul.f32 %v302_v48, %v302_v48  ;;  %v331_v24 = vmul.f32 %v303_v35, %v303_v35 }
  0xc4   : > { %7932 = vst [vmem:[#allocation20_spill] sm:$0xff] %v5003_v20  ;;  %v380_v36 = vsel %vm205_vm0, %v329_v3, 0.0  ;;  %v869_v52 = vsub.f32 %v4788_v58, %v5003_v20  ;;  %v870_v47 = vsub.f32 %v4780_v54, %v5003_v20 }
  0xc5   : > { %7933 = vst [vmem:[#allocation21_spill] sm:$0xff] %v5005_v50  ;;  %v810_v31 = vpop.xlane.xlu0 %809  ;;  %v381_v19 = vadd.f32 %v380_v36, %v328_v30  ;;  %v384_v6 = vsel %vm205_vm0, %v331_v24, 0.0  ;;  %v871_v10 = vsub.f32 %v4793_v60, %v5005_v50  ;;  %v872_v11 = vsub.f32 %v4783_v55, %v5005_v50 }
  0xc6   : > { %v5017_v7 = vmul.f32 0.0051020407, %v810_v31  ;;  %v897_v0 = vmul.f32 %v869_v52, %v869_v52  ;;  %v898_v59 = vmul.f32 %v870_v47, %v870_v47  ;;  %v822_v41 = vpop.xlane.xlu1 %821  ;;  %v385_v58 = vadd.f32 %v384_v6, %v330_v57 }
  0xc7   : > { %378 = vadd.xlane.f32.xlu1 %v377_v46  ;;  %382 = vadd.xlane.f32.xlu0 %v381_v19  ;;  %v5019_v38 = vmul.f32 0.0051020407, %v822_v41  ;;  %v899_v54 = vmul.f32 %v871_v10, %v871_v10  ;;  %v900_v28 = vmul.f32 %v872_v11, %v872_v11 }
  0xc8   : > { %7934 = vst [vmem:[#allocation22_spill] sm:$0xff] %v5017_v7  ;;  %v925_v23 = vsel %vm205_vm0, %v898_v59, 0.0  ;;  %v873_v60 = vsub.f32 %v4806_v8, %v5017_v7  ;;  %v874_v55 = vsub.f32 %v4798_v62, %v5017_v7 }
  0xc9   : > { %7935 = vst [vmem:[#allocation23_spill] sm:$0xff] %v5019_v38  ;;  %v814_v2 = vpop.xlane.xlu0 %813  ;;  %v926_v44 = vadd.f32 %v925_v23, %v897_v0  ;;  %v929_v39 = vsel %vm205_vm0, %v900_v28, 0.0  ;;  %v880_v4 = vsub.f32 %v4801_v63, %v5019_v38  ;;  %v879_v62 = vsub.f32 %v4814_v13, %v5019_v38 }
  0xca   : > { %v5029_v40 = vmul.f32 0.0051020407, %v814_v2  ;;  %v901_v14 = vmul.f32 %v873_v60, %v873_v60  ;;  %v902_v48 = vmul.f32 %v874_v55, %v874_v55  ;;  %v830_v35 = vpop.xlane.xlu1 %829  ;;  %v930_v15 = vadd.f32 %v929_v39, %v899_v54 }
  0xcb   : > { %386 = vadd.xlane.f32.xlu1 %v385_v58  ;;  %927 = vadd.xlane.f32.xlu0 %v926_v44  ;;  %v5031_v30 = vmul.f32 0.0051020407, %v830_v35  ;;  %v908_v46 = vmul.f32 %v880_v4, %v880_v4  ;;  %v907_v6 = vmul.f32 %v879_v62, %v879_v62 }
  0xcc   : > { %7936 = vst [vmem:[#allocation24_spill] sm:$0xff] %v5029_v40  ;;  %v933_v8 = vsel %vm205_vm0, %v902_v48, 0.0  ;;  %v875_v3 = vsub.f32 %v4823_v21, %v5029_v40  ;;  %v876_v63 = vsub.f32 %v4811_v12, %v5029_v40 }
  0xcd   : > { %7937 = vst [vmem:[#allocation25_spill] sm:$0xff] %v5031_v30  ;;  %v818_v57 = vpop.xlane.xlu0 %817  ;;  %v934_v24 = vadd.f32 %v933_v8, %v901_v14  ;;  %v884_v36 = vsub.f32 %v4819_v17, %v5031_v30  ;;  %v883_v13 = vsub.f32 %v4832_v29, %v5031_v30  ;;  %v945_v11 = vsel %vm205_vm0, %v908_v46, 0.0 }
  0xce   : > { %v5042_v52 = vmul.f32 0.0051020407, %v818_v57  ;;  %v903_v47 = vmul.f32 %v875_v3, %v875_v3  ;;  %v904_v31 = vmul.f32 %v876_v63, %v876_v63  ;;  %v838_v19 = vpop.xlane.xlu1 %837  ;;  %v946_v55 = vadd.f32 %v945_v11, %v907_v6 }
  0xcf   : > { %931 = vadd.xlane.f32.xlu1 %v930_v15  ;;  %935 = vadd.xlane.f32.xlu0 %v934_v24  ;;  %v5046_v21 = vmul.f32 0.0051020407, %v838_v19  ;;  %v912_v12 = vmul.f32 %v884_v36, %v884_v36  ;;  %v911_v60 = vmul.f32 %v883_v13, %v883_v13  ;;  %v7944_v36 = vld [vmem:[#allocation2_spill] sm:$0xff]  ;;  %v7945_v13 = vld [vmem:[#allocation3_spill] sm:$0xff] }
  0xd0   : > { %7938 = vst [vmem:[#allocation26_spill] sm:$0xff] %v5042_v52  ;;  %v937_v10 = vsel %vm205_vm0, %v904_v31, 0.0  ;;  %v877_v17 = vsub.f32 %v4841_v37, %v5042_v52  ;;  %v878_v0 = vsub.f32 %v4829_v27, %v5042_v52 }
  0xd1   : > { %7939 = vst [vmem:[#allocation27_spill] sm:$0xff] %v5046_v21  ;;  %v826_v59 = vpop.xlane.xlu0 %825  ;;  %v938_v41 = vadd.f32 %v937_v10, %v903_v47  ;;  %v888_v29 = vsub.f32 %v4837_v33, %v5046_v21  ;;  %v953_v37 = vsel %vm205_vm0, %v912_v12, 0.0  ;;  %v887_v27 = vsub.f32 %v4850_v45, %v5046_v21 }
  0xd2   : > { %v5056_v58 = vmul.f32 0.0051020407, %v826_v59  ;;  %v905_v54 = vmul.f32 %v877_v17, %v877_v17  ;;  %v906_v28 = vmul.f32 %v878_v0, %v878_v0  ;;  %v846_v23 = vpop.xlane.xlu1 %845  ;;  %v954_v62 = vadd.f32 %v953_v37, %v911_v60 }
  0xd3   : > { %939 = vadd.xlane.f32.xlu1 %v938_v41  ;;  %v5058_v2 = vmul.f32 0.0051020407, %v846_v23  ;;  %v916_v4 = vmul.f32 %v888_v29, %v888_v29  ;;  %v7948_v29 = vld [vmem:[#allocation6_spill] sm:$0xff] }
  0xd4   : > { %7940 = vst [vmem:[#allocation28_spill] sm:$0xff] %v5056_v58  ;;  %v941_v44 = vsel %vm205_vm0, %v906_v28, 0.0  ;;  %v881_v33 = vsub.f32 %v4859_v53, %v5056_v58  ;;  %v882_v39 = vsub.f32 %v4847_v43, %v5056_v58  ;;  %v915_v53 = vmul.f32 %v887_v27, %v887_v27  ;;  %v7949_v28 = vld [vmem:[#allocation4_spill] sm:$0xff] }
  0xd5   : > { %7941 = vst [vmem:[#allocation29_spill] sm:$0xff] %v5058_v2  ;;  %v834_v14 = vpop.xlane.xlu0 %833  ;;  %v942_v48 = vadd.f32 %v941_v44, %v905_v54  ;;  %v892_v35 = vsub.f32 %v4855_v49, %v5058_v2  ;;  %v891_v43 = vsub.f32 %v4868_v61, %v5058_v2  ;;  %v961_v24 = vsel %vm205_vm0, %v916_v4, 0.0 }
  0xd6   : > { %v5070_v15 = vmul.f32 0.0051020407, %v834_v14  ;;  %v909_v8 = vmul.f32 %v881_v33, %v881_v33  ;;  %v910_v3 = vmul.f32 %v882_v39, %v882_v39  ;;  %v854_v45 = vpop.xlane.xlu1 %853  ;;  %v962_v11 = vadd.f32 %v961_v24, %v915_v53  ;;  %v5103_v53 = vld [vmem:[%s4653_s15 + $0x1d8] sm:$0xff] }
  0xd7   : > { %947 = vadd.xlane.f32.xlu1 %v946_v55  ;;  %943 = vadd.xlane.f32.xlu0 %v942_v48  ;;  %v5072_v63 = vmul.f32 0.0051020407, %v854_v45  ;;  %v920_v46 = vmul.f32 %v892_v35, %v892_v35  ;;  %v919_v17 = vmul.f32 %v891_v43, %v891_v43  ;;  %v7951_v35 = vld [vmem:[#allocation8_spill] sm:$0xff]  ;;  %v5106_v43 = vld [vmem:[%s4653_s15 + $0x1c8] sm:$0xff] }
  0xd8   : > { %7942 = vst [vmem:[#allocation30_spill] sm:$0xff] %v5070_v15  ;;  %v949_v57 = vsel %vm205_vm0, %v910_v3, 0.0  ;;  %v885_v49 = vsub.f32 %v4877_v16, %v5070_v15  ;;  %v886_v47 = vsub.f32 %v7944_v36, %v5070_v15  ;;  %v7947_v16 = vld [vmem:[#allocation5_spill] sm:$0xff]  ;;  %v5110_v36 = vld [vmem:[%s4653_s15 + $0x1d0] sm:$0xff] }
  0xd9   : > { %7943 = vst [vmem:[#allocation31_spill] sm:$0xff] %v5072_v63  ;;  %v842_v31 = vpop.xlane.xlu0 %841  ;;  %v950_v19 = vadd.f32 %v949_v57, %v909_v8  ;;  %v896_v6 = vsub.f32 %v7945_v13, %v5072_v63  ;;  %v969_v0 = vsel %vm205_vm0, %v920_v46, 0.0  ;;  %v895_v59 = vsub.f32 %v7947_v16, %v5072_v63  ;;  %v7952_v8 = vld [vmem:[#allocation7_spill] sm:$0xff]  ;;  %v5133_v16 = vld [vmem:[%s4653_s15 + $0x210] sm:$0xff] }
  0xda   : > { %v5084_v12 = vmul.f32 0.0051020407, %v842_v31  ;;  %v913_v10 = vmul.f32 %v885_v49, %v885_v49  ;;  %v914_v61 = vmul.f32 %v886_v47, %v886_v47  ;;  %v970_v39 = vadd.f32 %v969_v0, %v919_v17  ;;  %v5115_v31 = vld [vmem:[%s4653_s15 + $0x1c0] sm:$0xff] }
  0xdb   : > { %955 = vadd.xlane.f32.xlu1 %v954_v62  ;;  %951 = vadd.xlane.f32.xlu0 %v950_v19  ;;  %v924_v60 = vmul.f32 %v896_v6, %v896_v6  ;;  %v923_v4 = vmul.f32 %v895_v59, %v895_v59  ;;  %v1397_v47 = vsel %vm205_vm0, %v5103_v53, 0.0  ;;  %v1393_v19 = vsel %vm205_vm0, %v5106_v43, 0.0  ;;  %v5120_v6 = vld [vmem:[%s4653_s15 + $0x1e8] sm:$0xff]  ;;  %v5128_v17 = vld [vmem:[%s4653_s15 + $0x1e0] sm:$0xff] }
  0xdc   : > { %7946 = vst [vmem:[#allocation2_spill] sm:$0xff] %v5084_v12  ;;  %v957_v41 = vsel %vm205_vm0, %v914_v61, 0.0  ;;  %v889_v54 = vsub.f32 %v7948_v29, %v5084_v12  ;;  %v890_v23 = vsub.f32 %v7949_v28, %v5084_v12  ;;  %v1398_v61 = vadd.f32 %v5110_v36, %v1397_v47  ;;  %v5141_v29 = vld [vmem:[%s4653_s15 + $0x238] sm:$0xff] }
  0xdd   : > { %v850_v55 = vpop.xlane.xlu0 %849  ;;  %v958_v37 = vadd.f32 %v957_v41, %v913_v10  ;;  %v977_v48 = vsel %vm205_vm0, %v924_v60, 0.0  ;;  %v5123_v10 = vld [vmem:[%s4653_s15 + $0x218] sm:$0xff]  ;;  %v1401_v0 = vsel %vm205_vm0, %v5120_v6, 0.0 }
  0xde   : > { %v5094_v27 = vmul.f32 0.0051020407, %v850_v55  ;;  %v917_v44 = vmul.f32 %v889_v54, %v889_v54  ;;  %v918_v33 = vmul.f32 %v890_v23, %v890_v23  ;;  %v978_v24 = vadd.f32 %v977_v48, %v923_v4  ;;  %v5138_v41 = vld [vmem:[%s4653_s15 + $0x1f8] sm:$0xff]  ;;  %v5146_v23 = vld [vmem:[%s4653_s15 + $0x1f0] sm:$0xff] }
  0xdf   : > { %963 = vadd.xlane.f32.xlu1 %v962_v11  ;;  %959 = vadd.xlane.f32.xlu0 %v958_v37  ;;  %v1394_v11 = vadd.f32 %v5115_v31, %v1393_v19  ;;  %v1413_v59 = vsel %vm205_vm0, %v5123_v10, 0.0  ;;  %v1402_v54 = vadd.f32 %v5128_v17, %v1401_v0  ;;  %v1405_v60 = vsel %vm205_vm0, %v5138_v41, 0.0  ;;  %v5151_v55 = vld [vmem:[%s4653_s15 + $0x230] sm:$0xff]  ;;  %v5192_v19 = vld [vmem:[%s4653_s15 + $0x248] sm:$0xff]  ;;  %v5200_v0 = vld [vmem:[%s4653_s15 + $0x240] sm:$0xff] }
  0xe0   : > { %7950 = vst [vmem:[#allocation3_spill] sm:$0xff] %v5094_v27  ;;  %v965_v14 = vsel %vm205_vm0, %v918_v33, 0.0  ;;  %v893_v62 = vsub.f32 %v7951_v35, %v5094_v27  ;;  %v894_v3 = vsub.f32 %v7952_v8, %v5094_v27  ;;  %v1414_v28 = vadd.f32 %v5133_v16, %v1413_v59  ;;  %v5159_v33 = vld [vmem:[%s4653_s15 + $0x258] sm:$0xff]  ;;  %v5169_v35 = vld [vmem:[%s4653_s15 + $0x250] sm:$0xff]  ;;  %v5174_v8 = vld [vmem:[%s4653_s15 + $0x228] sm:$0xff] }
  0xe1   : > { %v966_v45 = vadd.f32 %v965_v14, %v917_v44  ;;  %v1421_v37 = vsel %vm205_vm0, %v5141_v29, 0.0  ;;  %v5156_v44 = vld [vmem:[%s4653_s15 + $0x208] sm:$0xff]  ;;  %v5164_v14 = vld [vmem:[%s4653_s15 + $0x200] sm:$0xff]  ;;  %v1425_v59 = vsel %vm205_vm0, %v5192_v19, 0.0 }
  0xe2   : > { %v921_v46 = vmul.f32 %v893_v62, %v893_v62  ;;  %v922_v57 = vmul.f32 %v894_v3, %v894_v3  ;;  %v1422_v4 = vadd.f32 %v5151_v55, %v1421_v37  ;;  %v1409_v48 = vsel %vm205_vm0, %v5156_v44, 0.0  ;;  %v5177_v3 = vld [vmem:[%s4653_s15 + $0x278] sm:$0xff] }
  0xe3   : > { %971 = vadd.xlane.f32.xlu1 %v970_v39  ;;  %967 = vadd.xlane.f32.xlu0 %v966_v45  ;;  %v1406_v39 = vadd.f32 %v5146_v23, %v1405_v60  ;;  %v1429_v62 = vsel %vm205_vm0, %v5159_v33, 0.0  ;;  %v1410_v45 = vadd.f32 %v5164_v14, %v1409_v48  ;;  %v1437_v47 = vsel %vm205_vm0, %v5177_v3, 0.0  ;;  %v5210_v60 = vld [vmem:[%s4653_s15 + $0x268] sm:$0xff] }
  0xe4   : > { %v973_v49 = vsel %vm205_vm0, %v922_v57, 0.0  ;;  %v5182_v57 = vld [vmem:[%s4653_s15 + $0x220] sm:$0xff]  ;;  %v1426_v37 = vadd.f32 %v5200_v0, %v1425_v59  ;;  %v1433_v48 = vsel %vm205_vm0, %v5210_v60, 0.0 }
  0xe5   : > { %v974_v13 = vadd.f32 %v973_v49, %v921_v46  ;;  %v1430_v46 = vadd.f32 %v5169_v35, %v1429_v62  ;;  %v5187_v49 = vld [vmem:[%s4653_s15 + $0x270] sm:$0xff]  ;;  %v5220_v62 = vld [vmem:[%s4653_s15 + $0x288] sm:$0xff] }
  0xe7   : > { %979 = vadd.xlane.f32.xlu1 %v978_v24  ;;  %975 = vadd.xlane.f32.xlu0 %v974_v13  ;;  %v1417_v24 = vsel %vm205_vm0, %v5174_v8, 0.0  ;;  %v5195_v13 = vld [vmem:[%s4653_s15 + $0x298] sm:$0xff] }
  0xeb   : > { %1399 = vadd.xlane.f32.xlu1 %v1398_v61  ;;  %1395 = vadd.xlane.f32.xlu0 %v1394_v11  ;;  %v1418_v61 = vadd.f32 %v5182_v57, %v1417_v24  ;;  %v1438_v11 = vadd.f32 %v5187_v49, %v1437_v47  ;;  %v1441_v24 = vsel %vm205_vm0, %v5220_v62, 0.0 }
  0xef   : > { %1403 = vadd.xlane.f32.xlu0 %v1402_v54  ;;  %1415 = vadd.xlane.f32.xlu1 %v1414_v28  ;;  %v5205_v54 = vld [vmem:[%s4653_s15 + $0x290] sm:$0xff]  ;;  %v1445_v28 = vsel %vm205_vm0, %v5195_v13, 0.0 }
  0xf3   : > { %1407 = vadd.xlane.f32.xlu0 %v1406_v39  ;;  %1423 = vadd.xlane.f32.xlu1 %v1422_v4  ;;  %v1446_v39 = vadd.f32 %v5205_v54, %v1445_v28  ;;  %v5215_v4 = vld [vmem:[%s4653_s15 + $0x260] sm:$0xff] }
  0xf7   : > { %1411 = vadd.xlane.f32.xlu0 %v1410_v45  ;;  %1431 = vadd.xlane.f32.xlu1 %v1430_v46  ;;  %v1434_v45 = vadd.f32 %v5215_v4, %v1433_v48  ;;  %v5224_v46 = vld [vmem:[%s4653_s15 + $0x280] sm:$0xff] }
  0xf8   : > { %v1442_v47 = vadd.f32 %v5224_v46, %v1441_v24 }
  0xfb   : > { %1419 = vadd.xlane.f32.xlu0 %v1418_v61  ;;  %1439 = vadd.xlane.f32.xlu1 %v1438_v11 }
  0xff   : > { %1427 = vadd.xlane.f32.xlu0 %v1426_v37  ;;  %1447 = vadd.xlane.f32.xlu1 %v1446_v39 }
 0x103   : > { %1435 = vadd.xlane.f32.xlu0 %v1434_v45 }
 0x107   : > { %1443 = vadd.xlane.f32.xlu0 %v1442_v47 }
 0x13c   : > { %v5229_v61 = vpop.xlane.xlu0 %334 }
 0x140   : > { %v5231_v11 = vpop.xlane.xlu1 %338  ;;  %v5233_v59 = vpop.xlane.xlu0 %342 }
 0x144   : > { %v5235_v28 = vpop.xlane.xlu1 %346  ;;  %v5237_v37 = vpop.xlane.xlu0 %350 }
 0x148   : > { %v5239_v39 = vpop.xlane.xlu1 %354  ;;  %v5241_v48 = vpop.xlane.xlu0 %358 }
 0x14c   : > { %v5243_v63 = vpop.xlane.xlu1 %362  ;;  %v5245_v45 = vpop.xlane.xlu0 %366 }
 0x150   : > { %v5247_v24 = vpop.xlane.xlu1 %370  ;;  %v5249_v47 = vpop.xlane.xlu0 %374 }
 0x154   : > { %v5251_v2 = vpop.xlane.xlu1 %378  ;;  %v5253_v21 = vpop.xlane.xlu0 %382 }
 0x158   : > { %v5255_v27 = vpop.xlane.xlu1 %386  ;;  %v5257_v30 = vpop.xlane.xlu0 %927 }
 0x15c   : > { %v5259_v12 = vpop.xlane.xlu1 %931  ;;  %v5261_v38 = vpop.xlane.xlu0 %935 }
 0x160   : > { %v5263_v15 = vpop.xlane.xlu1 %939 }
 0x161   : > { %7953 = vst [vmem:[#allocation5_spill] sm:$0xff] %v5263_v15 }
 0x164   : > { %v5265_v40 = vpop.xlane.xlu1 %947  ;;  %v5267_v58 = vpop.xlane.xlu0 %943 }
 0x165   : > { %7954 = vst [vmem:[#allocation6_spill] sm:$0xff] %v5265_v40 }
 0x168   : > { %v5269_v7 = vpop.xlane.xlu1 %955  ;;  %v5271_v52 = vpop.xlane.xlu0 %951 }
 0x169   : > { %7955 = vst [vmem:[#allocation4_spill] sm:$0xff] %v5269_v7 }
 0x16c   : > { %v5273_v50 = vpop.xlane.xlu1 %963  ;;  %v5275_v20 = vpop.xlane.xlu0 %959 }
 0x16d   : > { %7956 = vst [vmem:[#allocation8_spill] sm:$0xff] %v5273_v50  ;;  %7957 = vst [vmem:[#allocation7_spill] sm:$0xff] %v5275_v20 }
 0x170   : > { %v5277_v42 = vpop.xlane.xlu1 %971  ;;  %v5279_v22 = vpop.xlane.xlu0 %967 }
 0x171   : > { %7958 = vst [vmem:[#allocation32_spill] sm:$0xff] %v5277_v42  ;;  %7959 = vst [vmem:[#allocation33_spill] sm:$0xff] %v5279_v22 }
 0x174   : > { %v5281_v34 = vpop.xlane.xlu1 %979  ;;  %v5283_v51 = vpop.xlane.xlu0 %975 }
 0x175   : > { %7960 = vst [vmem:[#allocation34_spill] sm:$0xff] %v5281_v34  ;;  %7961 = vst [vmem:[#allocation35_spill] sm:$0xff] %v5283_v51 }
 0x178   : > { %v1400_v26 = vpop.xlane.xlu1 %1399  ;;  %v1396_v40 = vpop.xlane.xlu0 %1395 }
 0x179   : > { %v5285_v32 = vmul.f32 0.0051020407, %v1400_v26  ;;  %v5287_v18 = vmul.f32 0.0051020407, %v1396_v40 }
 0x17b   : > { %7962 = vst [vmem:[#allocation36_spill] sm:$0xff] %v5285_v32  ;;  %7963 = vst [vmem:[#allocation37_spill] sm:$0xff] %v5287_v18  ;;  %v1465_v7 = vsub.f32 %v5110_v36, %v5285_v32  ;;  %v1466_v50 = vsub.f32 %v5103_v53, %v5285_v32  ;;  %v1463_v42 = vsub.f32 %v5115_v31, %v5287_v18 }
 0x17c   : > { %v1464_v34 = vsub.f32 %v5106_v43, %v5287_v18  ;;  %v1404_v22 = vpop.xlane.xlu0 %1403  ;;  %v1416_v51 = vpop.xlane.xlu1 %1415 }
 0x17d   : > { %v5297_v20 = vmul.f32 0.0051020407, %v1404_v22  ;;  %v1493_v26 = vmul.f32 %v1465_v7, %v1465_v7  ;;  %v1494_v15 = vmul.f32 %v1466_v50, %v1466_v50  ;;  %v1491_v40 = vmul.f32 %v1463_v42, %v1463_v42 }
 0x17e   : > { %v1492_v1 = vmul.f32 %v1464_v34, %v1464_v34  ;;  %v5299_v5 = vmul.f32 0.0051020407, %v1416_v51 }
 0x17f   : > { %v1523_v36 = vsel %vm205_vm0, %v1494_v15, 0.0  ;;  %v1467_v53 = vsub.f32 %v5128_v17, %v5297_v20  ;;  %v1468_v31 = vsub.f32 %v5120_v6, %v5297_v20 }
 0x180   : > { %v1408_v32 = vpop.xlane.xlu0 %1407  ;;  %v1524_v43 = vadd.f32 %v1523_v36, %v1493_v26  ;;  %v1519_v18 = vsel %vm205_vm0, %v1492_v1, 0.0  ;;  %v1424_v22 = vpop.xlane.xlu1 %1423  ;;  %v1474_v50 = vsub.f32 %v5123_v10, %v5299_v5  ;;  %v1473_v17 = vsub.f32 %v5133_v16, %v5299_v5 }
 0x181   : > { %v5309_v42 = vmul.f32 0.0051020407, %v1408_v32  ;;  %v1520_v51 = vadd.f32 %v1519_v18, %v1491_v40  ;;  %v1495_v34 = vmul.f32 %v1467_v53, %v1467_v53  ;;  %v1496_v7 = vmul.f32 %v1468_v31, %v1468_v31 }
 0x182   : > { %1525 = vadd.xlane.f32.xlu1 %v1524_v43  ;;  %v5311_v15 = vmul.f32 0.0051020407, %v1424_v22  ;;  %v1502_v32 = vmul.f32 %v1474_v50, %v1474_v50 }
 0x183   : > { %1521 = vadd.xlane.f32.xlu0 %v1520_v51  ;;  %v1527_v6 = vsel %vm205_vm0, %v1496_v7, 0.0  ;;  %v1469_v1 = vsub.f32 %v5146_v23, %v5309_v42  ;;  %v1470_v10 = vsub.f32 %v5138_v41, %v5309_v42  ;;  %v1501_v23 = vmul.f32 %v1473_v17, %v1473_v17 }
 0x184   : > { %v1412_v26 = vpop.xlane.xlu0 %1411  ;;  %v1528_v18 = vadd.f32 %v1527_v6, %v1495_v34  ;;  %v1432_v40 = vpop.xlane.xlu1 %1431  ;;  %v1477_v36 = vsub.f32 %v5151_v55, %v5311_v15  ;;  %v1478_v53 = vsub.f32 %v5141_v29, %v5311_v15  ;;  %v1539_v50 = vsel %vm205_vm0, %v1502_v32, 0.0 }
 0x185   : > { %v5324_v16 = vmul.f32 0.0051020407, %v1412_v26  ;;  %v1497_v31 = vmul.f32 %v1469_v1, %v1469_v1  ;;  %v1498_v43 = vmul.f32 %v1470_v10, %v1470_v10  ;;  %v5326_v22 = vmul.f32 0.0051020407, %v1432_v40 }
 0x186   : > { %v1506_v51 = vmul.f32 %v1478_v53, %v1478_v53  ;;  %v1505_v1 = vmul.f32 %v1477_v36, %v1477_v36 }
 0x187   : > { %1529 = vadd.xlane.f32.xlu0 %v1528_v18  ;;  %v1531_v41 = vsel %vm205_vm0, %v1498_v43, 0.0  ;;  %v1471_v34 = vsub.f32 %v5164_v14, %v5324_v16  ;;  %v1472_v55 = vsub.f32 %v5156_v44, %v5324_v16  ;;  %v1482_v17 = vsub.f32 %v5159_v33, %v5326_v22 }
 0x188   : > { %v1420_v29 = vpop.xlane.xlu0 %1419  ;;  %v1532_v7 = vadd.f32 %v1531_v41, %v1497_v31  ;;  %v1440_v6 = vpop.xlane.xlu1 %1439  ;;  %v1547_v10 = vsel %vm205_vm0, %v1506_v51, 0.0  ;;  %v1540_v14 = vadd.f32 %v1539_v50, %v1501_v23  ;;  %v1481_v44 = vsub.f32 %v5169_v35, %v5326_v22 }
 0x189   : > { %v5337_v26 = vmul.f32 0.0051020407, %v1420_v29  ;;  %v1499_v18 = vmul.f32 %v1471_v34, %v1471_v34  ;;  %v1500_v40 = vmul.f32 %v1472_v55, %v1472_v55  ;;  %v5339_v32 = vmul.f32 0.0051020407, %v1440_v6 }
 0x18a   : > { %1533 = vadd.xlane.f32.xlu1 %v1532_v7  ;;  %v1510_v33 = vmul.f32 %v1482_v17, %v1482_v17  ;;  %v1548_v41 = vadd.f32 %v1547_v10, %v1505_v1 }
 0x18b   : > { %v1535_v53 = vsel %vm205_vm0, %v1500_v40, 0.0  ;;  %v1475_v36 = vsub.f32 %v5182_v57, %v5337_v26  ;;  %v1476_v31 = vsub.f32 %v5174_v8, %v5337_v26  ;;  %v1486_v55 = vsub.f32 %v5177_v3, %v5339_v32 }
 0x18c   : > { %v1428_v43 = vpop.xlane.xlu0 %1427  ;;  %v1536_v51 = vadd.f32 %v1535_v53, %v1499_v18  ;;  %v1448_v34 = vpop.xlane.xlu1 %1447  ;;  %v1509_v57 = vmul.f32 %v1481_v44, %v1481_v44  ;;  %v1485_v8 = vsub.f32 %v5187_v49, %v5339_v32  ;;  %v1555_v1 = vsel %vm205_vm0, %v1510_v33, 0.0 }
 0x18d   : > { %v5350_v23 = vmul.f32 0.0051020407, %v1428_v43  ;;  %v1503_v50 = vmul.f32 %v1475_v36, %v1475_v36  ;;  %v1504_v35 = vmul.f32 %v1476_v31, %v1476_v31  ;;  %v5352_v29 = vmul.f32 0.0051020407, %v1448_v34 }
 0x18e   : > { %1541 = vadd.xlane.f32.xlu1 %v1540_v14  ;;  %1537 = vadd.xlane.f32.xlu0 %v1536_v51  ;;  %v1514_v7 = vmul.f32 %v1486_v55, %v1486_v55  ;;  %v1556_v53 = vadd.f32 %v1555_v1, %v1509_v57  ;;  %v1513_v36 = vmul.f32 %v1485_v8, %v1485_v8  ;;  %v389_v51 = vmul.f32 0.0051020407, %v5231_v11 }
 0x18f   : > { %v1543_v6 = vsel %vm205_vm0, %v1504_v35, 0.0  ;;  %v1479_v3 = vsub.f32 %v5200_v0, %v5350_v23  ;;  %v1480_v10 = vsub.f32 %v5192_v19, %v5350_v23  ;;  %v1490_v40 = vsub.f32 %v5195_v13, %v5352_v29 }
 0x190   : > { %v1436_v17 = vpop.xlane.xlu0 %1435  ;;  %v1544_v18 = vadd.f32 %v1543_v6, %v1503_v50  ;;  %v1563_v31 = vsel %vm205_vm0, %v1514_v7, 0.0  ;;  %v1489_v0 = vsub.f32 %v5205_v54, %v5352_v29  ;;  %v390_v57 = vmul.f32 0.0051020407, %v5233_v59 }
 0x191   : > { %v5364_v14 = vmul.f32 0.0051020407, %v1436_v17  ;;  %v1507_v44 = vmul.f32 %v1479_v3, %v1479_v3  ;;  %v1508_v49 = vmul.f32 %v1480_v10, %v1480_v10  ;;  %v1518_v43 = vmul.f32 %v1490_v40, %v1490_v40 }
 0x192   : > { %1549 = vadd.xlane.f32.xlu1 %v1548_v41  ;;  %1545 = vadd.xlane.f32.xlu0 %v1544_v18  ;;  %v1564_v54 = vadd.f32 %v1563_v31, %v1513_v36  ;;  %v1517_v8 = vmul.f32 %v1489_v0, %v1489_v0  ;;  %v403_v6 = vadd.f32 0.001, %v389_v51  ;;  %v388_v3 = vmul.f32 0.0051020407, %v5229_v61 }
 0x193   : > { %v1551_v19 = vsel %vm205_vm0, %v1508_v49, 0.0  ;;  %v1483_v33 = vsub.f32 %v5215_v4, %v5364_v14  ;;  %v1484_v13 = vsub.f32 %v5210_v60, %v5364_v14  ;;  %v1571_v7 = vsel %vm205_vm0, %v1518_v43, 0.0 }
 0x194   : > { %v1444_v41 = vpop.xlane.xlu0 %1443  ;;  %v1552_v34 = vadd.f32 %v1551_v19, %v1507_v44  ;;  %v1572_v17 = vadd.f32 %v1571_v7, %v1517_v8  ;;  %v404_v18 = vadd.f32 0.001, %v390_v57  ;;  %v391_v40 = vmul.f32 0.0051020407, %v5235_v28  ;;  %v433_v7 = vld [vmem:[%s5396_s19 + $0x18] sm:$0xff] }
 0x195   : > { %v5375_v55 = vmul.f32 0.0051020407, %v1444_v41  ;;  %v1511_v50 = vmul.f32 %v1483_v33, %v1483_v33  ;;  %v1512_v35 = vmul.f32 %v1484_v13, %v1484_v13  ;;  %4199 = vrsqrt.f32 %v403_v6  ;;  %v432_v41 = vld [vmem:[%s5396_s19 + $0x10] sm:$0xff] }
 0x196   : > { %1557 = vadd.xlane.f32.xlu1 %v1556_v53  ;;  %1553 = vadd.xlane.f32.xlu0 %v1552_v34  ;;  %v402_v49 = vadd.f32 0.001, %v388_v3  ;;  %4201 = vrsqrt.f32 %v404_v18  ;;  %v405_v61 = vadd.f32 0.001, %v391_v40  ;;  %v393_v53 = vmul.f32 0.0051020407, %v5239_v39 }
 0x197   : > { %v1559_v4 = vsel %vm205_vm0, %v1512_v35, 0.0  ;;  %v1487_v60 = vsub.f32 %v5224_v46, %v5375_v55  ;;  %v1488_v11 = vsub.f32 %v5220_v62, %v5375_v55  ;;  %v392_v62 = vmul.f32 0.0051020407, %v5237_v37  ;;  %v431_v39 = vld [vmem:[%s5396_s19 + $0x8] sm:$0xff]  ;;  %v430_v35 = vld [vmem:[%s5396_s19] sm:$0xff]  ;;  %v7967_v18 = vld [vmem:[#allocation9_spill] sm:$0xff] }
 0x198   : > { %v1560_v1 = vadd.f32 %v1559_v4, %v1511_v50  ;;  %4203 = vrsqrt.f32 %v402_v49  ;;  %v394_v31 = vmul.f32 0.0051020407, %v5241_v48  ;;  %v395_v28 = vmul.f32 0.0051020407, %v5243_v63 }
 0x199   : > { %v1515_v10 = vmul.f32 %v1487_v60, %v1487_v60  ;;  %v1516_v59 = vmul.f32 %v1488_v11, %v1488_v11  ;;  %v406_v36 = vadd.f32 0.001, %v392_v62  ;;  %4205 = vrsqrt.f32 %v405_v61 }
 0x19a   : > { %1565 = vadd.xlane.f32.xlu1 %v1564_v54  ;;  %1561 = vadd.xlane.f32.xlu0 %v1560_v1  ;;  %v407_v0 = vadd.f32 0.001, %v393_v53  ;;  %v408_v19 = vadd.f32 0.001, %v394_v31  ;;  %v396_v33 = vmul.f32 0.0051020407, %v5245_v45 }
 0x19b   : > { %v1567_v44 = vsel %vm205_vm0, %v1516_v59, 0.0  ;;  %4207 = vrsqrt.f32 %v406_v36  ;;  %v409_v48 = vadd.f32 0.001, %v395_v28  ;;  %v397_v13 = vmul.f32 0.0051020407, %v5247_v24 }
 0x19c   : > { %v1568_v46 = vadd.f32 %v1567_v44, %v1515_v10  ;;  %4209 = vrsqrt.f32 %v407_v0  ;;  %v410_v43 = vadd.f32 0.001, %v396_v33  ;;  %v398_v45 = vmul.f32 0.0051020407, %v5249_v47  ;;  %v7966_v10 = vld [vmem:[#allocation10_spill] sm:$0xff]  ;;  %v437_v0 = vld [vmem:[%s5396_s19 + $0x38] sm:$0xff] }
 0x19d   : > { %4211 = vrsqrt.f32 %v408_v19  ;;  %v399_v50 = vmul.f32 0.0051020407, %v5251_v2  ;;  %v411_v57 = vadd.f32 0.001, %v397_v13  ;;  %v400_v4 = vmul.f32 0.0051020407, %v5253_v21 }
 0x19e   : > { %1573 = vadd.xlane.f32.xlu1 %v1572_v17  ;;  %1569 = vadd.xlane.f32.xlu0 %v1568_v46  ;;  %4213 = vrsqrt.f32 %v409_v48  ;;  %v412_v24 = vadd.f32 0.001, %v398_v45  ;;  %v434_v2 = vld [vmem:[%s5396_s19 + $0x20] sm:$0xff]  ;;  %v401_v1 = vmul.f32 0.0051020407, %v5255_v27  ;;  %v435_v46 = vld [vmem:[%s5396_s19 + $0x28] sm:$0xff] }
 0x19f   : > { %v4200_v37 = vpop.eup %4199  ;;  %4215 = vrsqrt.f32 %v410_v43  ;;  %v413_v6 = vadd.f32 0.001, %v399_v50  ;;  %v414_v21 = vadd.f32 0.001, %v400_v4  ;;  %v436_v27 = vld [vmem:[%s5396_s19 + $0x30] sm:$0xff]  ;;  %v7970_v13 = vld [vmem:[#allocation11_spill] sm:$0xff] }
 0x1a0   : > { %v4202_v63 = vpop.eup %4201  ;;  %v5401_v51 = vmul.f32 %v4200_v37, %v431_v39  ;;  %4217 = vrsqrt.f32 %v411_v57  ;;  %v415_v62 = vadd.f32 0.001, %v401_v1  ;;  %v985_v31 = vmul.f32 0.0051020407, %v5267_v58  ;;  %v438_v37 = vld [vmem:[%s5396_s19 + $0x40] sm:$0xff]  ;;  %v7971_v45 = vld [vmem:[#allocation12_spill] sm:$0xff] }
 0x1a1   : > { %v5406_v54 = vmul.f32 %v4202_v63, %v432_v41  ;;  %4219 = vrsqrt.f32 %v412_v24  ;;  %v983_v39 = vmul.f32 0.0051020407, %v5261_v38  ;;  %v439_v50 = vld [vmem:[%s5396_s19 + $0x48] sm:$0xff]  ;;  %v7973_v24 = vld [vmem:[#allocation13_spill] sm:$0xff] }
 0x1a2   : > { %v4204_v34 = vpop.eup %4203  ;;  %v459_v47 = vmul.f32 %v5401_v51, %v4919_v9  ;;  %v981_v9 = vmul.f32 0.0051020407, %v5257_v30  ;;  %4221 = vrsqrt.f32 %v413_v6  ;;  %v982_v30 = vmul.f32 0.0051020407, %v5259_v12  ;;  %v441_v1 = vld [vmem:[%s5396_s19 + $0x58] sm:$0xff] }
 0x1a3   : > { %v4206_v8 = vpop.eup %4205  ;;  %v5412_v60 = vmul.f32 %v4204_v34, %v430_v35  ;;  %v460_v59 = vmul.f32 %v5406_v54, %v7966_v10  ;;  %4223 = vrsqrt.f32 %v414_v21  ;;  %v999_v48 = vadd.f32 0.001, %v985_v31  ;;  %v440_v35 = vld [vmem:[%s5396_s19 + $0x50] sm:$0xff]  ;;  %v7976_v21 = vld [vmem:[#allocation14_spill] sm:$0xff] }
 0x1a4   : > { %v5417_v3 = vmul.f32 %v4206_v8, %v433_v7  ;;  %v995_v36 = vadd.f32 0.001, %v981_v9  ;;  %4225 = vrsqrt.f32 %v415_v62  ;;  %v997_v57 = vadd.f32 0.001, %v983_v39  ;;  %v7972_v8 = vld [vmem:[#allocation5_spill] sm:$0xff]  ;;  %v7981_v31 = vld [vmem:[#allocation16_spill] sm:$0xff] }
 0x1a5   : > { %7964 = vst [vmem:[#allocation38_spill] sm:$0xff] %v5412_v60  ;;  %v4208_v11 = vpop.eup %4207  ;;  %v458_v40 = vmul.f32 %v5412_v60, %v7967_v18  ;;  %v7979_v62 = vld [vmem:[#allocation33_spill] sm:$0xff] }
 0x1a6   : > { %7965 = vst [vmem:[#allocation39_spill] sm:$0xff] %v5417_v3  ;;  %v4210_v17 = vpop.eup %4209  ;;  %v5424_v44 = vmul.f32 %v4208_v11, %v434_v2  ;;  %v461_v61 = vmul.f32 %v5417_v3, %v4921_v25  ;;  %v996_v25 = vadd.f32 0.001, %v982_v30  ;;  %4227 = vrsqrt.f32 %v995_v36  ;;  %v7974_v11 = vld [vmem:[#allocation7_spill] sm:$0xff] }
 0x1a7   : > { %v4212_v49 = vpop.eup %4211  ;;  %v5434_v28 = vmul.f32 %v4210_v17, %v435_v46  ;;  %v989_v6 = vmul.f32 0.0051020407, %v7974_v11  ;;  %v442_v17 = vld [vmem:[%s5396_s19 + $0x60] sm:$0xff]  ;;  %v991_v30 = vmul.f32 0.0051020407, %v7979_v62 }
 0x1a8   : > { %v4214_v53 = vpop.eup %4213  ;;  %v462_v19 = vmul.f32 %v5424_v44, %v4933_v56  ;;  %v5439_v33 = vmul.f32 %v4212_v49, %v436_v27  ;;  %v987_v56 = vmul.f32 0.0051020407, %v5271_v52  ;;  %4229 = vrsqrt.f32 %v996_v25  ;;  %v3856_v25 = vld [vmem:[%s5396_s19 + $0x70] sm:$0xff]  ;;  %v3862_v62 = vld [vmem:[%s5396_s19 + $0xa0] sm:$0xff] }
 0x1a9   : > { %7968 = vst [vmem:[#allocation10_spill] sm:$0xff] %v5434_v28  ;;  %v4216_v12 = vpop.eup %4215  ;;  %v5445_v58 = vmul.f32 %v4214_v53, %v437_v0  ;;  %v463_v63 = vmul.f32 %v5434_v28, %v7970_v13  ;;  %v984_v52 = vmul.f32 0.0051020407, %v7972_v8  ;;  %4231 = vrsqrt.f32 %v999_v48  ;;  %v7982_v48 = vld [vmem:[#allocation4_spill] sm:$0xff]  ;;  %v7983_v13 = vld [vmem:[#allocation17_spill] sm:$0xff] }
 0x1aa   : > { %v4218_v43 = vpop.eup %4217  ;;  %v464_v41 = vmul.f32 %v5439_v33, %v7971_v45  ;;  %v5452_v34 = vmul.f32 %v4216_v12, %v438_v37  ;;  %v1001_v7 = vadd.f32 0.001, %v987_v56  ;;  %4233 = vrsqrt.f32 %v997_v57  ;;  %v443_v12 = vld [vmem:[%s5396_s19 + $0x68] sm:$0xff] }
 0x1ab   : > { %7969 = vst [vmem:[#allocation9_spill] sm:$0xff] %v5445_v58  ;;  %v4220_v38 = vpop.eup %4219  ;;  %v465_v4 = vmul.f32 %v5445_v58, %v7973_v24  ;;  %v5462_v2 = vmul.f32 %v4218_v43, %v439_v50  ;;  %v998_v18 = vadd.f32 0.001, %v984_v52  ;;  %v1003_v27 = vadd.f32 0.001, %v989_v6  ;;  %v7984_v45 = vld [vmem:[#allocation35_spill] sm:$0xff] }
 0x1ac   : > { %v466_v9 = vmul.f32 %v5452_v34, %v7976_v21  ;;  %v5467_v10 = vmul.f32 %v4220_v38, %v440_v35  ;;  %4235 = vrsqrt.f32 %v1001_v7  ;;  %v988_v56 = vmul.f32 0.0051020407, %v7982_v48  ;;  %v7986_v35 = vld [vmem:[#allocation18_spill] sm:$0xff]  ;;  %v3857_v52 = vld [vmem:[%s5396_s19 + $0x78] sm:$0xff]  ;;  %v7988_v7 = vld [vmem:[#allocation8_spill] sm:$0xff] }
 0x1ad   : > { %7975 = vst [vmem:[#allocation11_spill] sm:$0xff] %v5462_v2  ;;  %4237 = vrsqrt.f32 %v998_v18  ;;  %v1005_v43 = vadd.f32 0.001, %v991_v30  ;;  %v990_v11 = vmul.f32 0.0051020407, %v7988_v7  ;;  %v3859_v48 = vld [vmem:[%s5396_s19 + $0x88] sm:$0xff] }
 0x1ae   : > { %v468_v0 = vmul.f32 %v5467_v10, %v7981_v31  ;;  %4239 = vrsqrt.f32 %v1003_v27 }
 0x1af   : > { %488 = vrot.lane.b32.xlu1 %v459_v47, %s4619_s20  ;;  %v4222_v47 = vpop.eup %4221  ;;  %v1004_v30 = vadd.f32 0.001, %v990_v11  ;;  %v3866_v11 = vld [vmem:[%s5396_s19 + $0xc0] sm:$0xff] }
 0x1b0   : > { %v5473_v49 = vmul.f32 %v4222_v47, %v441_v1  ;;  %v1002_v47 = vadd.f32 0.001, %v988_v56  ;;  %v7989_v1 = vld [vmem:[#allocation19_spill] sm:$0xff] }
 0x1b2   : > { %7978 = vst [vmem:[#allocation12_spill] sm:$0xff] %v5473_v49 }
 0x1b3   : > { %490 = vrot.lane.b32.xlu1 %v460_v59, %s4619_s20  ;;  %v4224_v59 = vpop.eup %4223 }
 0x1b4   : > { %486 = vrot.lane.b32.xlu0 %v458_v40, %s4619_s20  ;;  %v7977_v40 = vld [vmem:[#allocation6_spill] sm:$0xff]  ;;  %v4226_v36 = vpop.eup %4225 }
 0x1b5   : > { %v986_v46 = vmul.f32 0.0051020407, %v7977_v40  ;;  %v4228_v37 = vpop.eup %4227  ;;  %v5490_v50 = vmul.f32 %v4226_v36, %v443_v12  ;;  %v7992_v36 = vld [vmem:[#allocation21_spill] sm:$0xff] }
 0x1b6   : > { %v4230_v38 = vpop.eup %4229  ;;  %v5494_v8 = vmul.f32 %v4228_v37, %v3856_v25  ;;  %v7993_v37 = vld [vmem:[#allocation26_spill] sm:$0xff] }
 0x1b7   : > { %492 = vrot.lane.b32.xlu1 %v461_v61, %s4619_s20  ;;  %v7980_v61 = vld [vmem:[#allocation15_spill] sm:$0xff]  ;;  %v1000_v39 = vadd.f32 0.001, %v986_v46  ;;  %7985 = vst [vmem:[#allocation5_spill] sm:$0xff] %v5490_v50  ;;  %v4232_v24 = vpop.eup %4231  ;;  %v471_v21 = vmul.f32 %v5490_v50, %v7989_v1  ;;  %v3858_v46 = vld [vmem:[%s5396_s19 + $0x80] sm:$0xff]  ;;  %v7998_v1 = vld [vmem:[#allocation24_spill] sm:$0xff] }
 0x1b8   : > { %494 = vrot.lane.b32.xlu0 %v462_v19, %s4619_s20  ;;  %v467_v53 = vmul.f32 %v5462_v2, %v7980_v61  ;;  %v5480_v19 = vmul.f32 %v4224_v59, %v442_v17  ;;  %7987 = vst [vmem:[#allocation13_spill] sm:$0xff] %v5494_v8  ;;  %v4234_v59 = vpop.eup %4233  ;;  %v7990_v17 = vld [vmem:[#allocation20_spill] sm:$0xff] }
 0x1b9   : > { %4241 = vrsqrt.f32 %v1000_v39  ;;  %v1052_v18 = vmul.f32 %v5494_v8, %v7990_v17  ;;  %v4236_v27 = vpop.eup %4235  ;;  %v7991_v61 = vld [vmem:[#allocation32_spill] sm:$0xff] }
 0x1ba   : > { %v470_v57 = vmul.f32 %v5480_v19, %v7986_v35  ;;  %4243 = vrsqrt.f32 %v1005_v43  ;;  %v4238_v12 = vpop.eup %4237  ;;  %v5520_v39 = vmul.f32 %v4236_v27, %v3862_v62  ;;  %v7994_v43 = vld [vmem:[#allocation34_spill] sm:$0xff]  ;;  %v3863_v62 = vld [vmem:[%s5396_s19 + $0xa8] sm:$0xff] }
 0x1bb   : > { %496 = vrot.lane.b32.xlu1 %v463_v63, %s4619_s20  ;;  %v469_v63 = vmul.f32 %v5473_v49, %v7983_v13  ;;  %4245 = vrsqrt.f32 %v1002_v47  ;;  %v4240_v56 = vpop.eup %4239  ;;  %v3864_v13 = vld [vmem:[%s5396_s19 + $0xb0] sm:$0xff]  ;;  %v5529_v35 = vmul.f32 %v4238_v12, %v3859_v48  ;;  %v3861_v47 = vld [vmem:[%s5396_s19 + $0x98] sm:$0xff] }
 0x1bc   : > { %498 = vrot.lane.b32.xlu0 %v464_v41, %s4619_s20  ;;  %v993_v41 = vmul.f32 0.0051020407, %v7984_v45  ;;  %v994_v45 = vmul.f32 0.0051020407, %v7994_v43 }
 0x1bd   : > { %7996 = vst [vmem:[#allocation7_spill] sm:$0xff] %v5529_v35 }
 0x1be   : > { %v1007_v6 = vadd.f32 0.001, %v993_v41  ;;  %v7995_v41 = vld [vmem:[#allocation22_spill] sm:$0xff] }
 0x1bf   : > { %500 = vrot.lane.b32.xlu1 %v465_v4, %s4619_s20  ;;  %v3860_v4 = vld [vmem:[%s5396_s19 + $0x90] sm:$0xff] }
 0x1c0   : > { %502 = vrot.lane.b32.xlu0 %v466_v9, %s4619_s20  ;;  %v5503_v9 = vmul.f32 %v4230_v38, %v3857_v52  ;;  %v5507_v40 = vmul.f32 %v4232_v24, %v3860_v4  ;;  %4247 = vrsqrt.f32 %v1007_v6  ;;  %v7997_v52 = vld [vmem:[#allocation28_spill] sm:$0xff]  ;;  %v5533_v4 = vmul.f32 %v4240_v56, %v3864_v13  ;;  %v3865_v56 = vld [vmem:[%s5396_s19 + $0xb8] sm:$0xff] }
 0x1c1   : > { %4249 = vrsqrt.f32 %v1004_v30  ;;  %v1058_v24 = vmul.f32 %v5520_v39, %v7997_v52  ;;  %v1008_v6 = vadd.f32 0.001, %v994_v45  ;;  %v8004_v13 = vld [vmem:[#allocation25_spill] sm:$0xff]  ;;  %v8007_v52 = vld [vmem:[#allocation27_spill] sm:$0xff] }
 0x1c2   : > { %v1053_v31 = vmul.f32 %v5503_v9, %v7992_v36  ;;  %v1056_v25 = vmul.f32 %v5507_v40, %v7993_v37  ;;  %v8003_v37 = vld [vmem:[#allocation2_spill] sm:$0xff] }
 0x1c3   : > { %504 = vrot.lane.b32.xlu1 %v467_v53, %s4619_s20  ;;  %v992_v53 = vmul.f32 0.0051020407, %v7991_v61  ;;  %v3868_v61 = vld [vmem:[%s5396_s19 + $0xd0] sm:$0xff] }
 0x1c4   : > { %506 = vrot.lane.b32.xlu0 %v468_v0, %s4619_s20  ;;  %v5516_v0 = vmul.f32 %v4234_v59, %v3858_v46 }
 0x1c6   : > { %v1054_v38 = vmul.f32 %v5516_v0, %v7995_v41  ;;  %v8006_v41 = vld [vmem:[#allocation3_spill] sm:$0xff] }
 0x1c7   : > { %508 = vrot.lane.b32.xlu1 %v469_v63, %s4619_s20  ;;  %v1006_v63 = vadd.f32 0.001, %v992_v53  ;;  %v8001_v53 = vld [vmem:[#allocation23_spill] sm:$0xff] }
 0x1c8   : > { %510 = vrot.lane.b32.xlu0 %v470_v57, %s4619_s20  ;;  %v4242_v57 = vpop.eup %4241 }
 0x1c9   : > { %v4244_v7 = vpop.eup %4243  ;;  %4251 = vrsqrt.f32 %v1006_v63  ;;  %v5541_v59 = vmul.f32 %v4242_v57, %v3861_v47  ;;  %v3867_v57 = vld [vmem:[%s5396_s19 + $0xc8] sm:$0xff] }
 0x1ca   : > { %v4246_v17 = vpop.eup %4245  ;;  %v5545_v27 = vmul.f32 %v4244_v7, %v3866_v11  ;;  %4253 = vrsqrt.f32 %v1008_v6  ;;  %v3869_v11 = vld [vmem:[%s5396_s19 + $0xd8] sm:$0xff] }
 0x1cb   : > { %512 = vrot.lane.b32.xlu1 %v471_v21, %s4619_s20  ;;  %v1055_v21 = vmul.f32 %v5529_v35, %v7998_v1  ;;  %7999 = vst [vmem:[#allocation14_spill] sm:$0xff] %v5541_v59  ;;  %v4248_v30 = vpop.eup %4247  ;;  %v1057_v36 = vmul.f32 %v5541_v59, %v8001_v53  ;;  %v8009_v6 = vld [vmem:[#allocation29_spill] sm:$0xff]  ;;  %v5786_v59 = vld [vmem:[%s4653_s15 + $0x368] sm:$0xff]  ;;  %v5789_v35 = vld [vmem:[%s4653_s15 + $0x370] sm:$0xff] }
 0x1cc   : > { %1080 = vrot.lane.b32.xlu0 %v1052_v18, %s4619_s20  ;;  %v8000_v18 = vld [vmem:[#allocation30_spill] sm:$0xff]  ;;  %v4250_v12 = vpop.eup %4249  ;;  %v5557_v48 = vmul.f32 %v4248_v30, %v3868_v61 }
 0x1cd   : > { %v1060_v46 = vmul.f32 %v5533_v4, %v8000_v18  ;;  %v5564_v43 = vmul.f32 %v4250_v12, %v3865_v56 }
 0x1cf   : > { %1082 = vrot.lane.b32.xlu1 %v1053_v31, %s4619_s20  ;;  %v5553_v31 = vmul.f32 %v4246_v17, %v3863_v62  ;;  %8005 = vst [vmem:[#allocation33_spill] sm:$0xff] %v5564_v43  ;;  %v8011_v17 = vld [vmem:[#allocation31_spill] sm:$0xff] }
 0x1d0   : > { %1088 = vrot.lane.b32.xlu0 %v1056_v25, %s4619_s20  ;;  %v1062_v25 = vmul.f32 %v5545_v27, %v8003_v37 }
 0x1d1   : > { %8002 = vst [vmem:[#allocation6_spill] sm:$0xff] %v5553_v31  ;;  %v1059_v63 = vmul.f32 %v5553_v31, %v8004_v13 }
 0x1d3   : > { %1084 = vrot.lane.b32.xlu1 %v1054_v38, %s4619_s20  ;;  %v4252_v45 = vpop.eup %4251  ;;  %v1064_v38 = vmul.f32 %v5557_v48, %v8006_v41 }
 0x1d4   : > { %1092 = vrot.lane.b32.xlu0 %v1058_v24, %s4619_s20  ;;  %v1061_v24 = vmul.f32 %v5564_v43, %v8007_v52  ;;  %v5573_v47 = vmul.f32 %v4252_v45, %v3867_v57  ;;  %v4254_v7 = vpop.eup %4253  ;;  %v3927_v52 = vld [vmem:[%s5396_s19 + $0xe8] sm:$0xff] }
 0x1d6   : > { %8008 = vst [vmem:[#allocation15_spill] sm:$0xff] %v5573_v47  ;;  %v1063_v1 = vmul.f32 %v5573_v47, %v8009_v6  ;;  %v5769_v47 = vld [vmem:[%s4653_s15 + $0x350] sm:$0xff] }
 0x1d7   : > { %1086 = vrot.lane.b32.xlu1 %v1055_v21, %s4619_s20  ;;  %v5579_v21 = vmul.f32 %v4254_v7, %v3869_v11 }
 0x1d8   : > { %1096 = vrot.lane.b32.xlu0 %v1060_v46, %s4619_s20 }
 0x1d9   : > { %8010 = vst [vmem:[#allocation16_spill] sm:$0xff] %v5579_v21  ;;  %v1065_v18 = vmul.f32 %v5579_v21, %v8011_v17  ;;  %v5766_v21 = vld [vmem:[%s4653_s15 + $0x348] sm:$0xff] }
 0x1da   : > { %v2027_v43 = vsel %vm205_vm0, %v5766_v21, 0.0 }
 0x1db   : > { %1090 = vrot.lane.b32.xlu1 %v1057_v36, %s4619_s20 }
 0x1dc   : > { %1100 = vrot.lane.b32.xlu0 %v1062_v25, %s4619_s20 }
 0x1df   : > { %1094 = vrot.lane.b32.xlu1 %v1059_v63, %s4619_s20 }
 0x1e0   : > { %1104 = vrot.lane.b32.xlu0 %v1064_v38, %s4619_s20 }
 0x1e3   : > { %1098 = vrot.lane.b32.xlu1 %v1061_v24, %s4619_s20  ;;  %v3926_v24 = vld [vmem:[%s5396_s19 + $0xe0] sm:$0xff] }
 0x1e7   : > { %1102 = vrot.lane.b32.xlu1 %v1063_v1, %s4619_s20 }
 0x1eb   : > { %1106 = vrot.lane.b32.xlu1 %v1065_v18, %s4619_s20 }
 0x20f   : > { %v1526_v46 = vpop.xlane.xlu1 %1525 }
 0x210   : > { %v1576_v62 = vmul.f32 0.0051020407, %v1526_v46  ;;  %v1522_v30 = vpop.xlane.xlu0 %1521 }
 0x211   : > { %v1575_v61 = vmul.f32 0.0051020407, %v1522_v30 }
 0x212   : > { %v1590_v53 = vadd.f32 0.001, %v1576_v62 }
 0x213   : > { %v1589_v36 = vadd.f32 0.001, %v1575_v61 }
 0x214   : > { %4255 = vrsqrt.f32 %v1590_v53  ;;  %v1530_v12 = vpop.xlane.xlu0 %1529  ;;  %v8013_v53 = vld [vmem:[#allocation36_spill] sm:$0xff] }
 0x215   : > { %4257 = vrsqrt.f32 %v1589_v36  ;;  %v1577_v37 = vmul.f32 0.0051020407, %v1530_v12  ;;  %v3928_v12 = vld [vmem:[%s5396_s19 + $0xf0] sm:$0xff] }
 0x217   : > { %v1591_v25 = vadd.f32 0.001, %v1577_v37  ;;  %v1534_v56 = vpop.xlane.xlu1 %1533 }
 0x218   : > { %v1578_v13 = vmul.f32 0.0051020407, %v1534_v56  ;;  %v8014_v56 = vld [vmem:[#allocation37_spill] sm:$0xff] }
 0x219   : > { %4259 = vrsqrt.f32 %v1591_v25 }
 0x21a   : > { %v1592_v63 = vadd.f32 0.001, %v1578_v13 }
 0x21b   : > { %v1542_v45 = vpop.xlane.xlu1 %1541  ;;  %v1538_v41 = vpop.xlane.xlu0 %1537 }
 0x21c   : > { %4261 = vrsqrt.f32 %v1592_v63  ;;  %v1580_v38 = vmul.f32 0.0051020407, %v1542_v45  ;;  %v1579_v57 = vmul.f32 0.0051020407, %v1538_v41 }
 0x21e   : > { %v4256_v7 = vpop.eup %4255  ;;  %v1594_v11 = vadd.f32 0.001, %v1580_v38  ;;  %v1593_v6 = vadd.f32 0.001, %v1579_v57 }
 0x21f   : > { %v4258_v1 = vpop.eup %4257  ;;  %v1550_v17 = vpop.xlane.xlu1 %1549  ;;  %v5587_v46 = vmul.f32 %v4256_v7, %v3927_v52 }
 0x220   : > { %v1546_v18 = vpop.xlane.xlu0 %1545  ;;  %4263 = vrsqrt.f32 %v1594_v11  ;;  %v1582_v62 = vmul.f32 0.0051020407, %v1550_v17  ;;  %v5589_v61 = vmul.f32 %v4258_v1, %v3926_v24  ;;  %v3929_v24 = vld [vmem:[%s5396_s19 + $0xf8] sm:$0xff] }
 0x221   : > { %v1581_v30 = vmul.f32 0.0051020407, %v1546_v18  ;;  %4265 = vrsqrt.f32 %v1593_v6  ;;  %v1647_v36 = vmul.f32 %v5587_v46, %v8013_v53 }
 0x222   : > { %8012 = vst [vmem:[#allocation4_spill] sm:$0xff] %v5589_v61  ;;  %v1596_v37 = vadd.f32 0.001, %v1582_v62  ;;  %v1646_v13 = vmul.f32 %v5589_v61, %v8014_v56 }
 0x223   : > { %v1595_v25 = vadd.f32 0.001, %v1581_v30  ;;  %v4260_v63 = vpop.eup %4259  ;;  %1676 = vrot.lane.b32.xlu1 %v1647_v36, %s4619_s20  ;;  %v1558_v45 = vpop.xlane.xlu1 %1557  ;;  %v3931_v36 = vld [vmem:[%s5396_s19 + $0x108] sm:$0xff] }
 0x224   : > { %v1554_v41 = vpop.xlane.xlu0 %1553  ;;  %4267 = vrsqrt.f32 %v1596_v37  ;;  %v1584_v38 = vmul.f32 0.0051020407, %v1558_v45  ;;  %1674 = vrot.lane.b32.xlu0 %v1646_v13, %s4619_s20  ;;  %v5598_v52 = vmul.f32 %v4260_v63, %v3928_v12  ;;  %v3930_v37 = vld [vmem:[%s5396_s19 + $0x100] sm:$0xff] }
 0x225   : > { %v1583_v57 = vmul.f32 0.0051020407, %v1554_v41  ;;  %4269 = vrsqrt.f32 %v1595_v25 }
 0x226   : > { %v4262_v7 = vpop.eup %4261  ;;  %v1598_v11 = vadd.f32 0.001, %v1584_v38  ;;  %v1648_v1 = vmul.f32 %v5598_v52, %v5297_v20 }
 0x227   : > { %v1597_v6 = vadd.f32 0.001, %v1583_v57  ;;  %v1566_v17 = vpop.xlane.xlu1 %1565  ;;  %v5603_v62 = vmul.f32 %v4262_v7, %v3929_v24  ;;  %v3933_v7 = vld [vmem:[%s5396_s19 + $0x118] sm:$0xff] }
 0x228   : > { %v1562_v18 = vpop.xlane.xlu0 %1561  ;;  %4271 = vrsqrt.f32 %v1598_v11  ;;  %v1586_v30 = vmul.f32 0.0051020407, %v1566_v17  ;;  %1678 = vrot.lane.b32.xlu1 %v1648_v1, %s4619_s20  ;;  %v3932_v11 = vld [vmem:[%s5396_s19 + $0x110] sm:$0xff] }
 0x229   : > { %8015 = vst [vmem:[#allocation17_spill] sm:$0xff] %v5603_v62  ;;  %v1585_v53 = vmul.f32 0.0051020407, %v1562_v18  ;;  %4273 = vrsqrt.f32 %v1597_v6  ;;  %v1649_v12 = vmul.f32 %v5603_v62, %v5309_v42  ;;  %v5760_v62 = vld [vmem:[%s4653_s15 + $0x320] sm:$0xff] }
 0x22a   : > { %v4264_v25 = vpop.eup %4263  ;;  %v1600_v56 = vadd.f32 0.001, %v1586_v30 }
 0x22b   : > { %v1599_v20 = vadd.f32 0.001, %v1585_v53  ;;  %v4266_v13 = vpop.eup %4265  ;;  %v1574_v63 = vpop.xlane.xlu1 %1573  ;;  %v5610_v41 = vmul.f32 %v4264_v25, %v3931_v36 }
 0x22c   : > { %v1570_v45 = vpop.xlane.xlu0 %1569  ;;  %4275 = vrsqrt.f32 %v1600_v56  ;;  %v1588_v38 = vmul.f32 0.0051020407, %v1574_v63  ;;  %1680 = vrot.lane.b32.xlu1 %v1649_v12, %s4619_s20  ;;  %v5613_v24 = vmul.f32 %v4266_v13, %v3930_v37  ;;  %v3934_v37 = vld [vmem:[%s5396_s19 + $0x120] sm:$0xff]  ;;  %v3937_v63 = vld [vmem:[%s5396_s19 + $0x138] sm:$0xff] }
 0x22d   : > { %8016 = vst [vmem:[#allocation35_spill] sm:$0xff] %v5610_v41  ;;  %v1587_v57 = vmul.f32 0.0051020407, %v1570_v45  ;;  %4277 = vrsqrt.f32 %v1599_v20  ;;  %v1651_v42 = vmul.f32 %v5610_v41, %v5299_v5  ;;  %v3935_v5 = vld [vmem:[%s5396_s19 + $0x128] sm:$0xff]  ;;  %v3936_v45 = vld [vmem:[%s5396_s19 + $0x130] sm:$0xff] }
 0x22e   : > { %v4268_v6 = vpop.eup %4267  ;;  %v1602_v1 = vadd.f32 0.001, %v1588_v38  ;;  %v1650_v18 = vmul.f32 %v5613_v24, %v5324_v16 }
 0x22f   : > { %v1601_v17 = vadd.f32 0.001, %v1587_v57  ;;  %v4270_v30 = vpop.eup %4269  ;;  %v5621_v53 = vmul.f32 %v4268_v6, %v3933_v7  ;;  %v3938_v6 = vld [vmem:[%s5396_s19 + $0x140] sm:$0xff] }
 0x230   : > { %4279 = vrsqrt.f32 %v1602_v1  ;;  %1684 = vrot.lane.b32.xlu1 %v1651_v42, %s4619_s20  ;;  %1682 = vrot.lane.b32.xlu0 %v1650_v18, %s4619_s20  ;;  %v5625_v36 = vmul.f32 %v4270_v30, %v3932_v11  ;;  %v3939_v11 = vld [vmem:[%s5396_s19 + $0x148] sm:$0xff] }
 0x231   : > { %8017 = vst [vmem:[#allocation18_spill] sm:$0xff] %v5621_v53  ;;  %4281 = vrsqrt.f32 %v1601_v17  ;;  %v1653_v12 = vmul.f32 %v5621_v53, %v5311_v15  ;;  %v5749_v53 = vld [vmem:[%s4653_s15 + $0x330] sm:$0xff] }
 0x232   : > { %v4272_v25 = vpop.eup %4271  ;;  %v1652_v16 = vmul.f32 %v5625_v36, %v5337_v26 }
 0x233   : > { %v4274_v56 = vpop.eup %4273  ;;  %v5633_v20 = vmul.f32 %v4272_v25, %v3935_v5  ;;  %v5678_v25 = vld [vmem:[%s4653_s15 + $0x2c8] sm:$0xff] }
 0x234   : > { %1688 = vrot.lane.b32.xlu1 %v1653_v12, %s4619_s20  ;;  %1686 = vrot.lane.b32.xlu0 %v1652_v16, %s4619_s20  ;;  %v5637_v13 = vmul.f32 %v4274_v56, %v3934_v37  ;;  %v5673_v12 = vld [vmem:[%s4653_s15 + $0x2a0] sm:$0xff]  ;;  %v1995_v56 = vsel %vm205_vm0, %v5678_v25, 0.0 }
 0x235   : > { %8018 = vst [vmem:[#allocation8_spill] sm:$0xff] %v5633_v20  ;;  %v1655_v15 = vmul.f32 %v5633_v20, %v5326_v22  ;;  %v5685_v16 = vld [vmem:[%s4653_s15 + $0x2c0] sm:$0xff]  ;;  %v5746_v20 = vld [vmem:[%s4653_s15 + $0x328] sm:$0xff] }
 0x236   : > { %v4276_v38 = vpop.eup %4275  ;;  %v1654_v26 = vmul.f32 %v5637_v13, %v5350_v23 }
 0x237   : > { %v4278_v57 = vpop.eup %4277  ;;  %v5645_v7 = vmul.f32 %v4276_v38, %v3937_v63  ;;  %v5690_v63 = vld [vmem:[%s4653_s15 + $0x2b0] sm:$0xff]  ;;  %v5698_v38 = vld [vmem:[%s4653_s15 + $0x2f8] sm:$0xff] }
 0x238   : > { %1692 = vrot.lane.b32.xlu1 %v1655_v15, %s4619_s20  ;;  %1690 = vrot.lane.b32.xlu0 %v1654_v26, %s4619_s20  ;;  %v5649_v42 = vmul.f32 %v4278_v57, %v3936_v45  ;;  %v5695_v45 = vld [vmem:[%s4653_s15 + $0x2d8] sm:$0xff]  ;;  %v1996_v26 = vadd.f32 %v5685_v16, %v1995_v56  ;;  %v5725_v56 = vpop.permute.xlu1 %488 }
 0x239   : > { %8019 = vst [vmem:[#allocation19_spill] sm:$0xff] %v5645_v7  ;;  %v1657_v22 = vmul.f32 %v5645_v7, %v5339_v32  ;;  %8023 = vst [vmem:[#allocation26_spill] sm:$0xff] %v5725_v56  ;;  %v5740_v7 = vld [vmem:[%s4653_s15 + $0x300] sm:$0xff] }
 0x23a   : > { %8020 = vst [vmem:[#allocation20_spill] sm:$0xff] %v5649_v42  ;;  %v4280_v1 = vpop.eup %4279  ;;  %v1656_v23 = vmul.f32 %v5649_v42, %v5364_v14  ;;  %v5670_v14 = vld [vmem:[%s4653_s15 + $0x2a8] sm:$0xff] }
 0x23b   : > { %v4282_v17 = vpop.eup %4281  ;;  %v5657_v18 = vmul.f32 %v4280_v1, %v3939_v11  ;;  %v1987_v37 = vsel %vm205_vm0, %v5670_v14, 0.0  ;;  %v5703_v11 = vld [vmem:[%s4653_s15 + $0x2d0] sm:$0xff] }
 0x23c   : > { %1696 = vrot.lane.b32.xlu1 %v1657_v22, %s4619_s20  ;;  %1694 = vrot.lane.b32.xlu0 %v1656_v23, %s4619_s20  ;;  %v5661_v30 = vmul.f32 %v4282_v17, %v3938_v6  ;;  %v1999_v22 = vsel %vm205_vm0, %v5695_v45, 0.0  ;;  %v5708_v6 = vld [vmem:[%s4653_s15 + $0x2e8] sm:$0xff]  ;;  %v5711_v1 = vld [vmem:[%s4653_s15 + $0x2f0] sm:$0xff]  ;;  %v2007_v23 = vsel %vm205_vm0, %v5698_v38, 0.0 }
 0x23d   : > { %8021 = vst [vmem:[#allocation32_spill] sm:$0xff] %v5657_v18  ;;  %v1659_v32 = vmul.f32 %v5657_v18, %v5352_v29  ;;  %v5681_v29 = vld [vmem:[%s4653_s15 + $0x2b8] sm:$0xff]  ;;  %v5731_v18 = vld [vmem:[%s4653_s15 + $0x310] sm:$0xff] }
 0x23e   : > { %8022 = vst [vmem:[#allocation21_spill] sm:$0xff] %v5661_v30  ;;  %v1658_v5 = vmul.f32 %v5661_v30, %v5375_v55  ;;  %v1988_v55 = vadd.f32 %v5673_v12, %v1987_v37  ;;  %v1991_v15 = vsel %vm205_vm0, %v5681_v29, 0.0  ;;  %v5716_v17 = vld [vmem:[%s4653_s15 + $0x318] sm:$0xff]  ;;  %v2003_v37 = vsel %vm205_vm0, %v5708_v6, 0.0 }
 0x23f   : > { %v1992_v57 = vadd.f32 %v5690_v63, %v1991_v15  ;;  %v5728_v15 = vld [vmem:[%s4653_s15 + $0x308] sm:$0xff] }
 0x240   : > { %1700 = vrot.lane.b32.xlu1 %v1659_v32, %s4619_s20  ;;  %1698 = vrot.lane.b32.xlu0 %v1658_v5, %s4619_s20  ;;  %v2000_v32 = vadd.f32 %v5703_v11, %v1999_v22  ;;  %v5720_v5 = vld [vmem:[%s4653_s15 + $0x2e0] sm:$0xff] }
 0x241   : > { %v2004_v22 = vadd.f32 %v5720_v5, %v2003_v37  ;;  %v5754_v37 = vld [vmem:[%s4653_s15 + $0x358] sm:$0xff] }
 0x25f   : > { %1989 = vadd.xlane.f32.xlu0 %v1988_v55  ;;  %v2008_v55 = vadd.f32 %v5711_v1, %v2007_v23  ;;  %v2011_v23 = vsel %vm205_vm0, %v5728_v15, 0.0 }
 0x260   : > { %v2012_v41 = vadd.f32 %v5740_v7, %v2011_v23  ;;  %v5778_v23 = vld [vmem:[%s4653_s15 + $0x340] sm:$0xff] }
 0x263   : > { %1997 = vadd.xlane.f32.xlu0 %v1996_v26  ;;  %v2015_v26 = vsel %vm205_vm0, %v5716_v17, 0.0 }
 0x264   : > { %1993 = vadd.xlane.f32.xlu1 %v1992_v57  ;;  %v5736_v57 = vld [vmem:[%s4653_s15 + $0x338] sm:$0xff]  ;;  %v2016_v56 = vadd.f32 %v5731_v18, %v2015_v26  ;;  %v2019_v26 = vsel %vm205_vm0, %v5746_v20, 0.0 }
 0x267   : > { %2001 = vadd.xlane.f32.xlu0 %v2000_v32  ;;  %v2023_v32 = vsel %vm205_vm0, %v5736_v57, 0.0 }
 0x268   : > { %2009 = vadd.xlane.f32.xlu1 %v2008_v55  ;;  %v5756_v55 = vpop.permute.xlu1 %490  ;;  %v2024_v61 = vadd.f32 %v5749_v53, %v2023_v32 }
 0x269   : > { %8024 = vst [vmem:[#allocation34_spill] sm:$0xff] %v5756_v55  ;;  %v5774_v55 = vld [vmem:[%s4653_s15 + $0x378] sm:$0xff] }
 0x26a   : > { %v2039_v8 = vsel %vm205_vm0, %v5774_v55, 0.0 }
 0x26b   : > { %2005 = vadd.xlane.f32.xlu0 %v2004_v22  ;;  %v2031_v22 = vsel %vm205_vm0, %v5754_v37, 0.0 }
 0x26c   : > { %2017 = vadd.xlane.f32.xlu1 %v2016_v56  ;;  %v2020_v56 = vadd.f32 %v5760_v62, %v2019_v26  ;;  %v2032_v32 = vadd.f32 %v5769_v47, %v2031_v22  ;;  %v5783_v31 = vpop.permute.xlu1 %492  ;;  %v2035_v26 = vsel %vm205_vm0, %v5786_v59, 0.0  ;;  %v2040_v22 = vadd.f32 %v5789_v35, %v2039_v8 }
 0x26d   : > { %8025 = vst [vmem:[#allocation22_spill] sm:$0xff] %v5783_v31 }
 0x26f   : > { %2013 = vadd.xlane.f32.xlu0 %v2012_v41  ;;  %v2028_v41 = vadd.f32 %v5778_v23, %v2027_v43  ;;  %v5807_v43 = vpop.permute.xlu0 %486 }
 0x270   : > { %2025 = vadd.xlane.f32.xlu1 %v2024_v61  ;;  %v5795_v61 = vld [vmem:[%s4653_s15 + $0x360] sm:$0xff]  ;;  %v5800_v50 = vpop.permute.xlu1 %496  ;;  %8029 = vst [vmem:[#allocation23_spill] sm:$0xff] %v5807_v43 }
 0x271   : > { %8026 = vst [vmem:[#allocation28_spill] sm:$0xff] %v5800_v50  ;;  %v2036_v31 = vadd.f32 %v5795_v61, %v2035_v26 }
 0x273   : > { %2021 = vadd.xlane.f32.xlu0 %v2020_v56  ;;  %v5811_v2 = vpop.permute.xlu0 %494 }
 0x274   : > { %2033 = vadd.xlane.f32.xlu1 %v2032_v32  ;;  %v5803_v49 = vpop.permute.xlu1 %500  ;;  %8031 = vst [vmem:[#allocation25_spill] sm:$0xff] %v5811_v2 }
 0x275   : > { %8027 = vst [vmem:[#allocation24_spill] sm:$0xff] %v5803_v49 }
 0x277   : > { %2029 = vadd.xlane.f32.xlu0 %v2028_v41  ;;  %v5815_v8 = vpop.permute.xlu0 %498 }
 0x278   : > { %2041 = vadd.xlane.f32.xlu1 %v2040_v22  ;;  %v5805_v56 = vpop.permute.xlu1 %504  ;;  %8033 = vst [vmem:[#allocation27_spill] sm:$0xff] %v5815_v8 }
 0x279   : > { %8028 = vst [vmem:[#allocation30_spill] sm:$0xff] %v5805_v56 }
 0x27b   : > { %2037 = vadd.xlane.f32.xlu0 %v2036_v31  ;;  %v5819_v41 = vpop.permute.xlu0 %502 }
 0x27c   : > { %v5809_v32 = vpop.permute.xlu1 %508  ;;  %8035 = vst [vmem:[#allocation31_spill] sm:$0xff] %v5819_v41 }
 0x27d   : > { %8030 = vst [vmem:[#allocation2_spill] sm:$0xff] %v5809_v32 }
 0x27f   : > { %v5823_v31 = vpop.permute.xlu0 %506 }
 0x280   : > { %v5813_v58 = vpop.permute.xlu1 %512  ;;  %8037 = vst [vmem:[#allocation37_spill] sm:$0xff] %v5823_v31 }
 0x281   : > { %8032 = vst [vmem:[#allocation3_spill] sm:$0xff] %v5813_v58 }
 0x283   : > { %v5827_v56 = vpop.permute.xlu0 %510 }
 0x284   : > { %v5817_v50 = vpop.permute.xlu1 %1082  ;;  %8039 = vst [vmem:[#allocation41_spill] sm:$0xff] %v5827_v56 }
 0x285   : > { %8034 = vst [vmem:[#allocation29_spill] sm:$0xff] %v5817_v50 }
 0x287   : > { %v5831_v32 = vpop.permute.xlu0 %1080 }
 0x288   : > { %v5821_v26 = vpop.permute.xlu1 %1084  ;;  %8041 = vst [vmem:[#allocation43_spill] sm:$0xff] %v5831_v32 }
 0x289   : > { %8036 = vst [vmem:[#allocation36_spill] sm:$0xff] %v5821_v26 }
 0x28b   : > { %v5835_v58 = vpop.permute.xlu0 %1088 }
 0x28c   : > { %v5825_v22 = vpop.permute.xlu1 %1086  ;;  %8043 = vst [vmem:[#allocation45_spill] sm:$0xff] %v5835_v58 }
 0x28d   : > { %8038 = vst [vmem:[#allocation40_spill] sm:$0xff] %v5825_v22 }
 0x28f   : > { %v5839_v50 = vpop.permute.xlu0 %1092 }
 0x290   : > { %v5829_v49 = vpop.permute.xlu1 %1090  ;;  %8045 = vst [vmem:[#allocation47_spill] sm:$0xff] %v5839_v50 }
 0x291   : > { %8040 = vst [vmem:[#allocation42_spill] sm:$0xff] %v5829_v49 }
 0x293   : > { %v5843_v26 = vpop.permute.xlu0 %1096 }
 0x294   : > { %v5833_v2 = vpop.permute.xlu1 %1094  ;;  %8047 = vst [vmem:[#allocation49_spill] sm:$0xff] %v5843_v26 }
 0x295   : > { %8042 = vst [vmem:[#allocation44_spill] sm:$0xff] %v5833_v2 }
 0x297   : > { %v5847_v22 = vpop.permute.xlu0 %1100 }
 0x298   : > { %v5837_v8 = vpop.permute.xlu1 %1098  ;;  %8049 = vst [vmem:[#allocation51_spill] sm:$0xff] %v5847_v22 }
 0x299   : > { %8044 = vst [vmem:[#allocation46_spill] sm:$0xff] %v5837_v8 }
 0x29b   : > { %v5851_v49 = vpop.permute.xlu0 %1104 }
 0x29c   : > { %v5841_v41 = vpop.permute.xlu1 %1102  ;;  %8051 = vst [vmem:[#allocation53_spill] sm:$0xff] %v5851_v49 }
 0x29d   : > { %8046 = vst [vmem:[#allocation48_spill] sm:$0xff] %v5841_v41 }
 0x29f   : > { %v5855_v2 = vpop.permute.xlu0 %1674 }
 0x2a0   : > { %v5845_v31 = vpop.permute.xlu1 %1106  ;;  %8053 = vst [vmem:[#allocation55_spill] sm:$0xff] %v5855_v2 }
 0x2a1   : > { %8048 = vst [vmem:[#allocation50_spill] sm:$0xff] %v5845_v31 }
 0x2a3   : > { %v5859_v8 = vpop.permute.xlu0 %1682 }
 0x2a4   : > { %v5849_v56 = vpop.permute.xlu1 %1676  ;;  %8055 = vst [vmem:[#allocation57_spill] sm:$0xff] %v5859_v8 }
 0x2a5   : > { %8050 = vst [vmem:[#allocation52_spill] sm:$0xff] %v5849_v56 }
 0x2a7   : > { %v5863_v41 = vpop.permute.xlu0 %1686 }
 0x2a8   : > { %v5853_v32 = vpop.permute.xlu1 %1678  ;;  %8057 = vst [vmem:[#allocation59_spill] sm:$0xff] %v5863_v41 }
 0x2a9   : > { %8052 = vst [vmem:[#allocation54_spill] sm:$0xff] %v5853_v32 }
 0x2ab   : > { %v5867_v31 = vpop.permute.xlu0 %1690 }
 0x2ac   : > { %v5857_v58 = vpop.permute.xlu1 %1680  ;;  %8059 = vst [vmem:[#allocation61_spill] sm:$0xff] %v5867_v31 }
 0x2ad   : > { %8054 = vst [vmem:[#allocation56_spill] sm:$0xff] %v5857_v58 }
 0x2af   : > { %v5871_v56 = vpop.permute.xlu0 %1694 }
 0x2b0   : > { %v5861_v50 = vpop.permute.xlu1 %1684  ;;  %8061 = vst [vmem:[#allocation63_spill] sm:$0xff] %v5871_v56 }
 0x2b1   : > { %8056 = vst [vmem:[#allocation58_spill] sm:$0xff] %v5861_v50 }
 0x2b3   : > { %v5875_v32 = vpop.permute.xlu0 %1698 }
 0x2b4   : > { %v5865_v26 = vpop.permute.xlu1 %1688  ;;  %8063 = vst [vmem:[#allocation65_spill] sm:$0xff] %v5875_v32 }
 0x2b5   : > { %8058 = vst [vmem:[#allocation60_spill] sm:$0xff] %v5865_v26 }
 0x2b8   : > { %v5869_v22 = vpop.permute.xlu1 %1692 }
 0x2b9   : > { %8060 = vst [vmem:[#allocation62_spill] sm:$0xff] %v5869_v22 }
 0x2bc   : > { %v5873_v49 = vpop.permute.xlu1 %1696 }
 0x2bd   : > { %8062 = vst [vmem:[#allocation64_spill] sm:$0xff] %v5873_v49 }
 0x2c0   : > { %v5877_v58 = vpop.permute.xlu1 %1700 }
 0x2c1   : > { %8064 = vst [vmem:[#allocation66_spill] sm:$0xff] %v5877_v58 }
 0x2ec   : > { %v1990_v2 = vpop.xlane.xlu0 %1989 }
 0x2ed   : > { %v5879_v8 = vmul.f32 0.0051020407, %v1990_v2 }
 0x2ef   : > { %v2057_v41 = vsub.f32 %v5673_v12, %v5879_v8  ;;  %v2058_v26 = vsub.f32 %v5670_v14, %v5879_v8 }
 0x2f0   : > { %v1998_v31 = vpop.xlane.xlu0 %1997 }
 0x2f1   : > { %v2086_v50 = vmul.f32 %v2058_v26, %v2058_v26  ;;  %v5885_v22 = vmul.f32 0.0051020407, %v1998_v31  ;;  %v1994_v56 = vpop.xlane.xlu1 %1993  ;;  %v2085_v43 = vmul.f32 %v2057_v41, %v2057_v41 }
 0x2f2   : > { %v5887_v49 = vmul.f32 0.0051020407, %v1994_v56 }
 0x2f3   : > { %v2061_v32 = vsub.f32 %v5685_v16, %v5885_v22  ;;  %v2062_v2 = vsub.f32 %v5678_v25, %v5885_v22  ;;  %v2113_v58 = vsel %vm205_vm0, %v2086_v50, 0.0 }
 0x2f4   : > { %v2059_v12 = vsub.f32 %v5690_v63, %v5887_v49  ;;  %v2060_v14 = vsub.f32 %v5681_v29, %v5887_v49  ;;  %v2002_v26 = vpop.xlane.xlu0 %2001  ;;  %v2114_v31 = vadd.f32 %v2113_v58, %v2085_v43 }
 0x2f5   : > { %v2090_v28 = vmul.f32 %v2062_v2, %v2062_v2  ;;  %v5898_v41 = vmul.f32 0.0051020407, %v2002_v26  ;;  %v2010_v56 = vpop.xlane.xlu1 %2009  ;;  %v2089_v3 = vmul.f32 %v2061_v32, %v2061_v32 }
 0x2f6   : > { %v2088_v60 = vmul.f32 %v2060_v14, %v2060_v14  ;;  %2115 = vadd.xlane.f32.xlu0 %v2114_v31  ;;  %v5900_v16 = vmul.f32 0.0051020407, %v2010_v56  ;;  %v2087_v25 = vmul.f32 %v2059_v12, %v2059_v12 }
 0x2f7   : > { %v2063_v50 = vsub.f32 %v5703_v11, %v5898_v41  ;;  %v2064_v63 = vsub.f32 %v5695_v45, %v5898_v41  ;;  %v2121_v29 = vsel %vm205_vm0, %v2090_v28, 0.0 }
 0x2f8   : > { %v2006_v30 = vpop.xlane.xlu0 %2005  ;;  %v2067_v58 = vsub.f32 %v5711_v1, %v5900_v16  ;;  %v2068_v43 = vsub.f32 %v5698_v38, %v5900_v16  ;;  %v2122_v32 = vadd.f32 %v2121_v29, %v2089_v3  ;;  %v2117_v2 = vsel %vm205_vm0, %v2088_v60, 0.0 }
 0x2f9   : > { %v2092_v14 = vmul.f32 %v2064_v63, %v2064_v63  ;;  %v5912_v12 = vmul.f32 0.0051020407, %v2006_v30  ;;  %v2118_v26 = vadd.f32 %v2117_v2, %v2087_v25  ;;  %v2018_v11 = vpop.xlane.xlu1 %2017  ;;  %v2091_v31 = vmul.f32 %v2063_v50, %v2063_v50 }
 0x2fa   : > { %v2096_v56 = vmul.f32 %v2068_v43, %v2068_v43  ;;  %2123 = vadd.xlane.f32.xlu0 %v2122_v32  ;;  %v5914_v45 = vmul.f32 0.0051020407, %v2018_v11  ;;  %v2095_v60 = vmul.f32 %v2067_v58, %v2067_v58 }
 0x2fb   : > { %v2065_v28 = vsub.f32 %v5720_v5, %v5912_v12  ;;  %v2066_v1 = vsub.f32 %v5708_v6, %v5912_v12  ;;  %2119 = vadd.xlane.f32.xlu1 %v2118_v26  ;;  %v2125_v3 = vsel %vm205_vm0, %v2092_v14, 0.0 }
 0x2fc   : > { %v2014_v38 = vpop.xlane.xlu0 %2013  ;;  %v2071_v30 = vsub.f32 %v5731_v18, %v5914_v45  ;;  %v2072_v25 = vsub.f32 %v5716_v17, %v5914_v45  ;;  %v2126_v50 = vadd.f32 %v2125_v3, %v2091_v31  ;;  %v2133_v63 = vsel %vm205_vm0, %v2096_v56, 0.0 }
 0x2fd   : > { %v2094_v29 = vmul.f32 %v2066_v1, %v2066_v1  ;;  %v5926_v43 = vmul.f32 0.0051020407, %v2014_v38  ;;  %v2026_v5 = vpop.xlane.xlu1 %2025  ;;  %v2093_v32 = vmul.f32 %v2065_v28, %v2065_v28  ;;  %v2134_v26 = vadd.f32 %v2133_v63, %v2095_v60 }
 0x2fe   : > { %v2100_v6 = vmul.f32 %v2072_v25, %v2072_v25  ;;  %v5928_v2 = vmul.f32 0.0051020407, %v2026_v5  ;;  %v2099_v14 = vmul.f32 %v2071_v30, %v2071_v30 }
 0x2ff   : > { %v2069_v58 = vsub.f32 %v5740_v7, %v5926_v43  ;;  %v2070_v18 = vsub.f32 %v5728_v15, %v5926_v43  ;;  %2127 = vadd.xlane.f32.xlu1 %v2126_v50  ;;  %v2129_v17 = vsel %vm205_vm0, %v2094_v29, 0.0 }
 0x300   : > { %v2022_v11 = vpop.xlane.xlu0 %2021  ;;  %v2075_v31 = vsub.f32 %v5749_v53, %v5928_v2  ;;  %v2076_v56 = vsub.f32 %v5736_v57, %v5928_v2  ;;  %v2130_v28 = vadd.f32 %v2129_v17, %v2093_v32  ;;  %v2141_v1 = vsel %vm205_vm0, %v2100_v6, 0.0 }
 0x301   : > { %v2098_v3 = vmul.f32 %v2070_v18, %v2070_v18  ;;  %v5940_v38 = vmul.f32 0.0051020407, %v2022_v11  ;;  %v2034_v7 = vpop.xlane.xlu1 %2033  ;;  %v2097_v30 = vmul.f32 %v2069_v58, %v2069_v58  ;;  %v2142_v60 = vadd.f32 %v2141_v1, %v2099_v14 }
 0x302   : > { %v2104_v15 = vmul.f32 %v2076_v56, %v2076_v56  ;;  %2131 = vadd.xlane.f32.xlu0 %v2130_v28  ;;  %v5942_v25 = vmul.f32 0.0051020407, %v2034_v7  ;;  %v2103_v63 = vmul.f32 %v2075_v31, %v2075_v31 }
 0x303   : > { %v2073_v50 = vsub.f32 %v5760_v62, %v5940_v38  ;;  %v2074_v53 = vsub.f32 %v5746_v20, %v5940_v38  ;;  %2135 = vadd.xlane.f32.xlu1 %v2134_v26  ;;  %v2137_v57 = vsel %vm205_vm0, %v2098_v3, 0.0 }
 0x304   : > { %v2030_v29 = vpop.xlane.xlu0 %2029  ;;  %v2079_v5 = vsub.f32 %v5769_v47, %v5942_v25  ;;  %v2080_v32 = vsub.f32 %v5754_v37, %v5942_v25  ;;  %v2138_v6 = vadd.f32 %v2137_v57, %v2097_v30  ;;  %v2149_v14 = vsel %vm205_vm0, %v2104_v15, 0.0 }
 0x305   : > { %v2102_v58 = vmul.f32 %v2074_v53, %v2074_v53  ;;  %v5954_v18 = vmul.f32 0.0051020407, %v2030_v29  ;;  %v2042_v62 = vpop.xlane.xlu1 %2041  ;;  %v2101_v17 = vmul.f32 %v2073_v50, %v2073_v50  ;;  %v2150_v56 = vadd.f32 %v2149_v14, %v2103_v63 }
 0x306   : > { %v2108_v20 = vmul.f32 %v2080_v32, %v2080_v32  ;;  %2139 = vadd.xlane.f32.xlu0 %v2138_v6  ;;  %v5956_v26 = vmul.f32 0.0051020407, %v2042_v62  ;;  %v2107_v11 = vmul.f32 %v2079_v5, %v2079_v5 }
 0x307   : > { %v2077_v31 = vsub.f32 %v5778_v23, %v5954_v18  ;;  %v2078_v47 = vsub.f32 %v5766_v21, %v5954_v18  ;;  %2143 = vadd.xlane.f32.xlu1 %v2142_v60  ;;  %v2145_v37 = vsel %vm205_vm0, %v2102_v58, 0.0 }
 0x308   : > { %v2038_v28 = vpop.xlane.xlu0 %2037  ;;  %v2083_v1 = vsub.f32 %v5789_v35, %v5956_v26  ;;  %v2084_v3 = vsub.f32 %v5774_v55, %v5956_v26  ;;  %v2146_v7 = vadd.f32 %v2145_v37, %v2101_v17  ;;  %v2157_v30 = vsel %vm205_vm0, %v2108_v20, 0.0 }
 0x309   : > { %v2106_v15 = vmul.f32 %v2078_v47, %v2078_v47  ;;  %v5968_v50 = vmul.f32 0.0051020407, %v2038_v28  ;;  %v2105_v23 = vmul.f32 %v2077_v31, %v2077_v31  ;;  %v2158_v21 = vadd.f32 %v2157_v30, %v2107_v11 }
 0x30a   : > { %v2112_v53 = vmul.f32 %v2084_v3, %v2084_v3  ;;  %2147 = vadd.xlane.f32.xlu0 %v2146_v7  ;;  %v2111_v55 = vmul.f32 %v2083_v1, %v2083_v1 }
 0x30b   : > { %v2081_v60 = vsub.f32 %v5795_v61, %v5968_v50  ;;  %v2082_v57 = vsub.f32 %v5786_v59, %v5968_v50  ;;  %2151 = vadd.xlane.f32.xlu1 %v2150_v56  ;;  %v2153_v35 = vsel %vm205_vm0, %v2106_v15, 0.0  ;;  %v3996_v15 = vld [vmem:[%s5396_s19 + $0x150] sm:$0xff] }
 0x30c   : > { %v2154_v63 = vadd.f32 %v2153_v35, %v2105_v23  ;;  %v2165_v29 = vsel %vm205_vm0, %v2112_v53, 0.0 }
 0x30d   : > { %v2110_v5 = vmul.f32 %v2082_v57, %v2082_v57  ;;  %v2109_v32 = vmul.f32 %v2081_v60, %v2081_v60  ;;  %v2166_v14 = vadd.f32 %v2165_v29, %v2111_v55 }
 0x30e   : > { %2155 = vadd.xlane.f32.xlu0 %v2154_v63 }
 0x30f   : > { %2159 = vadd.xlane.f32.xlu1 %v2158_v21  ;;  %v2161_v6 = vsel %vm205_vm0, %v2110_v5, 0.0 }
 0x310   : > { %v2162_v58 = vadd.f32 %v2161_v6, %v2109_v32  ;;  %v3997_v32 = vld [vmem:[%s5396_s19 + $0x158] sm:$0xff] }
 0x312   : > { %2163 = vadd.xlane.f32.xlu0 %v2162_v58 }
 0x313   : > { %2167 = vadd.xlane.f32.xlu1 %v2166_v14 }
 0x383   : > { %v2116_v61 = vpop.xlane.xlu0 %2115 }
 0x384   : > { %v2169_v62 = vmul.f32 0.0051020407, %v2116_v61 }
 0x386   : > { %v2183_v59 = vadd.f32 0.001, %v2169_v62 }
 0x387   : > { %v2124_v17 = vpop.xlane.xlu0 %2123 }
 0x388   : > { %4283 = vrsqrt.f32 %v2183_v59  ;;  %v2171_v20 = vmul.f32 0.0051020407, %v2124_v17  ;;  %v2120_v11 = vpop.xlane.xlu1 %2119  ;;  %v3998_v59 = vld [vmem:[%s5396_s19 + $0x160] sm:$0xff] }
 0x389   : > { %v2170_v31 = vmul.f32 0.0051020407, %v2120_v11 }
 0x38a   : > { %v2185_v47 = vadd.f32 0.001, %v2171_v20 }
 0x38b   : > { %v2184_v37 = vadd.f32 0.001, %v2170_v31 }
 0x38c   : > { %4285 = vrsqrt.f32 %v2185_v47  ;;  %v2128_v56 = vpop.xlane.xlu1 %2127 }
 0x38d   : > { %4287 = vrsqrt.f32 %v2184_v37  ;;  %v2172_v28 = vmul.f32 0.0051020407, %v2128_v56 }
 0x38f   : > { %v2186_v1 = vadd.f32 0.001, %v2172_v28  ;;  %v2132_v3 = vpop.xlane.xlu0 %2131 }
 0x390   : > { %v2173_v7 = vmul.f32 0.0051020407, %v2132_v3  ;;  %v2136_v30 = vpop.xlane.xlu1 %2135  ;;  %v3999_v3 = vld [vmem:[%s5396_s19 + $0x168] sm:$0xff] }
 0x391   : > { %4289 = vrsqrt.f32 %v2186_v1  ;;  %v2174_v23 = vmul.f32 0.0051020407, %v2136_v30 }
 0x392   : > { %v4284_v53 = vpop.eup %4283  ;;  %v2187_v21 = vadd.f32 0.001, %v2173_v7 }
 0x393   : > { %v2188_v60 = vadd.f32 0.001, %v2174_v23  ;;  %v2140_v57 = vpop.xlane.xlu0 %2139  ;;  %v5978_v35 = vmul.f32 %v4284_v53, %v3996_v15  ;;  %v4000_v15 = vld [vmem:[%s5396_s19 + $0x170] sm:$0xff] }
 0x394   : > { %4291 = vrsqrt.f32 %v2187_v21  ;;  %v2175_v55 = vmul.f32 0.0051020407, %v2140_v57  ;;  %v2144_v63 = vpop.xlane.xlu1 %2143 }
 0x395   : > { %8065 = vst [vmem:[#allocation67_spill] sm:$0xff] %v5978_v35  ;;  %4293 = vrsqrt.f32 %v2188_v60  ;;  %v2176_v29 = vmul.f32 0.0051020407, %v2144_v63  ;;  %v2240_v5 = vmul.f32 %v5978_v35, %v5879_v8 }
 0x396   : > { %v4286_v6 = vpop.eup %4285  ;;  %v2189_v14 = vadd.f32 0.001, %v2175_v55 }
 0x397   : > { %v4288_v58 = vpop.eup %4287  ;;  %v2190_v61 = vadd.f32 0.001, %v2176_v29  ;;  %2268 = vrot.lane.b32.xlu0 %v2240_v5, %s4619_s20  ;;  %v2148_v62 = vpop.xlane.xlu0 %2147  ;;  %v5989_v37 = vmul.f32 %v4286_v6, %v3998_v59  ;;  %v4001_v5 = vld [vmem:[%s5396_s19 + $0x178] sm:$0xff] }
 0x398   : > { %4295 = vrsqrt.f32 %v2189_v14  ;;  %v2177_v17 = vmul.f32 0.0051020407, %v2148_v62  ;;  %v2152_v20 = vpop.xlane.xlu1 %2151  ;;  %v5985_v11 = vmul.f32 %v4288_v58, %v3997_v32  ;;  %v4002_v14 = vld [vmem:[%s5396_s19 + $0x180] sm:$0xff] }
 0x399   : > { %4297 = vrsqrt.f32 %v2190_v61  ;;  %v2178_v31 = vmul.f32 0.0051020407, %v2152_v20  ;;  %8067 = vst [vmem:[#allocation69_spill] sm:$0xff] %v5989_v37 }
 0x39a   : > { %8066 = vst [vmem:[#allocation68_spill] sm:$0xff] %v5985_v11  ;;  %v2191_v47 = vadd.f32 0.001, %v2177_v17  ;;  %v2241_v8 = vmul.f32 %v5985_v11, %v5887_v49  ;;  %v2242_v49 = vmul.f32 %v5989_v37, %v5885_v22 }
 0x39b   : > { %v4290_v56 = vpop.eup %4289  ;;  %v2192_v28 = vadd.f32 0.001, %v2178_v31  ;;  %v2156_v1 = vpop.xlane.xlu0 %2155 }
 0x39c   : > { %4299 = vrsqrt.f32 %v2191_v47  ;;  %v2179_v7 = vmul.f32 0.0051020407, %v2156_v1  ;;  %2270 = vrot.lane.b32.xlu1 %v2241_v8, %s4619_s20  ;;  %v2160_v30 = vpop.xlane.xlu1 %2159  ;;  %v5996_v60 = vmul.f32 %v4290_v56, %v3999_v3  ;;  %v4003_v8 = vld [vmem:[%s5396_s19 + $0x188] sm:$0xff] }
 0x39d   : > { %4301 = vrsqrt.f32 %v2192_v28  ;;  %v2180_v23 = vmul.f32 0.0051020407, %v2160_v30  ;;  %v4005_v30 = vld [vmem:[%s5396_s19 + $0x198] sm:$0xff] }
 0x39e   : > { %v4292_v53 = vpop.eup %4291  ;;  %v2193_v21 = vadd.f32 0.001, %v2179_v7  ;;  %8068 = vst [vmem:[#allocation70_spill] sm:$0xff] %v5996_v60  ;;  %v2243_v59 = vmul.f32 %v5996_v60, %v5898_v41 }
 0x39f   : > { %v4294_v57 = vpop.eup %4293  ;;  %v2194_v55 = vadd.f32 0.001, %v2180_v23  ;;  %v2164_v63 = vpop.xlane.xlu0 %2163  ;;  %v5998_v29 = vmul.f32 %v4292_v53, %v4000_v15  ;;  %v4006_v15 = vld [vmem:[%s5396_s19 + $0x1a0] sm:$0xff] }
 0x3a0   : > { %4303 = vrsqrt.f32 %v2193_v21  ;;  %v2181_v32 = vmul.f32 0.0051020407, %v2164_v63  ;;  %v2168_v6 = vpop.xlane.xlu1 %2167  ;;  %2272 = vrot.lane.b32.xlu1 %v2242_v49, %s4619_s20  ;;  %v6007_v17 = vmul.f32 %v4294_v57, %v4001_v5  ;;  %v4007_v57 = vld [vmem:[%s5396_s19 + $0x1a8] sm:$0xff] }
 0x3a1   : > { %8069 = vst [vmem:[#allocation71_spill] sm:$0xff] %v5998_v29  ;;  %4305 = vrsqrt.f32 %v2194_v55  ;;  %v2182_v58 = vmul.f32 0.0051020407, %v2168_v6  ;;  %v2244_v22 = vmul.f32 %v5998_v29, %v5912_v12  ;;  %v4004_v12 = vld [vmem:[%s5396_s19 + $0x190] sm:$0xff] }
 0x3a2   : > { %v4296_v61 = vpop.eup %4295  ;;  %v2195_v62 = vadd.f32 0.001, %v2181_v32  ;;  %8070 = vst [vmem:[#allocation72_spill] sm:$0xff] %v6007_v17  ;;  %v2245_v28 = vmul.f32 %v6007_v17, %v5900_v16  ;;  %v4008_v55 = vld [vmem:[%s5396_s19 + $0x1b0] sm:$0xff] }
 0x3a3   : > { %v4298_v20 = vpop.eup %4297  ;;  %v2196_v31 = vadd.f32 0.001, %v2182_v58  ;;  %2276 = vrot.lane.b32.xlu0 %v2244_v22, %s4619_s20  ;;  %v6010_v47 = vmul.f32 %v4296_v61, %v4002_v14  ;;  %v4009_v14 = vld [vmem:[%s5396_s19 + $0x1b8] sm:$0xff]  ;;  %v6062_v61 = vld [vmem:[%s4653_s15 + $0x388] sm:$0xff] }
 0x3a4   : > { %4307 = vrsqrt.f32 %v2195_v62  ;;  %2274 = vrot.lane.b32.xlu1 %v2243_v59, %s4619_s20  ;;  %v6019_v1 = vmul.f32 %v4298_v20, %v4003_v8  ;;  %v6070_v62 = vld [vmem:[%s4653_s15 + $0x3a8] sm:$0xff]  ;;  %v6074_v20 = vld [vmem:[%s4653_s15 + $0x3a0] sm:$0xff] }
 0x3a5   : > { %8071 = vst [vmem:[#allocation73_spill] sm:$0xff] %v6010_v47  ;;  %4309 = vrsqrt.f32 %v2196_v31  ;;  %v2246_v56 = vmul.f32 %v6010_v47, %v5926_v43  ;;  %v6079_v31 = vld [vmem:[%s4653_s15 + $0x3b8] sm:$0xff] }
 0x3a6   : > { %v4300_v41 = vpop.eup %4299  ;;  %8072 = vst [vmem:[#allocation74_spill] sm:$0xff] %v6019_v1  ;;  %v2247_v16 = vmul.f32 %v6019_v1, %v5914_v45  ;;  %v6175_v1 = vld [vmem:[%s4653_s15 + $0x440] sm:$0xff] }
 0x3a7   : > { %v4302_v3 = vpop.eup %4301  ;;  %2280 = vrot.lane.b32.xlu0 %v2246_v56, %s4619_s20  ;;  %v6022_v7 = vmul.f32 %v4300_v41, %v4004_v12  ;;  %v6083_v12 = vld [vmem:[%s4653_s15 + $0x398] sm:$0xff]  ;;  %v6086_v56 = vld [vmem:[%s4653_s15 + $0x3b0] sm:$0xff]  ;;  %v2593_v41 = vsel %vm205_vm0, %v6079_v31, 0.0 }
 0x3a8   : > { %2278 = vrot.lane.b32.xlu1 %v2245_v28, %s4619_s20  ;;  %v6031_v53 = vmul.f32 %v4302_v3, %v4005_v30  ;;  %v6091_v28 = vld [vmem:[%s4653_s15 + $0x3c8] sm:$0xff]  ;;  %v6094_v3 = vld [vmem:[%s4653_s15 + $0x390] sm:$0xff]  ;;  %v2585_v30 = vsel %vm205_vm0, %v6083_v12, 0.0 }
 0x3a9   : > { %8073 = vst [vmem:[#allocation75_spill] sm:$0xff] %v6022_v7  ;;  %v2248_v43 = vmul.f32 %v6022_v7, %v5940_v38 }
 0x3aa   : > { %v4304_v23 = vpop.eup %4303  ;;  %8074 = vst [vmem:[#allocation76_spill] sm:$0xff] %v6031_v53  ;;  %v2249_v45 = vmul.f32 %v6031_v53, %v5928_v2  ;;  %v6172_v53 = vld [vmem:[%s4653_s15 + $0x458] sm:$0xff] }
 0x3ab   : > { %v4306_v21 = vpop.eup %4305  ;;  %2284 = vrot.lane.b32.xlu0 %v2248_v43, %s4619_s20  ;;  %v6034_v49 = vmul.f32 %v4304_v23, %v4006_v15  ;;  %v2594_v15 = vadd.f32 %v6086_v56, %v2593_v41  ;;  %v6100_v43 = vld [vmem:[%s4653_s15 + $0x3d8] sm:$0xff]  ;;  %v6103_v23 = vld [vmem:[%s4653_s15 + $0x3c0] sm:$0xff]  ;;  %v2633_v60 = vsel %vm205_vm0, %v6172_v53, 0.0 }
 0x3ac   : > { %2282 = vrot.lane.b32.xlu1 %v2247_v16, %s4619_s20  ;;  %v6043_v5 = vmul.f32 %v4306_v21, %v4007_v57  ;;  %v2597_v16 = vsel %vm205_vm0, %v6091_v28, 0.0  ;;  %v2586_v21 = vadd.f32 %v6094_v3, %v2585_v30  ;;  %v6109_v57 = vld [vmem:[%s4653_s15 + $0x3e8] sm:$0xff] }
 0x3ad   : > { %8075 = vst [vmem:[#allocation77_spill] sm:$0xff] %v6034_v49  ;;  %v2250_v63 = vmul.f32 %v6034_v49, %v5954_v18 }
 0x3ae   : > { %v4308_v38 = vpop.eup %4307  ;;  %8076 = vst [vmem:[#allocation78_spill] sm:$0xff] %v6043_v5  ;;  %v2251_v58 = vmul.f32 %v6043_v5, %v5942_v25  ;;  %v2581_v25 = vsel %vm205_vm0, %v6062_v61, 0.0  ;;  %v6166_v5 = vld [vmem:[%s4653_s15 + $0x430] sm:$0xff] }
 0x3af   : > { %v4310_v32 = vpop.eup %4309  ;;  %2288 = vrot.lane.b32.xlu0 %v2250_v63, %s4619_s20  ;;  %v6046_v6 = vmul.f32 %v4308_v38, %v4008_v55  ;;  %v6112_v55 = vld [vmem:[%s4653_s15 + $0x3d0] sm:$0xff]  ;;  %v2601_v63 = vsel %vm205_vm0, %v6100_v43, 0.0  ;;  %v2598_v38 = vadd.f32 %v6103_v23, %v2597_v16 }
 0x3b0   : > { %2286 = vrot.lane.b32.xlu1 %v2249_v45, %s4619_s20  ;;  %v6054_v2 = vmul.f32 %v4310_v32, %v4009_v14  ;;  %v6118_v45 = vld [vmem:[%s4653_s15 + $0x3f8] sm:$0xff]  ;;  %v6121_v32 = vld [vmem:[%s4653_s15 + $0x3e0] sm:$0xff]  ;;  %v2605_v14 = vsel %vm205_vm0, %v6109_v57, 0.0  ;;  %v6148_v16 = vld [vmem:[%s4653_s15 + $0x410] sm:$0xff] }
 0x3b1   : > { %8077 = vst [vmem:[#allocation79_spill] sm:$0xff] %v6046_v6  ;;  %v2252_v18 = vmul.f32 %v6046_v6, %v5968_v50  ;;  %v6065_v50 = vld [vmem:[%s4653_s15 + $0x380] sm:$0xff] }
 0x3b2   : > { %8078 = vst [vmem:[#allocation80_spill] sm:$0xff] %v6054_v2  ;;  %v2253_v22 = vmul.f32 %v6054_v2, %v5956_v26  ;;  %v2582_v59 = vadd.f32 %v6065_v50, %v2581_v25  ;;  %v2589_v26 = vsel %vm205_vm0, %v6070_v62, 0.0  ;;  %v2609_v25 = vsel %vm205_vm0, %v6118_v45, 0.0  ;;  %v6163_v2 = vld [vmem:[%s4653_s15 + $0x448] sm:$0xff] }
 0x3b3   : > { %2292 = vrot.lane.b32.xlu0 %v2252_v18, %s4619_s20  ;;  %v2590_v8 = vadd.f32 %v6074_v20, %v2589_v26  ;;  %v2602_v18 = vadd.f32 %v6112_v55, %v2601_v63  ;;  %v6136_v26 = vld [vmem:[%s4653_s15 + $0x418] sm:$0xff]  ;;  %v2629_v17 = vsel %vm205_vm0, %v6163_v2, 0.0 }
 0x3b4   : > { %2290 = vrot.lane.b32.xlu1 %v2251_v58, %s4619_s20  ;;  %v6127_v58 = vld [vmem:[%s4653_s15 + $0x408] sm:$0xff] }
 0x3b5   : > { %v2613_v41 = vsel %vm205_vm0, %v6127_v58, 0.0 }
 0x3b8   : > { %2294 = vrot.lane.b32.xlu1 %v2253_v22, %s4619_s20  ;;  %v6130_v22 = vld [vmem:[%s4653_s15 + $0x3f0] sm:$0xff] }
 0x3b9   : > { %v2610_v30 = vadd.f32 %v6130_v22, %v2609_v25 }
 0x3d2   : > { %2583 = vadd.xlane.f32.xlu0 %v2582_v59  ;;  %v2606_v59 = vadd.f32 %v6121_v32, %v2605_v14  ;;  %v6157_v14 = vld [vmem:[%s4653_s15 + $0x420] sm:$0xff] }
 0x3d6   : > { %2591 = vadd.xlane.f32.xlu0 %v2590_v8  ;;  %v6139_v8 = vld [vmem:[%s4653_s15 + $0x400] sm:$0xff] }
 0x3d7   : > { %v2614_v63 = vadd.f32 %v6139_v8, %v2613_v41 }
 0x3da   : > { %2595 = vadd.xlane.f32.xlu0 %v2594_v15  ;;  %v6145_v15 = vld [vmem:[%s4653_s15 + $0x428] sm:$0xff] }
 0x3dc   : > { %2587 = vadd.xlane.f32.xlu1 %v2586_v21  ;;  %v2617_v21 = vsel %vm205_vm0, %v6136_v26, 0.0 }
 0x3dd   : > { %v2618_v25 = vadd.f32 %v6148_v16, %v2617_v21  ;;  %v6181_v21 = vld [vmem:[%s4653_s15 + $0x450] sm:$0xff] }
 0x3de   : > { %2599 = vadd.xlane.f32.xlu0 %v2598_v38  ;;  %v6154_v38 = vld [vmem:[%s4653_s15 + $0x438] sm:$0xff] }
 0x3e0   : > { %2603 = vadd.xlane.f32.xlu1 %v2602_v18  ;;  %v2621_v18 = vsel %vm205_vm0, %v6145_v15, 0.0 }
 0x3e1   : > { %v2622_v41 = vadd.f32 %v6157_v14, %v2621_v18  ;;  %v2634_v18 = vadd.f32 %v6181_v21, %v2633_v60 }
 0x3e2   : > { %2607 = vadd.xlane.f32.xlu0 %v2606_v59  ;;  %v2625_v59 = vsel %vm205_vm0, %v6154_v38, 0.0 }
 0x3e4   : > { %2611 = vadd.xlane.f32.xlu1 %v2610_v30  ;;  %v2626_v30 = vadd.f32 %v6166_v5, %v2625_v59 }
 0x3e6   : > { %2615 = vadd.xlane.f32.xlu0 %v2614_v63  ;;  %v2630_v63 = vadd.f32 %v6175_v1, %v2629_v17 }
 0x3e8   : > { %2619 = vadd.xlane.f32.xlu1 %v2618_v25 }
 0x3ea   : > { %2623 = vadd.xlane.f32.xlu0 %v2622_v41 }
 0x3ec   : > { %2627 = vadd.xlane.f32.xlu1 %v2626_v30 }
 0x3ee   : > { %2631 = vadd.xlane.f32.xlu0 %v2630_v63 }
 0x3f0   : > { %2635 = vadd.xlane.f32.xlu1 %v2634_v18 }
 0x409   : > { %v6189_v6 = vpop.permute.xlu0 %2268 }
 0x40a   : > { %8080 = vst [vmem:[#allocation82_spill] sm:$0xff] %v6189_v6 }
 0x40e   : > { %v6187_v35 = vpop.permute.xlu1 %2270 }
 0x40f   : > { %8079 = vst [vmem:[#allocation81_spill] sm:$0xff] %v6187_v35 }
 0x412   : > { %v6191_v25 = vpop.permute.xlu1 %2272 }
 0x413   : > { %8081 = vst [vmem:[#allocation83_spill] sm:$0xff] %v6191_v25 }
 0x415   : > { %v6193_v59 = vpop.permute.xlu0 %2276 }
 0x416   : > { %8082 = vst [vmem:[#allocation84_spill] sm:$0xff] %v6193_v59  ;;  %v6195_v49 = vpop.permute.xlu1 %2274 }
 0x417   : > { %8083 = vst [vmem:[#allocation85_spill] sm:$0xff] %v6195_v49 }
 0x419   : > { %v6197_v7 = vpop.permute.xlu0 %2280 }
 0x41a   : > { %8084 = vst [vmem:[#allocation86_spill] sm:$0xff] %v6197_v7  ;;  %v6199_v41 = vpop.permute.xlu1 %2278 }
 0x41b   : > { %8085 = vst [vmem:[#allocation87_spill] sm:$0xff] %v6199_v41 }
 0x41d   : > { %v6201_v17 = vpop.permute.xlu0 %2284 }
 0x41e   : > { %8086 = vst [vmem:[#allocation88_spill] sm:$0xff] %v6201_v17  ;;  %v6203_v30 = vpop.permute.xlu1 %2282 }
 0x41f   : > { %8087 = vst [vmem:[#allocation89_spill] sm:$0xff] %v6203_v30 }
 0x421   : > { %v6205_v60 = vpop.permute.xlu0 %2288 }
 0x422   : > { %8088 = vst [vmem:[#allocation90_spill] sm:$0xff] %v6205_v60  ;;  %v6207_v63 = vpop.permute.xlu1 %2286 }
 0x423   : > { %8089 = vst [vmem:[#allocation91_spill] sm:$0xff] %v6207_v63 }
 0x425   : > { %v6209_v18 = vpop.permute.xlu0 %2292 }
 0x426   : > { %8090 = vst [vmem:[#allocation92_spill] sm:$0xff] %v6209_v18  ;;  %v6211_v35 = vpop.permute.xlu1 %2290 }
 0x427   : > { %8091 = vst [vmem:[#allocation93_spill] sm:$0xff] %v6211_v35 }
 0x42a   : > { %v6221_v6 = vpop.permute.xlu1 %2294 }
 0x42b   : > { %8092 = vst [vmem:[#allocation94_spill] sm:$0xff] %v6221_v6 }
 0x45f   : > { %v2584_v25 = vpop.xlane.xlu0 %2583 }
 0x460   : > { %v6213_v59 = vmul.f32 0.0051020407, %v2584_v25 }
 0x462   : > { %v2651_v7 = vsub.f32 %v6065_v50, %v6213_v59  ;;  %v2652_v41 = vsub.f32 %v6062_v61, %v6213_v59 }
 0x463   : > { %v2592_v17 = vpop.xlane.xlu0 %2591 }
 0x464   : > { %v2680_v49 = vmul.f32 %v2652_v41, %v2652_v41  ;;  %v6219_v30 = vmul.f32 0.0051020407, %v2592_v17  ;;  %v2679_v60 = vmul.f32 %v2651_v7, %v2651_v7 }
 0x466   : > { %v2655_v18 = vsub.f32 %v6074_v20, %v6219_v30  ;;  %v2656_v25 = vsub.f32 %v6070_v62, %v6219_v30  ;;  %v2707_v35 = vsel %vm205_vm0, %v2680_v49, 0.0 }
 0x467   : > { %v2596_v63 = vpop.xlane.xlu0 %2595  ;;  %v2708_v50 = vadd.f32 %v2707_v35, %v2679_v60 }
 0x468   : > { %v2684_v47 = vmul.f32 %v2656_v25, %v2656_v25  ;;  %v6228_v29 = vmul.f32 0.0051020407, %v2596_v63  ;;  %v2683_v61 = vmul.f32 %v2655_v18, %v2655_v18 }
 0x469   : > { %v2588_v41 = vpop.xlane.xlu1 %2587  ;;  %2709 = vadd.xlane.f32.xlu0 %v2708_v50 }
 0x46a   : > { %v2658_v7 = vsub.f32 %v6079_v31, %v6228_v29  ;;  %v6232_v17 = vmul.f32 0.0051020407, %v2588_v41  ;;  %v2715_v20 = vsel %vm205_vm0, %v2684_v47, 0.0  ;;  %v2657_v62 = vsub.f32 %v6086_v56, %v6228_v29 }
 0x46b   : > { %v2600_v6 = vpop.xlane.xlu0 %2599  ;;  %v2716_v49 = vadd.f32 %v2715_v20, %v2683_v61 }
 0x46c   : > { %v2686_v37 = vmul.f32 %v2658_v7, %v2658_v7  ;;  %v2653_v35 = vsub.f32 %v6094_v3, %v6232_v17  ;;  %v2654_v60 = vsub.f32 %v6083_v12, %v6232_v17  ;;  %v6241_v63 = vmul.f32 0.0051020407, %v2600_v6 }
 0x46d   : > { %2717 = vadd.xlane.f32.xlu0 %v2716_v49  ;;  %v2604_v31 = vpop.xlane.xlu1 %2603  ;;  %v2685_v41 = vmul.f32 %v2657_v62, %v2657_v62 }
 0x46e   : > { %v2682_v18 = vmul.f32 %v2654_v60, %v2654_v60  ;;  %v2659_v47 = vsub.f32 %v6103_v23, %v6241_v63  ;;  %v2660_v56 = vsub.f32 %v6091_v28, %v6241_v63  ;;  %v6247_v25 = vmul.f32 0.0051020407, %v2604_v31 }
 0x46f   : > { %v2608_v50 = vpop.xlane.xlu0 %2607  ;;  %v2681_v61 = vmul.f32 %v2653_v35, %v2653_v35  ;;  %v2719_v3 = vsel %vm205_vm0, %v2686_v37, 0.0 }
 0x470   : > { %v2688_v7 = vmul.f32 %v2660_v56, %v2660_v56  ;;  %v6250_v12 = vmul.f32 0.0051020407, %v2608_v50  ;;  %v2661_v6 = vsub.f32 %v6112_v55, %v6247_v25  ;;  %v2662_v20 = vsub.f32 %v6100_v43, %v6247_v25 }
 0x471   : > { %v2711_v23 = vsel %vm205_vm0, %v2682_v18, 0.0  ;;  %v2612_v49 = vpop.xlane.xlu1 %2611  ;;  %v2687_v28 = vmul.f32 %v2659_v47, %v2659_v47  ;;  %v2720_v50 = vadd.f32 %v2719_v3, %v2685_v41 }
 0x472   : > { %v2663_v60 = vsub.f32 %v6121_v32, %v6250_v12  ;;  %v2664_v62 = vsub.f32 %v6109_v57, %v6250_v12  ;;  %v2690_v37 = vmul.f32 %v2662_v20, %v2662_v20  ;;  %v2712_v35 = vadd.f32 %v2711_v23, %v2681_v61 }
 0x473   : > { %v2616_v31 = vpop.xlane.xlu0 %2615  ;;  %v6261_v56 = vmul.f32 0.0051020407, %v2612_v49  ;;  %v2723_v55 = vsel %vm205_vm0, %v2688_v7, 0.0  ;;  %v2689_v11 = vmul.f32 %v2661_v6, %v2661_v6 }
 0x474   : > { %v2692_v43 = vmul.f32 %v2664_v62, %v2664_v62  ;;  %2713 = vadd.xlane.f32.xlu1 %v2712_v35  ;;  %v6264_v18 = vmul.f32 0.0051020407, %v2616_v31  ;;  %v2724_v47 = vadd.f32 %v2723_v55, %v2687_v28  ;;  %v2691_v42 = vmul.f32 %v2663_v60, %v2663_v60 }
 0x475   : > { %v2665_v32 = vsub.f32 %v6130_v22, %v6261_v56  ;;  %v2666_v57 = vsub.f32 %v6118_v45, %v6261_v56  ;;  %v2620_v61 = vpop.xlane.xlu1 %2619  ;;  %v2727_v20 = vsel %vm205_vm0, %v2690_v37, 0.0 }
 0x476   : > { %v2667_v7 = vsub.f32 %v6139_v8, %v6264_v18  ;;  %v2668_v41 = vsub.f32 %v6127_v58, %v6264_v18  ;;  %2725 = vadd.xlane.f32.xlu0 %v2724_v47  ;;  %v6275_v3 = vmul.f32 0.0051020407, %v2620_v61  ;;  %v2731_v6 = vsel %vm205_vm0, %v2692_v43, 0.0 }
 0x477   : > { %v2694_v23 = vmul.f32 %v2666_v57, %v2666_v57  ;;  %v2624_v49 = vpop.xlane.xlu0 %2623  ;;  %v2732_v22 = vadd.f32 %v2731_v6, %v2691_v42  ;;  %v2728_v28 = vadd.f32 %v2727_v20, %v2689_v11  ;;  %v2693_v60 = vmul.f32 %v2665_v32, %v2665_v32 }
 0x478   : > { %v2696_v45 = vmul.f32 %v2668_v41, %v2668_v41  ;;  %2721 = vadd.xlane.f32.xlu1 %v2720_v50  ;;  %v6278_v62 = vmul.f32 0.0051020407, %v2624_v49  ;;  %v2669_v8 = vsub.f32 %v6148_v16, %v6275_v3  ;;  %v2670_v58 = vsub.f32 %v6136_v26, %v6275_v3 }
 0x479   : > { %v2628_v37 = vpop.xlane.xlu1 %2627  ;;  %v2695_v35 = vmul.f32 %v2667_v7, %v2667_v7  ;;  %v2735_v31 = vsel %vm205_vm0, %v2694_v23, 0.0 }
 0x47a   : > { %v2671_v55 = vsub.f32 %v6157_v14, %v6278_v62  ;;  %v2672_v42 = vsub.f32 %v6145_v15, %v6278_v62  ;;  %v2698_v11 = vmul.f32 %v2670_v58, %v2670_v58  ;;  %2733 = vadd.xlane.f32.xlu0 %v2732_v22  ;;  %v6289_v50 = vmul.f32 0.0051020407, %v2628_v37 }
 0x47b   : > { %v2632_v43 = vpop.xlane.xlu0 %2631  ;;  %v2739_v16 = vsel %vm205_vm0, %v2696_v45, 0.0  ;;  %v2736_v47 = vadd.f32 %v2735_v31, %v2693_v60  ;;  %v2697_v32 = vmul.f32 %v2669_v8, %v2669_v8 }
 0x47c   : > { %v2700_v26 = vmul.f32 %v2672_v42, %v2672_v42  ;;  %2729 = vadd.xlane.f32.xlu1 %v2728_v28  ;;  %v6292_v57 = vmul.f32 0.0051020407, %v2632_v43  ;;  %v2673_v61 = vsub.f32 %v6166_v5, %v6289_v50  ;;  %v2674_v14 = vsub.f32 %v6154_v38, %v6289_v50 }
 0x47d   : > { %v2740_v15 = vadd.f32 %v2739_v16, %v2695_v35  ;;  %v2636_v20 = vpop.xlane.xlu1 %2635  ;;  %v2699_v7 = vmul.f32 %v2671_v55, %v2671_v55  ;;  %v2743_v41 = vsel %vm205_vm0, %v2698_v11, 0.0 }
 0x47e   : > { %v2675_v6 = vsub.f32 %v6175_v1, %v6292_v57  ;;  %v2676_v23 = vsub.f32 %v6163_v2, %v6292_v57  ;;  %v2702_v49 = vmul.f32 %v2674_v14, %v2674_v14  ;;  %v6303_v22 = vmul.f32 0.0051020407, %v2636_v20 }
 0x47f   : > { %2741 = vadd.xlane.f32.xlu0 %v2740_v15  ;;  %v2747_v5 = vsel %vm205_vm0, %v2700_v26, 0.0  ;;  %v2744_v28 = vadd.f32 %v2743_v41, %v2697_v32  ;;  %v2701_v60 = vmul.f32 %v2673_v61, %v2673_v61 }
 0x480   : > { %v2704_v38 = vmul.f32 %v2676_v23, %v2676_v23  ;;  %2737 = vadd.xlane.f32.xlu1 %v2736_v47  ;;  %v2677_v45 = vsub.f32 %v6181_v21, %v6303_v22  ;;  %v2678_v8 = vsub.f32 %v6172_v53, %v6303_v22  ;;  %v2748_v1 = vadd.f32 %v2747_v5, %v2699_v7  ;;  %v4066_v7 = vld [vmem:[%s5396_s19 + $0x1c0] sm:$0xff] }
 0x481   : > { %v2703_v58 = vmul.f32 %v2675_v6, %v2675_v6  ;;  %v2751_v2 = vsel %vm205_vm0, %v2702_v49, 0.0  ;;  %v7873_v53 = vmov 0  }
 0x482   : > { %v2706_v37 = vmul.f32 %v2678_v8, %v2678_v8  ;;  %v2755_v35 = vsel %vm205_vm0, %v2704_v38, 0.0  ;;  %v2752_v55 = vadd.f32 %v2751_v2, %v2701_v60  ;;  %v2705_v42 = vmul.f32 %v2677_v45, %v2677_v45  ;;  %4193 = vset.pattern.permute.xlu1 %v7873_v53  ;;  %4195 = vset.pattern.permute.xlu0 %v7873_v53  ;;  %v6501_v53 = vld [vmem:[%s4653_s15 + $0x508] sm:$0xff] }
 0x483   : > { %2749 = vadd.xlane.f32.xlu0 %v2748_v1  ;;  %v2756_v31 = vadd.f32 %v2755_v35, %v2703_v58 }
 0x484   : > { %2745 = vadd.xlane.f32.xlu1 %v2744_v28  ;;  %v2759_v11 = vsel %vm205_vm0, %v2706_v37, 0.0 }
 0x485   : > { %v2760_v21 = vadd.f32 %v2759_v11, %v2705_v42 }
 0x487   : > { %2757 = vadd.xlane.f32.xlu0 %v2756_v31 }
 0x488   : > { %2753 = vadd.xlane.f32.xlu1 %v2752_v55 }
 0x48c   : > { %2761 = vadd.xlane.f32.xlu1 %v2760_v21  ;;  %v4067_v21 = vld [vmem:[%s5396_s19 + $0x1c8] sm:$0xff] }
 0x4f6   : > { %v2710_v43 = vpop.xlane.xlu0 %2709 }
 0x4f7   : > { %v2763_v16 = vmul.f32 0.0051020407, %v2710_v43 }
 0x4f9   : > { %v2777_v47 = vadd.f32 0.001, %v2763_v16 }
 0x4fa   : > { %v2718_v32 = vpop.xlane.xlu0 %2717 }
 0x4fb   : > { %4311 = vrsqrt.f32 %v2777_v47  ;;  %v2765_v26 = vmul.f32 0.0051020407, %v2718_v32 }
 0x4fd   : > { %v2779_v61 = vadd.f32 0.001, %v2765_v26  ;;  %v4070_v26 = vld [vmem:[%s5396_s19 + $0x1e0] sm:$0xff] }
 0x4ff   : > { %4313 = vrsqrt.f32 %v2779_v61  ;;  %v4068_v61 = vld [vmem:[%s5396_s19 + $0x1d0] sm:$0xff] }
 0x501   : > { %v2714_v14 = vpop.xlane.xlu1 %2713 }
 0x502   : > { %v2764_v15 = vmul.f32 0.0051020407, %v2714_v14 }
 0x503   : > { %v2726_v20 = vpop.xlane.xlu0 %2725 }
 0x504   : > { %v2778_v41 = vadd.f32 0.001, %v2764_v15  ;;  %v2767_v6 = vmul.f32 0.0051020407, %v2726_v20 }
 0x505   : > { %v4312_v23 = vpop.eup %4311  ;;  %v2722_v49 = vpop.xlane.xlu1 %2721 }
 0x506   : > { %4315 = vrsqrt.f32 %v2778_v41  ;;  %v2781_v5 = vadd.f32 0.001, %v2767_v6  ;;  %v2766_v28 = vmul.f32 0.0051020407, %v2722_v49  ;;  %v6316_v60 = vmul.f32 %v4312_v23, %v4066_v7 }
 0x507   : > { %v2734_v38 = vpop.xlane.xlu0 %2733 }
 0x508   : > { %4317 = vrsqrt.f32 %v2781_v5  ;;  %v2780_v45 = vadd.f32 0.001, %v2766_v28  ;;  %v2769_v8 = vmul.f32 0.0051020407, %v2734_v38  ;;  %v2834_v1 = vmul.f32 %v6316_v60, %v6213_v59 }
 0x509   : > { %v2730_v58 = vpop.xlane.xlu1 %2729  ;;  %v4314_v43 = vpop.eup %4313 }
 0x50a   : > { %4319 = vrsqrt.f32 %v2780_v45  ;;  %v2783_v2 = vadd.f32 0.001, %v2769_v8  ;;  %v2768_v37 = vmul.f32 0.0051020407, %v2730_v58  ;;  %2862 = vrot.lane.b32.xlu0 %v2834_v1, %s4619_s20  ;;  %v6330_v5 = vmul.f32 %v4314_v43, %v4068_v61  ;;  %v4072_v8 = vld [vmem:[%s5396_s19 + $0x1f0] sm:$0xff]  ;;  %v4069_v1 = vld [vmem:[%s5396_s19 + $0x1d8] sm:$0xff] }
 0x50c   : > { %4321 = vrsqrt.f32 %v2783_v2  ;;  %v2782_v35 = vadd.f32 0.001, %v2768_v37  ;;  %v2742_v31 = vpop.xlane.xlu0 %2741 }
 0x50d   : > { %v2771_v55 = vmul.f32 0.0051020407, %v2742_v31  ;;  %v2738_v42 = vpop.xlane.xlu1 %2737 }
 0x50e   : > { %4323 = vrsqrt.f32 %v2782_v35  ;;  %v2770_v11 = vmul.f32 0.0051020407, %v2738_v42 }
 0x50f   : > { %v2785_v16 = vadd.f32 0.001, %v2771_v55  ;;  %v2836_v55 = vmul.f32 %v6330_v5, %v6219_v30 }
 0x510   : > { %v4316_v47 = vpop.eup %4315  ;;  %v2784_v59 = vadd.f32 0.001, %v2770_v11  ;;  %v2750_v32 = vpop.xlane.xlu0 %2749 }
 0x511   : > { %4325 = vrsqrt.f32 %v2785_v16  ;;  %v2773_v14 = vmul.f32 0.0051020407, %v2750_v32  ;;  %v2746_v15 = vpop.xlane.xlu1 %2745  ;;  %v6324_v20 = vmul.f32 %v4316_v47, %v4067_v21  ;;  %v4071_v16 = vld [vmem:[%s5396_s19 + $0x1e8] sm:$0xff] }
 0x512   : > { %v4318_v7 = vpop.eup %4317  ;;  %4327 = vrsqrt.f32 %v2784_v59  ;;  %v2772_v41 = vmul.f32 0.0051020407, %v2746_v15  ;;  %v4074_v59 = vld [vmem:[%s5396_s19 + $0x200] sm:$0xff] }
 0x513   : > { %v2787_v6 = vadd.f32 0.001, %v2773_v14  ;;  %v2835_v23 = vmul.f32 %v6324_v20, %v6232_v17  ;;  %v6328_v49 = vmul.f32 %v4318_v7, %v4070_v26 }
 0x514   : > { %v4320_v28 = vpop.eup %4319  ;;  %v2786_v38 = vadd.f32 0.001, %v2772_v41  ;;  %v2758_v45 = vpop.xlane.xlu0 %2757  ;;  %v4073_v41 = vld [vmem:[%s5396_s19 + $0x1f8] sm:$0xff] }
 0x515   : > { %4329 = vrsqrt.f32 %v2787_v6  ;;  %v2775_v58 = vmul.f32 0.0051020407, %v2758_v45  ;;  %2864 = vrot.lane.b32.xlu1 %v2835_v23, %s4619_s20  ;;  %v2754_v2 = vpop.xlane.xlu1 %2753  ;;  %v2838_v37 = vmul.f32 %v6328_v49, %v6241_v63  ;;  %v6342_v11 = vmul.f32 %v4320_v28, %v4069_v1  ;;  %v4078_v1 = vld [vmem:[%s5396_s19 + $0x220] sm:$0xff] }
 0x516   : > { %v4322_v17 = vpop.eup %4321  ;;  %4331 = vrsqrt.f32 %v2786_v38  ;;  %v2774_v35 = vmul.f32 0.0051020407, %v2754_v2 }
 0x517   : > { %v2789_v31 = vadd.f32 0.001, %v2775_v58  ;;  %2870 = vrot.lane.b32.xlu0 %v2838_v37, %s4619_s20  ;;  %v6340_v42 = vmul.f32 %v4322_v17, %v4072_v8  ;;  %8093 = vst [vmem:[#allocation95_spill] sm:$0xff] %v6342_v11  ;;  %v2837_v26 = vmul.f32 %v6342_v11, %v6228_v29  ;;  %v4075_v8 = vld [vmem:[%s5396_s19 + $0x208] sm:$0xff]  ;;  %v6520_v11 = vld [vmem:[%s4653_s15 + $0x520] sm:$0xff] }
 0x518   : > { %v4324_v21 = vpop.eup %4323  ;;  %v2788_v43 = vadd.f32 0.001, %v2774_v35  ;;  %v4077_v35 = vld [vmem:[%s5396_s19 + $0x218] sm:$0xff] }
 0x519   : > { %4333 = vrsqrt.f32 %v2789_v31  ;;  %v2762_v63 = vpop.xlane.xlu1 %2761  ;;  %2866 = vrot.lane.b32.xlu1 %v2836_v55, %s4619_s20  ;;  %v2840_v47 = vmul.f32 %v6340_v42, %v6250_v12  ;;  %v6352_v61 = vmul.f32 %v4324_v21, %v4071_v16  ;;  %v4076_v12 = vld [vmem:[%s5396_s19 + $0x210] sm:$0xff]  ;;  %v4079_v21 = vld [vmem:[%s5396_s19 + $0x228] sm:$0xff] }
 0x51a   : > { %4335 = vrsqrt.f32 %v2788_v43  ;;  %v2776_v32 = vmul.f32 0.0051020407, %v2762_v63  ;;  %v6403_v63 = vld [vmem:[%s4653_s15 + $0x470] sm:$0xff] }
 0x51b   : > { %v4326_v30 = vpop.eup %4325  ;;  %2874 = vrot.lane.b32.xlu0 %v2840_v47, %s4619_s20  ;;  %8094 = vst [vmem:[#allocation96_spill] sm:$0xff] %v6352_v61  ;;  %v2839_v29 = vmul.f32 %v6352_v61, %v6247_v25  ;;  %v6516_v61 = vld [vmem:[%s4653_s15 + $0x528] sm:$0xff] }
 0x51c   : > { %v4328_v14 = vpop.eup %4327  ;;  %v2790_v15 = vadd.f32 0.001, %v2776_v32  ;;  %v6354_v7 = vmul.f32 %v4326_v30, %v4074_v59  ;;  %v6412_v32 = vld [vmem:[%s4653_s15 + $0x480] sm:$0xff]  ;;  %v6417_v30 = vld [vmem:[%s4653_s15 + $0x498] sm:$0xff] }
 0x51d   : > { %2868 = vrot.lane.b32.xlu1 %v2837_v26, %s4619_s20  ;;  %v6363_v28 = vmul.f32 %v4328_v14, %v4073_v41  ;;  %v6421_v14 = vld [vmem:[%s4653_s15 + $0x490] sm:$0xff]  ;;  %v6426_v41 = vld [vmem:[%s4653_s15 + $0x4b8] sm:$0xff] }
 0x51e   : > { %4337 = vrsqrt.f32 %v2790_v15  ;;  %v2842_v6 = vmul.f32 %v6354_v7, %v6264_v18  ;;  %v3187_v15 = vsel %vm205_vm0, %v6417_v30, 0.0 }
 0x51f   : > { %v4330_v23 = vpop.eup %4329  ;;  %8095 = vst [vmem:[#allocation97_spill] sm:$0xff] %v6363_v28  ;;  %v2841_v2 = vmul.f32 %v6363_v28, %v6261_v56  ;;  %v3215_v28 = vsel %vm205_vm0, %v6501_v53, 0.0 }
 0x520   : > { %v4332_v38 = vpop.eup %4331  ;;  %2878 = vrot.lane.b32.xlu0 %v2842_v6, %s4619_s20  ;;  %v6366_v45 = vmul.f32 %v4330_v23, %v4076_v12  ;;  %v3188_v12 = vadd.f32 %v6421_v14, %v3187_v15  ;;  %v6430_v6 = vld [vmem:[%s4653_s15 + $0x468] sm:$0xff]  ;;  %v6433_v23 = vld [vmem:[%s4653_s15 + $0x4b0] sm:$0xff] }
 0x521   : > { %2872 = vrot.lane.b32.xlu1 %v2839_v29, %s4619_s20  ;;  %v6375_v25 = vmul.f32 %v4332_v38, %v4075_v8  ;;  %v3195_v29 = vsel %vm205_vm0, %v6426_v41, 0.0  ;;  %v6438_v38 = vld [vmem:[%s4653_s15 + $0x4d8] sm:$0xff]  ;;  %v6441_v8 = vld [vmem:[%s4653_s15 + $0x460] sm:$0xff] }
 0x522   : > { %v2844_v18 = vmul.f32 %v6366_v45, %v6278_v62 }
 0x523   : > { %v4334_v58 = vpop.eup %4333  ;;  %8096 = vst [vmem:[#allocation98_spill] sm:$0xff] %v6375_v25  ;;  %v2843_v31 = vmul.f32 %v6375_v25, %v6275_v3  ;;  %v6510_v25 = vld [vmem:[%s4653_s15 + $0x500] sm:$0xff] }
 0x524   : > { %v4336_v37 = vpop.eup %4335  ;;  %2882 = vrot.lane.b32.xlu0 %v2844_v18, %s4619_s20  ;;  %v6378_v17 = vmul.f32 %v4334_v58, %v4078_v1  ;;  %v3175_v1 = vsel %vm205_vm0, %v6430_v6, 0.0  ;;  %v3196_v18 = vadd.f32 %v6433_v23, %v3195_v29  ;;  %v6447_v58 = vld [vmem:[%s4653_s15 + $0x4a8] sm:$0xff] }
 0x525   : > { %2876 = vrot.lane.b32.xlu1 %v2841_v2, %s4619_s20  ;;  %v6386_v56 = vmul.f32 %v4336_v37, %v4077_v35  ;;  %v6450_v2 = vld [vmem:[%s4653_s15 + $0x4d0] sm:$0xff]  ;;  %v3203_v37 = vsel %vm205_vm0, %v6438_v38, 0.0  ;;  %v3176_v35 = vadd.f32 %v6441_v8, %v3175_v1  ;;  %v6483_v29 = vld [vmem:[%s4653_s15 + $0x4e8] sm:$0xff] }
 0x526   : > { %v2846_v62 = vmul.f32 %v6378_v17, %v6292_v57  ;;  %v6400_v57 = vld [vmem:[%s4653_s15 + $0x478] sm:$0xff]  ;;  %v6486_v1 = vld [vmem:[%s4653_s15 + $0x510] sm:$0xff] }
 0x527   : > { %v2845_v43 = vmul.f32 %v6386_v56, %v6289_v50  ;;  %v3179_v47 = vsel %vm205_vm0, %v6400_v57, 0.0  ;;  %v6408_v50 = vld [vmem:[%s4653_s15 + $0x488] sm:$0xff] }
 0x528   : > { %v4338_v55 = vpop.eup %4337  ;;  %2886 = vrot.lane.b32.xlu0 %v2846_v62, %s4619_s20  ;;  %v3180_v59 = vadd.f32 %v6403_v63, %v3179_v47  ;;  %v6456_v62 = vld [vmem:[%s4653_s15 + $0x4f8] sm:$0xff] }
 0x529   : > { %2880 = vrot.lane.b32.xlu1 %v2843_v31, %s4619_s20  ;;  %v6393_v16 = vmul.f32 %v4338_v55, %v4079_v21  ;;  %v6459_v31 = vld [vmem:[%s4653_s15 + $0x4a0] sm:$0xff]  ;;  %v3191_v55 = vsel %vm205_vm0, %v6447_v58, 0.0  ;;  %v3204_v21 = vadd.f32 %v6450_v2, %v3203_v37  ;;  %v3211_v47 = vsel %vm205_vm0, %v6456_v62, 0.0 }
 0x52b   : > { %8097 = vst [vmem:[#allocation99_spill] sm:$0xff] %v6393_v16  ;;  %v2847_v3 = vmul.f32 %v6393_v16, %v6303_v22  ;;  %v3183_v22 = vsel %vm205_vm0, %v6408_v50, 0.0  ;;  %v6504_v16 = vld [vmem:[%s4653_s15 + $0x530] sm:$0xff] }
 0x52c   : > { %v3184_v26 = vadd.f32 %v6412_v32, %v3183_v22  ;;  %v6474_v22 = vld [vmem:[%s4653_s15 + $0x518] sm:$0xff] }
 0x52d   : > { %2884 = vrot.lane.b32.xlu1 %v2845_v43, %s4619_s20  ;;  %v6465_v43 = vld [vmem:[%s4653_s15 + $0x4c8] sm:$0xff] }
 0x52e   : > { %v3199_v15 = vsel %vm205_vm0, %v6465_v43, 0.0 }
 0x531   : > { %2888 = vrot.lane.b32.xlu1 %v2847_v3, %s4619_s20  ;;  %v6468_v3 = vld [vmem:[%s4653_s15 + $0x4f0] sm:$0xff] }
 0x547   : > { %3181 = vadd.xlane.f32.xlu0 %v3180_v59  ;;  %v3192_v59 = vadd.f32 %v6459_v31, %v3191_v55  ;;  %v6495_v55 = vld [vmem:[%s4653_s15 + $0x4e0] sm:$0xff] }
 0x54b   : > { %3185 = vadd.xlane.f32.xlu0 %v3184_v26  ;;  %v6477_v26 = vld [vmem:[%s4653_s15 + $0x4c0] sm:$0xff] }
 0x54c   : > { %v3200_v37 = vadd.f32 %v6477_v26, %v3199_v15 }
 0x54f   : > { %3189 = vadd.xlane.f32.xlu0 %v3188_v12  ;;  %v3212_v12 = vadd.f32 %v6468_v3, %v3211_v47 }
 0x553   : > { %3197 = vadd.xlane.f32.xlu0 %v3196_v18  ;;  %v3219_v18 = vsel %vm205_vm0, %v6474_v22, 0.0 }
 0x554   : > { %v3220_v47 = vadd.f32 %v6486_v1, %v3219_v18  ;;  %v3216_v18 = vadd.f32 %v6510_v25, %v3215_v28 }
 0x555   : > { %3177 = vadd.xlane.f32.xlu1 %v3176_v35  ;;  %v6492_v35 = vld [vmem:[%s4653_s15 + $0x538] sm:$0xff] }
 0x557   : > { %3205 = vadd.xlane.f32.xlu0 %v3204_v21  ;;  %v3207_v21 = vsel %vm205_vm0, %v6483_v29, 0.0 }
 0x558   : > { %v3208_v15 = vadd.f32 %v6495_v55, %v3207_v21 }
 0x559   : > { %3193 = vadd.xlane.f32.xlu1 %v3192_v59  ;;  %v3227_v59 = vsel %vm205_vm0, %v6492_v35, 0.0 }
 0x55b   : > { %3213 = vadd.xlane.f32.xlu0 %v3212_v12  ;;  %v3228_v12 = vadd.f32 %v6504_v16, %v3227_v59 }
 0x55d   : > { %3201 = vadd.xlane.f32.xlu1 %v3200_v37  ;;  %v3223_v37 = vsel %vm205_vm0, %v6516_v61, 0.0 }
 0x55e   : > { %v3224_v21 = vadd.f32 %v6520_v11, %v3223_v37 }
 0x55f   : > { %3221 = vadd.xlane.f32.xlu0 %v3220_v47 }
 0x561   : > { %3209 = vadd.xlane.f32.xlu1 %v3208_v15 }
 0x563   : > { %3229 = vadd.xlane.f32.xlu0 %v3228_v12 }
 0x565   : > { %3217 = vadd.xlane.f32.xlu1 %v3216_v18 }
 0x569   : > { %3225 = vadd.xlane.f32.xlu1 %v3224_v21  ;;  %v8105_v21 = vld [vmem:[#allocation73_spill] sm:$0xff] }
 0x57a   : > { %549 = vperm.xlu1 %4193, %v5401_v51  }
 0x57c   : > { %v6540_v51 = vpop.permute.xlu0 %2862 }
 0x57e   : > { %554 = vperm.xlu1 %4193, %v5406_v54  }
 0x582   : > { %564 = vperm.xlu1 %4193, %v5424_v44  }
 0x586   : > { %574 = vperm.xlu1 %4193, %v5439_v33  }
 0x587   : > { %v6542_v54 = vpop.permute.xlu1 %2864 }
 0x589   : > { %v6545_v44 = vpop.permute.xlu0 %2870 }
 0x58a   : > { %584 = vperm.xlu1 %4193, %v5452_v34  }
 0x58b   : > { %v6547_v33 = vpop.permute.xlu1 %2866 }
 0x58d   : > { %v6550_v34 = vpop.permute.xlu0 %2874 }
 0x58e   : > { %594 = vperm.xlu1 %4193, %v5467_v10  }
 0x58f   : > { %v6553_v10 = vpop.permute.xlu1 %2868 }
 0x592   : > { %604 = vperm.xlu1 %4193, %v5480_v19   ;;  %v6556_v19 = vpop.permute.xlu0 %2878 }
 0x596   : > { %1143 = vperm.xlu1 %4193, %v5503_v9   ;;  %v6558_v9 = vpop.permute.xlu1 %2872 }
 0x59a   : > { %1148 = vperm.xlu1 %4193, %v5516_v0   ;;  %v6561_v0 = vpop.permute.xlu0 %2882 }
 0x59e   : > { %1158 = vperm.xlu1 %4193, %v5507_v40   ;;  %v8098_v40 = vld [vmem:[#allocation20_spill] sm:$0xff] }
 0x59f   : > { %8099 = vst [vmem:[#allocation20_spill] sm:$0xff] %v6561_v0  ;;  %v4404_v0 = vld [vmem:[%s4653_s15 + $0x28] sm:$0xff] }
 0x5a2   : > { %1168 = vperm.xlu1 %4193, %v5520_v39   ;;  %v8100_v39 = vld [vmem:[#allocation21_spill] sm:$0xff] }
 0x5a6   : > { %1178 = vperm.xlu1 %4193, %v5533_v4   ;;  %v6564_v4 = vpop.permute.xlu1 %2876 }
 0x5aa   : > { %1188 = vperm.xlu1 %4193, %v5545_v27   ;;  %v8101_v27 = vld [vmem:[#allocation68_spill] sm:$0xff] }
 0x5ae   : > { %1198 = vperm.xlu1 %4193, %v5557_v48   ;;  %v6567_v48 = vpop.permute.xlu0 %2886 }
 0x5af   : > { %8102 = vst [vmem:[#allocation21_spill] sm:$0xff] %v6567_v48 }
 0x5b2   : > { %1737 = vperm.xlu1 %4193, %v5587_v46   ;;  %v6569_v46 = vpop.permute.xlu1 %2880 }
 0x5b6   : > { %1742 = vperm.xlu1 %4193, %v5598_v52   ;;  %v8103_v52 = vld [vmem:[#allocation69_spill] sm:$0xff]  ;;  %v6579_v59 = vpop.permute.xlu1 %2884 }
 0x5ba   : > { %1752 = vperm.xlu1 %4193, %v5613_v24  }
 0x5be   : > { %1762 = vperm.xlu1 %4193, %v5625_v36  }
 0x5c2   : > { %1772 = vperm.xlu1 %4193, %v5637_v13   ;;  %v8104_v13 = vld [vmem:[#allocation71_spill] sm:$0xff] }
 0x5c6   : > { %1782 = vperm.xlu1 %4193, %v8098_v40  }
 0x5ca   : > { %1792 = vperm.xlu1 %4193, %v8100_v39  }
 0x5ce   : > { %2331 = vperm.xlu1 %4193, %v8101_v27  }
 0x5d2   : > { %2336 = vperm.xlu1 %4193, %v8103_v52  }
 0x5d4   : > { %v3182_v24 = vpop.xlane.xlu0 %3181 }
 0x5d5   : > { %v6572_v36 = vmul.f32 0.0051020407, %v3182_v24 }
 0x5d6   : > { %2346 = vperm.xlu1 %4193, %v8104_v13  }
 0x5d7   : > { %v3247_v28 = vsub.f32 %v6403_v63, %v6572_v36  ;;  %v3248_v47 = vsub.f32 %v6400_v57, %v6572_v36 }
 0x5d8   : > { %v3186_v15 = vpop.xlane.xlu0 %3185 }
 0x5d9   : > { %v3276_v12 = vmul.f32 %v3248_v47, %v3248_v47  ;;  %v6581_v18 = vmul.f32 0.0051020407, %v3186_v15  ;;  %v3275_v37 = vmul.f32 %v3247_v28, %v3247_v28  ;;  %v6591_v47 = vpop.permute.xlu1 %2888  ;;  %v8106_v28 = vld [vmem:[#allocation75_spill] sm:$0xff] }
 0x5da   : > { %2356 = vperm.xlu1 %4193, %v8105_v21  }
 0x5db   : > { %v3249_v40 = vsub.f32 %v6412_v32, %v6581_v18  ;;  %v3250_v39 = vsub.f32 %v6408_v50, %v6581_v18  ;;  %v3305_v63 = vsel %vm205_vm0, %v3276_v12, 0.0 }
 0x5dc   : > { %v3190_v27 = vpop.xlane.xlu0 %3189  ;;  %v3306_v52 = vadd.f32 %v3305_v63, %v3275_v37 }
 0x5dd   : > { %v3278_v57 = vmul.f32 %v3250_v39, %v3250_v39  ;;  %v6589_v24 = vmul.f32 0.0051020407, %v3190_v27  ;;  %v3277_v13 = vmul.f32 %v3249_v40, %v3249_v40  ;;  %v8107_v40 = vld [vmem:[#allocation77_spill] sm:$0xff] }
 0x5de   : > { %3307 = vadd.xlane.f32.xlu0 %v3306_v52  ;;  %2366 = vperm.xlu1 %4193, %v8106_v28  }
 0x5df   : > { %v3251_v15 = vsub.f32 %v6421_v14, %v6589_v24  ;;  %v3252_v32 = vsub.f32 %v6417_v30, %v6589_v24  ;;  %v3309_v50 = vsel %vm205_vm0, %v3278_v57, 0.0 }
 0x5e0   : > { %v3198_v12 = vpop.xlane.xlu0 %3197  ;;  %v3310_v21 = vadd.f32 %v3309_v50, %v3277_v13 }
 0x5e1   : > { %v3280_v37 = vmul.f32 %v3252_v32, %v3252_v32  ;;  %v6599_v39 = vmul.f32 0.0051020407, %v3198_v12  ;;  %v3279_v63 = vmul.f32 %v3251_v15, %v3251_v15  ;;  %v8108_v15 = vld [vmem:[#allocation79_spill] sm:$0xff] }
 0x5e2   : > { %3311 = vadd.xlane.f32.xlu0 %v3310_v21  ;;  %2376 = vperm.xlu1 %4193, %v8107_v40   ;;  %v6602_v27 = vpop.xlane.xlu1 %3177 }
 0x5e3   : > { %v3255_v52 = vsub.f32 %v6433_v23, %v6599_v39  ;;  %v3256_v14 = vsub.f32 %v6426_v41, %v6599_v39  ;;  %v3313_v30 = vsel %vm205_vm0, %v3280_v37, 0.0 }
 0x5e4   : > { %v3206_v57 = vpop.xlane.xlu0 %3205  ;;  %v3314_v28 = vadd.f32 %v3313_v30, %v3279_v63 }
 0x5e5   : > { %v3284_v13 = vmul.f32 %v3256_v14, %v3256_v14  ;;  %v6609_v32 = vmul.f32 0.0051020407, %v3206_v57  ;;  %v3283_v12 = vmul.f32 %v3255_v52, %v3255_v52 }
 0x5e6   : > { %3315 = vadd.xlane.f32.xlu0 %v3314_v28  ;;  %2386 = vperm.xlu1 %4193, %v8108_v15   ;;  %v6612_v50 = vpop.xlane.xlu1 %3193 }
 0x5e7   : > { %v3259_v21 = vsub.f32 %v6450_v2, %v6609_v32  ;;  %v3260_v23 = vsub.f32 %v6438_v38, %v6609_v32  ;;  %v3321_v37 = vsel %vm205_vm0, %v3284_v13, 0.0 }
 0x5e8   : > { %v3214_v41 = vpop.xlane.xlu0 %3213  ;;  %v3322_v14 = vadd.f32 %v3321_v37, %v3283_v12 }
 0x5e9   : > { %v3288_v40 = vmul.f32 %v3260_v23, %v3260_v23  ;;  %v6619_v63 = vmul.f32 0.0051020407, %v3214_v41  ;;  %v3287_v57 = vmul.f32 %v3259_v21, %v3259_v21 }
 0x5ea   : > { %2925 = vperm.xlu1 %4193, %v6324_v20   ;;  %v6622_v30 = vpop.xlane.xlu1 %3201  ;;  %3323 = vadd.xlane.f32.xlu0 %v3322_v14 }
 0x5eb   : > { %v3263_v52 = vsub.f32 %v6468_v3, %v6619_v63  ;;  %v3264_v2 = vsub.f32 %v6456_v62, %v6619_v63  ;;  %v3329_v28 = vsel %vm205_vm0, %v3288_v40, 0.0 }
 0x5ec   : > { %v3222_v38 = vpop.xlane.xlu0 %3221  ;;  %v3330_v23 = vadd.f32 %v3329_v28, %v3287_v57 }
 0x5ed   : > { %v3292_v13 = vmul.f32 %v3264_v2, %v3264_v2  ;;  %v6629_v15 = vmul.f32 0.0051020407, %v3222_v38  ;;  %v3291_v12 = vmul.f32 %v3263_v52, %v3263_v52 }
 0x5ee   : > { %2930 = vperm.xlu1 %4193, %v6330_v5   ;;  %v3210_v20 = vpop.xlane.xlu1 %3209  ;;  %3331 = vadd.xlane.f32.xlu0 %v3330_v23 }
 0x5ef   : > { %v3267_v21 = vsub.f32 %v6486_v1, %v6629_v15  ;;  %v3268_v3 = vsub.f32 %v6474_v22, %v6629_v15  ;;  %v3337_v41 = vsel %vm205_vm0, %v3292_v13, 0.0 }
 0x5f0   : > { %v3230_v62 = vpop.xlane.xlu0 %3229  ;;  %v3338_v14 = vadd.f32 %v3337_v41, %v3291_v12 }
 0x5f1   : > { %v3296_v37 = vmul.f32 %v3268_v3, %v3268_v3  ;;  %v6637_v40 = vmul.f32 0.0051020407, %v3230_v62  ;;  %v3295_v5 = vmul.f32 %v3267_v21, %v3267_v21  ;;  %v7879_v3 = vmov 1  }
 0x5f2   : > { %v3218_v2 = vpop.xlane.xlu1 %3217  ;;  %2940 = vperm.xlu1 %4193, %v6328_v49   ;;  %3339 = vadd.xlane.f32.xlu0 %v3338_v14  ;;  %v8118_v14 = vld [vmem:[#allocation10_spill] sm:$0xff] }
 0x5f3   : > { %v3271_v57 = vsub.f32 %v6504_v16, %v6637_v40  ;;  %v3272_v1 = vsub.f32 %v6492_v35, %v6637_v40  ;;  %v3345_v22 = vsel %vm205_vm0, %v3296_v37, 0.0 }
 0x5f4   : > { %v3346_v38 = vadd.f32 %v3345_v22, %v3295_v5 }
 0x5f5   : > { %v3300_v52 = vmul.f32 %v3272_v1, %v3272_v1  ;;  %v3299_v13 = vmul.f32 %v3271_v57, %v3271_v57  ;;  %v6679_v57 = vmul.f32 0.0051020407, %v6612_v50  ;;  %v8119_v1 = vld [vmem:[#allocation9_spill] sm:$0xff] }
 0x5f6   : > { %v3226_v28 = vpop.xlane.xlu1 %3225  ;;  %2950 = vperm.xlu1 %4193, %v6340_v42   ;;  %3347 = vadd.xlane.f32.xlu0 %v3346_v38 }
 0x5f7   : > { %v3353_v23 = vsel %vm205_vm0, %v3300_v52, 0.0  ;;  %v3253_v50 = vsub.f32 %v6459_v31, %v6679_v57 }
 0x5f8   : > { %v3354_v49 = vadd.f32 %v3353_v23, %v3299_v13  ;;  %v6689_v13 = vmul.f32 0.0051020407, %v6622_v30  ;;  %v8121_v23 = vld [vmem:[#allocation11_spill] sm:$0xff] }
 0x5fa   : > { %v6647_v12 = vpop.permute.xlu1 %549  ;;  %2960 = vperm.xlu1 %4193, %v6354_v7   ;;  %3355 = vadd.xlane.f32.xlu0 %v3354_v49  ;;  %v8114_v7 = vld [vmem:[#allocation38_spill] sm:$0xff] }
 0x5fb   : > { %8109 = vst [vmem:[#allocation68_spill] sm:$0xff] %v6647_v12 }
 0x5fe   : > { %v6650_v16 = vpop.permute.xlu1 %554  ;;  %2970 = vperm.xlu1 %4193, %v6366_v45   ;;  %v8116_v45 = vld [vmem:[#allocation39_spill] sm:$0xff] }
 0x602   : > { %v6653_v35 = vpop.permute.xlu1 %564  ;;  %2975 = vperm.xlu1 %4193, %v6386_v56   ;;  %v6671_v56 = vmul.f32 0.0051020407, %v6602_v27  ;;  %v3254_v27 = vsub.f32 %v6447_v58, %v6679_v57  ;;  %v8123_v58 = vld [vmem:[#allocation12_spill] sm:$0xff] }
 0x603   : > { %8110 = vst [vmem:[#allocation69_spill] sm:$0xff] %v6653_v35 }
 0x604   : > { %v3246_v5 = vsub.f32 %v6430_v6, %v6671_v56  ;;  %v3245_v52 = vsub.f32 %v6441_v8, %v6671_v56  ;;  %v6698_v8 = vmul.f32 0.0051020407, %v3210_v20  ;;  %v8125_v20 = vld [vmem:[#allocation5_spill] sm:$0xff] }
 0x606   : > { %v6656_v21 = vpop.permute.xlu1 %574  ;;  %2980 = vperm.xlu1 %4193, %v6378_v17   ;;  %v3274_v38 = vmul.f32 %v3246_v5, %v3246_v5  ;;  %v3273_v49 = vmul.f32 %v3245_v52, %v3245_v52  ;;  %v3257_v5 = vsub.f32 %v6477_v26, %v6689_v13  ;;  %v3262_v31 = vsub.f32 %v6483_v29, %v6698_v8 }
 0x607   : > { %8111 = vst [vmem:[#allocation71_spill] sm:$0xff] %v6656_v21  ;;  %v6708_v52 = vmul.f32 0.0051020407, %v3218_v2  ;;  %v8127_v2 = vld [vmem:[#allocation13_spill] sm:$0xff] }
 0x608   : > { %v3285_v26 = vmul.f32 %v3257_v5, %v3257_v5  ;;  %v8205_v21 = vld [vmem:[#allocation93_spill] sm:$0xff] }
 0x60a   : > { %v6659_v42 = vpop.permute.xlu1 %584  ;;  %4194 = vset.pattern.permute.xlu1 %v7879_v3 }
 0x60b   : > { %8112 = vst [vmem:[#allocation73_spill] sm:$0xff] %v6659_v42 }
 0x60e   : > { %v6662_v62 = vpop.permute.xlu1 %594 }
 0x60f   : > { %8113 = vst [vmem:[#allocation75_spill] sm:$0xff] %v6662_v62 }
 0x610   : > { %544 = vperm.xlu0 %4195, %v8114_v7   ;;  %v3282_v7 = vmul.f32 %v3254_v27, %v3254_v27  ;;  %v3261_v27 = vsub.f32 %v6495_v55, %v6698_v8 }
 0x612   : > { %v6665_v41 = vpop.permute.xlu1 %604  ;;  %v3289_v55 = vmul.f32 %v3261_v27, %v3261_v27  ;;  %v8131_v27 = vld [vmem:[#allocation14_spill] sm:$0xff] }
 0x613   : > { %8115 = vst [vmem:[#allocation77_spill] sm:$0xff] %v6665_v41 }
 0x614   : > { %559 = vperm.xlu0 %4195, %v8116_v45   ;;  %v3258_v45 = vsub.f32 %v6465_v43, %v6689_v13  ;;  %v3317_v43 = vsel %vm205_vm0, %v3282_v7, 0.0 }
 0x616   : > { %v6668_v37 = vpop.permute.xlu1 %1143  ;;  %v3286_v3 = vmul.f32 %v3258_v45, %v3258_v45  ;;  %v6718_v45 = vmul.f32 0.0051020407, %v3226_v28  ;;  %v8129_v28 = vld [vmem:[#allocation7_spill] sm:$0xff] }
 0x617   : > { %8117 = vst [vmem:[#allocation79_spill] sm:$0xff] %v6668_v37 }
 0x618   : > { %569 = vperm.xlu0 %4195, %v8118_v14   ;;  %v3301_v14 = vsel %vm205_vm0, %v3274_v38, 0.0  ;;  %v3325_v29 = vsel %vm205_vm0, %v3286_v3, 0.0  ;;  %v3270_v5 = vsub.f32 %v6516_v61, %v6718_v45  ;;  %v3269_v3 = vsub.f32 %v6520_v11, %v6718_v45 }
 0x61a   : > { %v6674_v17 = vpop.permute.xlu1 %1148 }
 0x61c   : > { %579 = vperm.xlu0 %4195, %v8119_v1   ;;  %v3302_v1 = vadd.f32 %v3301_v14, %v3273_v49  ;;  %v3290_v49 = vmul.f32 %v3262_v31, %v3262_v31  ;;  %v3265_v14 = vsub.f32 %v6510_v25, %v6708_v52 }
 0x61e   : > { %v6682_v22 = vpop.permute.xlu1 %1158 }
 0x61f   : > { %8120 = vst [vmem:[#allocation38_spill] sm:$0xff] %v6682_v22 }
 0x620   : > { %589 = vperm.xlu0 %4195, %v8121_v23   ;;  %v3281_v23 = vmul.f32 %v3253_v50, %v3253_v50  ;;  %v3266_v50 = vsub.f32 %v6501_v53, %v6708_v52  ;;  %v3333_v53 = vsel %vm205_vm0, %v3290_v49, 0.0 }
 0x621   : > { %v3334_v31 = vadd.f32 %v3333_v53, %v3289_v55  ;;  %v8136_v55 = vld [vmem:[#allocation16_spill] sm:$0xff]  ;;  %v4367_v53 = vld [vmem:[%s5396_s19] sm:$0xff] }
 0x622   : > { %v6692_v6 = vpop.permute.xlu1 %1168 }
 0x623   : > { %8122 = vst [vmem:[#allocation39_spill] sm:$0xff] %v6692_v6 }
 0x624   : > { %599 = vperm.xlu0 %4195, %v8123_v58   ;;  %v3318_v58 = vadd.f32 %v3317_v43, %v3281_v23  ;;  %v3294_v23 = vmul.f32 %v3266_v50, %v3266_v50  ;;  %v3293_v43 = vmul.f32 %v3265_v14, %v3265_v14  ;;  %v8132_v50 = vld [vmem:[#allocation6_spill] sm:$0xff] }
 0x626   : > { %v6702_v30 = vpop.permute.xlu1 %1178  ;;  %v3341_v25 = vsel %vm205_vm0, %v3294_v23, 0.0 }
 0x627   : > { %8124 = vst [vmem:[#allocation10_spill] sm:$0xff] %v6702_v30  ;;  %v3342_v61 = vadd.f32 %v3341_v25, %v3293_v43  ;;  %v8141_v43 = vld [vmem:[#allocation17_spill] sm:$0xff]  ;;  %v8142_v25 = vld [vmem:[#allocation34_spill] sm:$0xff] }
 0x628   : > { %609 = vperm.xlu0 %4195, %v8125_v20   ;;  %v3298_v20 = vmul.f32 %v3270_v5, %v3270_v5  ;;  %v8138_v5 = vld [vmem:[#allocation4_spill] sm:$0xff] }
 0x62a   : > { %v6712_v38 = vpop.permute.xlu1 %1188  ;;  %3303 = vadd.xlane.f32.xlu1 %v3302_v1  ;;  %v3326_v1 = vadd.f32 %v3325_v29, %v3285_v26  ;;  %v3297_v26 = vmul.f32 %v3269_v3, %v3269_v3  ;;  %v3349_v49 = vsel %vm205_vm0, %v3298_v20, 0.0  ;;  %v4368_v20 = vld [vmem:[%s5396_s19 + $0x10] sm:$0xff] }
 0x62b   : > { %8126 = vst [vmem:[#allocation9_spill] sm:$0xff] %v6712_v38  ;;  %v8187_v38 = vld [vmem:[#allocation99_spill] sm:$0xff] }
 0x62c   : > { %1138 = vperm.xlu0 %4195, %v8127_v2   ;;  %v3350_v29 = vadd.f32 %v3349_v49, %v3297_v26  ;;  %v8133_v2 = vld [vmem:[#allocation33_spill] sm:$0xff] }
 0x62d   : > { %v4369_v49 = vld [vmem:[%s5396_s19 + $0x18] sm:$0xff] }
 0x62e   : > { %3319 = vadd.xlane.f32.xlu1 %v3318_v58  ;;  %v6722_v7 = vpop.permute.xlu1 %1198 }
 0x62f   : > { %8128 = vst [vmem:[#allocation11_spill] sm:$0xff] %v6722_v7 }
 0x630   : > { %1153 = vperm.xlu0 %4195, %v8129_v28   ;;  %v8139_v28 = vld [vmem:[#allocation23_spill] sm:$0xff] }
 0x631   : > { %v528_v3 = vsub.f32 %v4367_v53, %v8139_v28  ;;  %v8149_v28 = vld [vmem:[#allocation8_spill] sm:$0xff] }
 0x632   : > { %3327 = vadd.xlane.f32.xlu1 %v3326_v1  ;;  %v6732_v58 = vpop.permute.xlu1 %1737  ;;  %v8135_v1 = vld [vmem:[#allocation15_spill] sm:$0xff] }
 0x633   : > { %8130 = vst [vmem:[#allocation12_spill] sm:$0xff] %v6732_v58  ;;  %v8176_v58 = vld [vmem:[#allocation95_spill] sm:$0xff] }
 0x634   : > { %1163 = vperm.xlu0 %4195, %v8131_v27   ;;  %v530_v27 = vsub.f32 %v4368_v20, %v8142_v25  ;;  %v8151_v25 = vld [vmem:[#allocation19_spill] sm:$0xff] }
 0x636   : > { %3335 = vadd.xlane.f32.xlu1 %v3334_v31  ;;  %v6738_v11 = vpop.permute.xlu1 %1742 }
 0x638   : > { %1173 = vperm.xlu0 %4195, %v8132_v50   ;;  %v8145_v50 = vld [vmem:[#allocation22_spill] sm:$0xff] }
 0x63a   : > { %3343 = vadd.xlane.f32.xlu1 %v3342_v61  ;;  %v6741_v14 = vpop.permute.xlu1 %1752  ;;  %v8143_v61 = vld [vmem:[#allocation35_spill] sm:$0xff] }
 0x63b   : > { %8134 = vst [vmem:[#allocation5_spill] sm:$0xff] %v6741_v14 }
 0x63c   : > { %1183 = vperm.xlu0 %4195, %v8133_v2   ;;  %v8146_v2 = vld [vmem:[#allocation18_spill] sm:$0xff] }
 0x63e   : > { %3351 = vadd.xlane.f32.xlu1 %v3350_v29  ;;  %v6745_v23 = vpop.permute.xlu1 %1762  ;;  %v531_v29 = vsub.f32 %v4369_v49, %v8145_v50  ;;  %v8153_v49 = vld [vmem:[#allocation30_spill] sm:$0xff] }
 0x63f   : > { %8137 = vst [vmem:[#allocation13_spill] sm:$0xff] %v6745_v23 }
 0x640   : > { %1193 = vperm.xlu0 %4195, %v8135_v1   ;;  %v4370_v1 = vld [vmem:[%s5396_s19 + $0x28] sm:$0xff] }
 0x642   : > { %v6750_v31 = vpop.permute.xlu1 %1772 }
 0x643   : > { %8140 = vst [vmem:[#allocation7_spill] sm:$0xff] %v6750_v31  ;;  %v8166_v31 = vld [vmem:[#allocation76_spill] sm:$0xff] }
 0x644   : > { %1203 = vperm.xlu0 %4195, %v8136_v55   ;;  %v8147_v55 = vld [vmem:[#allocation28_spill] sm:$0xff] }
 0x646   : > { %v6756_v26 = vpop.permute.xlu1 %1782 }
 0x647   : > { %8144 = vst [vmem:[#allocation14_spill] sm:$0xff] %v6756_v26 }
 0x648   : > { %1732 = vperm.xlu0 %4195, %v8138_v5   ;;  %v533_v5 = vsub.f32 %v4370_v1, %v8147_v55  ;;  %v8155_v1 = vld [vmem:[#allocation2_spill] sm:$0xff] }
 0x64a   : > { %v6763_v53 = vpop.permute.xlu1 %1792 }
 0x64b   : > { %8148 = vst [vmem:[#allocation6_spill] sm:$0xff] %v6763_v53  ;;  %v8165_v53 = vld [vmem:[#allocation40_spill] sm:$0xff] }
 0x64c   : > { %1747 = vperm.xlu0 %4195, %v8141_v43   ;;  %v8150_v43 = vld [vmem:[#allocation24_spill] sm:$0xff] }
 0x64f   : > { %642 = vperm.xlu1 %4194, %v528_v3   ;;  %v4371_v3 = vld [vmem:[%s5396_s19 + $0x38] sm:$0xff] }
 0x650   : > { %1757 = vperm.xlu0 %4195, %v8143_v61   ;;  %v535_v20 = vsub.f32 %v4371_v3, %v8150_v43  ;;  %v4372_v61 = vld [vmem:[%s5396_s19 + $0x48] sm:$0xff] }
 0x651   : > { %v537_v50 = vsub.f32 %v4372_v61, %v8153_v49  ;;  %v4374_v3 = vld [vmem:[%s5396_s19 + $0x68] sm:$0xff]  ;;  %v4375_v49 = vld [vmem:[%s5396_s19 + $0x70] sm:$0xff] }
 0x652   : > { %v8157_v43 = vld [vmem:[#allocation3_spill] sm:$0xff] }
 0x653   : > { %652 = vperm.xlu1 %4194, %v530_v27   ;;  %v6769_v27 = vpop.permute.xlu1 %2331 }
 0x654   : > { %1767 = vperm.xlu0 %4195, %v8146_v2   ;;  %8152 = vst [vmem:[#allocation33_spill] sm:$0xff] %v6769_v27  ;;  %v4373_v2 = vld [vmem:[%s5396_s19 + $0x58] sm:$0xff] }
 0x655   : > { %v539_v55 = vsub.f32 %v4373_v2, %v8155_v1  ;;  %v8161_v2 = vld [vmem:[#allocation72_spill] sm:$0xff] }
 0x657   : > { %657 = vperm.xlu1 %4194, %v531_v29   ;;  %v8154_v29 = vld [vmem:[#allocation32_spill] sm:$0xff] }
 0x658   : > { %1777 = vperm.xlu0 %4195, %v8149_v28   ;;  %v8156_v28 = vld [vmem:[#allocation67_spill] sm:$0xff] }
 0x65b   : > { %667 = vperm.xlu1 %4194, %v533_v5   ;;  %v6776_v5 = vpop.permute.xlu1 %2336 }
 0x65c   : > { %1787 = vperm.xlu0 %4195, %v8151_v25   ;;  %v541_v25 = vsub.f32 %v4374_v3, %v8157_v43 }
 0x65f   : > { %677 = vperm.xlu1 %4194, %v535_v20   ;;  %v8158_v20 = vld [vmem:[#allocation70_spill] sm:$0xff]  ;;  %v6782_v27 = vpop.permute.xlu1 %2346 }
 0x660   : > { %1797 = vperm.xlu0 %4195, %v8154_v29   ;;  %8159 = vst [vmem:[#allocation15_spill] sm:$0xff] %v6782_v27 }
 0x663   : > { %687 = vperm.xlu1 %4194, %v537_v50   ;;  %v8160_v50 = vld [vmem:[#allocation43_spill] sm:$0xff]  ;;  %v6793_v43 = vpop.permute.xlu1 %2356 }
 0x664   : > { %2326 = vperm.xlu0 %4195, %v8156_v28   ;;  %v1122_v29 = vsub.f32 %v4375_v49, %v8160_v50  ;;  %v8162_v28 = vld [vmem:[#allocation36_spill] sm:$0xff]  ;;  %8163 = vst [vmem:[#allocation16_spill] sm:$0xff] %v6793_v43  ;;  %v4378_v50 = vld [vmem:[%s5396_s19 + $0x98] sm:$0xff] }
 0x667   : > { %697 = vperm.xlu1 %4194, %v539_v55   ;;  %v4376_v55 = vld [vmem:[%s5396_s19 + $0x80] sm:$0xff]  ;;  %v6799_v49 = vpop.permute.xlu1 %2366 }
 0x668   : > { %2341 = vperm.xlu0 %4195, %v8158_v20   ;;  %v1124_v3 = vsub.f32 %v4376_v55, %v8162_v28  ;;  %v8164_v20 = vld [vmem:[#allocation74_spill] sm:$0xff]  ;;  %8167 = vst [vmem:[#allocation4_spill] sm:$0xff] %v6799_v49  ;;  %v4379_v28 = vld [vmem:[%s5396_s19 + $0xa8] sm:$0xff]  ;;  %v4380_v49 = vld [vmem:[%s5396_s19 + $0xb8] sm:$0xff] }
 0x669   : > { %v8169_v55 = vld [vmem:[#allocation78_spill] sm:$0xff] }
 0x66b   : > { %v6784_v61 = vpop.xlane.xlu0 %3307  ;;  %707 = vperm.xlu1 %4194, %v541_v25   ;;  %v4377_v25 = vld [vmem:[%s5396_s19 + $0x88] sm:$0xff]  ;;  %v6806_v43 = vpop.permute.xlu1 %2376 }
 0x66c   : > { %2351 = vperm.xlu0 %4195, %v8161_v2   ;;  %v1125_v26 = vsub.f32 %v4377_v25, %v8165_v53  ;;  %8171 = vst [vmem:[#allocation23_spill] sm:$0xff] %v6806_v43  ;;  %v8172_v25 = vld [vmem:[#allocation80_spill] sm:$0xff] }
 0x66f   : > { %v6789_v1 = vpop.xlane.xlu0 %3311  ;;  %1236 = vperm.xlu1 %4194, %v1122_v29   ;;  %v8168_v29 = vld [vmem:[#allocation42_spill] sm:$0xff] }
 0x670   : > { %2361 = vperm.xlu0 %4195, %v8164_v20   ;;  %v1127_v2 = vsub.f32 %v4378_v50, %v8168_v29  ;;  %v8170_v20 = vld [vmem:[#allocation44_spill] sm:$0xff]  ;;  %v6812_v29 = vpop.permute.xlu1 %2386 }
 0x671   : > { %8174 = vst [vmem:[#allocation17_spill] sm:$0xff] %v6812_v29  ;;  %v8179_v29 = vld [vmem:[#allocation96_spill] sm:$0xff] }
 0x673   : > { %v3316_v27 = vpop.xlane.xlu0 %3315  ;;  %1246 = vperm.xlu1 %4194, %v1124_v3   ;;  %v1129_v3 = vsub.f32 %v4379_v28, %v8170_v20  ;;  %v4381_v28 = vld [vmem:[%s5396_s19 + $0xc8] sm:$0xff]  ;;  %v8175_v20 = vld [vmem:[#allocation48_spill] sm:$0xff] }
 0x674   : > { %2371 = vperm.xlu0 %4195, %v8166_v31   ;;  %v3360_v31 = vmul.f32 0.0051020407, %v3316_v27  ;;  %v1133_v43 = vsub.f32 %v4381_v28, %v8175_v20 }
 0x677   : > { %1251 = vperm.xlu1 %4194, %v1125_v26   ;;  %v3324_v23 = vpop.xlane.xlu0 %3323  ;;  %v8173_v26 = vld [vmem:[#allocation46_spill] sm:$0xff] }
 0x678   : > { %2381 = vperm.xlu0 %4195, %v8169_v55   ;;  %v1131_v14 = vsub.f32 %v4380_v49, %v8173_v26  ;;  %v3362_v55 = vmul.f32 0.0051020407, %v3324_v23  ;;  %v4382_v49 = vld [vmem:[%s5396_s19 + $0xd8] sm:$0xff]  ;;  %v8177_v26 = vld [vmem:[#allocation50_spill] sm:$0xff] }
 0x679   : > { %v1135_v7 = vsub.f32 %v4382_v49, %v8177_v26  ;;  %v8184_v26 = vld [vmem:[#allocation98_spill] sm:$0xff] }
 0x67a   : > { %v3376_v27 = vadd.f32 0.001, %v3362_v55 }
 0x67b   : > { %1261 = vperm.xlu1 %4194, %v1127_v2   ;;  %v3332_v53 = vpop.xlane.xlu0 %3331  ;;  %v3374_v2 = vadd.f32 0.001, %v3360_v31  ;;  %v4383_v31 = vld [vmem:[%s5396_s19 + $0xe0] sm:$0xff] }
 0x67c   : > { %2391 = vperm.xlu0 %4195, %v8172_v25  }
 0x67d   : > { %4339 = vrsqrt.f32 %v3374_v2 }
 0x67e   : > { %4341 = vrsqrt.f32 %v3376_v27  ;;  %v8183_v27 = vld [vmem:[#allocation54_spill] sm:$0xff] }
 0x67f   : > { %1271 = vperm.xlu1 %4194, %v1129_v3   ;;  %v3340_v50 = vpop.xlane.xlu0 %3339  ;;  %v3364_v3 = vmul.f32 0.0051020407, %v3332_v53  ;;  %v8181_v53 = vld [vmem:[#allocation97_spill] sm:$0xff] }
 0x680   : > { %2920 = vperm.xlu0 %4195, %v6316_v60   ;;  %v6819_v60 = vpop.permute.xlu1 %2925  ;;  %v3366_v23 = vmul.f32 0.0051020407, %v3340_v50 }
 0x681   : > { %8178 = vst [vmem:[#allocation34_spill] sm:$0xff] %v6819_v60 }
 0x682   : > { %v3380_v28 = vadd.f32 0.001, %v3366_v23 }
 0x683   : > { %1281 = vperm.xlu1 %4194, %v1131_v14   ;;  %v3348_v25 = vpop.xlane.xlu0 %3347  ;;  %v3378_v14 = vadd.f32 0.001, %v3364_v3 }
 0x684   : > { %2935 = vperm.xlu0 %4195, %v8176_v58   ;;  %v8180_v58 = vld [vmem:[#allocation55_spill] sm:$0xff]  ;;  %v3368_v20 = vmul.f32 0.0051020407, %v3348_v25  ;;  %v4385_v25 = vld [vmem:[%s5396_s19 + $0xf8] sm:$0xff] }
 0x685   : > { %v1716_v2 = vsub.f32 %v4383_v31, %v8180_v58  ;;  %4343 = vrsqrt.f32 %v3378_v14 }
 0x686   : > { %4345 = vrsqrt.f32 %v3380_v28  ;;  %v3382_v31 = vadd.f32 0.001, %v3368_v20 }
 0x687   : > { %1291 = vperm.xlu1 %4194, %v1133_v43   ;;  %v3356_v55 = vpop.xlane.xlu0 %3355  ;;  %v6825_v43 = vpop.permute.xlu1 %2930 }
 0x688   : > { %2945 = vperm.xlu0 %4195, %v8179_v29   ;;  %8182 = vst [vmem:[#allocation35_spill] sm:$0xff] %v6825_v43  ;;  %v4340_v49 = vpop.eup %4339  ;;  %v4384_v29 = vld [vmem:[%s5396_s19 + $0xf0] sm:$0xff]  ;;  %v3370_v58 = vmul.f32 0.0051020407, %v3356_v55  ;;  %4347 = vrsqrt.f32 %v3382_v31 }
 0x689   : > { %v1718_v3 = vsub.f32 %v4384_v29, %v8183_v27  ;;  %v4342_v23 = vpop.eup %4341  ;;  %v4141_v27 = vld [vmem:[%s5396_s19 + $0x258] sm:$0xff]  ;;  %v4402_v43 = vld [vmem:[%s5396_s19 + $0x1d0] sm:$0xff] }
 0x68a   : > { %v3384_v28 = vadd.f32 0.001, %v3370_v58  ;;  %v6845_v20 = vmul.f32 %v4342_v23, %v4141_v27  ;;  %v4387_v23 = vld [vmem:[%s5396_s19 + $0x118] sm:$0xff] }
 0x68b   : > { %1301 = vperm.xlu1 %4194, %v1135_v7   ;;  %v4139_v7 = vld [vmem:[%s5396_s19 + $0x248] sm:$0xff]  ;;  %v6837_v60 = vpop.permute.xlu1 %2940 }
 0x68c   : > { %2955 = vperm.xlu0 %4195, %v8181_v53   ;;  %v6833_v14 = vmul.f32 %v4340_v49, %v4139_v7  ;;  %8186 = vst [vmem:[#allocation22_spill] sm:$0xff] %v6837_v60  ;;  %v8188_v7 = vld [vmem:[#allocation58_spill] sm:$0xff]  ;;  %4349 = vrsqrt.f32 %v3384_v28 }
 0x68e   : > { %v3431_v55 = vmul.f32 %v6833_v14, %v6589_v24  ;;  %v3433_v24 = vmul.f32 %v6845_v20, %v6599_v39 }
 0x68f   : > { %1830 = vperm.xlu1 %4194, %v1716_v2   ;;  %v6829_v50 = vpop.permute.xlu0 %544  ;;  %v8185_v2 = vld [vmem:[#allocation56_spill] sm:$0xff]  ;;  %v4344_v49 = vpop.eup %4343 }
 0x690   : > { %2965 = vperm.xlu0 %4195, %v8184_v26   ;;  %v1719_v53 = vsub.f32 %v4385_v25, %v8185_v2  ;;  %v4143_v2 = vld [vmem:[%s5396_s19 + $0x268] sm:$0xff]  ;;  %v4346_v58 = vpop.eup %4345 }
 0x691   : > { %v6857_v31 = vmul.f32 %v4344_v49, %v4143_v2  ;;  %v4388_v49 = vld [vmem:[%s5396_s19 + $0x128] sm:$0xff] }
 0x692   : > { %v4348_v39 = vpop.eup %4347 }
 0x693   : > { %1840 = vperm.xlu1 %4194, %v1718_v3   ;;  %v6839_v29 = vpop.permute.xlu0 %559  ;;  %v4386_v3 = vld [vmem:[%s5396_s19 + $0x108] sm:$0xff]  ;;  %v3435_v28 = vmul.f32 %v6857_v31, %v6609_v32 }
 0x694   : > { %2985 = vperm.xlu0 %4195, %v8187_v38   ;;  %v1721_v26 = vsub.f32 %v4386_v3, %v8188_v7  ;;  %v6853_v38 = vpop.permute.xlu1 %2950  ;;  %v4145_v7 = vld [vmem:[%s5396_s19 + $0x278] sm:$0xff] }
 0x695   : > { %8189 = vst [vmem:[#allocation18_spill] sm:$0xff] %v6853_v38 }
 0x697   : > { %1845 = vperm.xlu1 %4194, %v1719_v53   ;;  %v6849_v25 = vpop.permute.xlu0 %569  ;;  %v8190_v53 = vld [vmem:[#allocation60_spill] sm:$0xff] }
 0x698   : > { %3462 = vrot.lane.b32.xlu0 %v3431_v55, %s4619_s20  ;;  %v1723_v27 = vsub.f32 %v4387_v23, %v8190_v53  ;;  %v6867_v55 = vmul.f32 %v4346_v58, %v4145_v7  ;;  %v6871_v30 = vpop.permute.xlu1 %2960  ;;  %v4147_v53 = vld [vmem:[%s5396_s19 + $0x288] sm:$0xff]  ;;  %v4350_v58 = vpop.eup %4349  ;;  %v8193_v7 = vld [vmem:[#allocation64_spill] sm:$0xff] }
 0x699   : > { %8192 = vst [vmem:[#allocation28_spill] sm:$0xff] %v6871_v30  ;;  %v6879_v32 = vmul.f32 %v4348_v39, %v4147_v53  ;;  %v4390_v39 = vld [vmem:[%s5396_s19 + $0x148] sm:$0xff] }
 0x69b   : > { %1855 = vperm.xlu1 %4194, %v1721_v26   ;;  %v6861_v3 = vpop.permute.xlu0 %579  ;;  %v8191_v26 = vld [vmem:[#allocation62_spill] sm:$0xff] }
 0x69c   : > { %3466 = vrot.lane.b32.xlu0 %v3433_v24, %s4619_s20  ;;  %v1725_v2 = vsub.f32 %v4388_v49, %v8191_v26  ;;  %v3437_v24 = vmul.f32 %v6867_v55, %v6619_v63  ;;  %v4149_v26 = vld [vmem:[%s5396_s19 + $0x298] sm:$0xff]  ;;  %v6887_v30 = vpop.permute.xlu1 %2970 }
 0x69d   : > { %8194 = vst [vmem:[#allocation8_spill] sm:$0xff] %v6887_v30  ;;  %v6891_v63 = vmul.f32 %v4350_v58, %v4149_v26  ;;  %v4392_v58 = vld [vmem:[%s5396_s19 + $0x160] sm:$0xff]  ;;  %v8198_v26 = vld [vmem:[#allocation83_spill] sm:$0xff] }
 0x69f   : > { %1865 = vperm.xlu1 %4194, %v1723_v27   ;;  %v6873_v23 = vpop.permute.xlu0 %589  ;;  %v4389_v27 = vld [vmem:[%s5396_s19 + $0x138] sm:$0xff] }
 0x6a0   : > { %3470 = vrot.lane.b32.xlu0 %v3435_v28, %s4619_s20  ;;  %v1727_v6 = vsub.f32 %v4389_v27, %v8193_v7  ;;  %v3439_v28 = vmul.f32 %v6879_v32, %v6629_v15  ;;  %v4391_v27 = vld [vmem:[%s5396_s19 + $0x150] sm:$0xff]  ;;  %v8196_v7 = vld [vmem:[#allocation82_spill] sm:$0xff]  ;;  %v6902_v30 = vpop.permute.xlu1 %2975 }
 0x6a1   : > { %8197 = vst [vmem:[#allocation24_spill] sm:$0xff] %v6902_v30 }
 0x6a3   : > { %1875 = vperm.xlu1 %4194, %v1725_v2   ;;  %v6883_v49 = vpop.permute.xlu0 %599  ;;  %v8195_v2 = vld [vmem:[#allocation66_spill] sm:$0xff] }
 0x6a4   : > { %3474 = vrot.lane.b32.xlu0 %v3437_v24, %s4619_s20  ;;  %v1729_v53 = vsub.f32 %v4390_v39, %v8195_v2  ;;  %v3441_v24 = vmul.f32 %v6891_v63, %v6637_v40  ;;  %v2312_v39 = vsub.f32 %v4392_v58, %v8198_v26  ;;  %v4393_v40 = vld [vmem:[%s5396_s19 + $0x168] sm:$0xff] }
 0x6a7   : > { %1885 = vperm.xlu1 %4194, %v1727_v6   ;;  %v6895_v22 = vpop.permute.xlu0 %609  ;;  %v2310_v6 = vsub.f32 %v4391_v27, %v8196_v7 }
 0x6a8   : > { %3478 = vrot.lane.b32.xlu0 %v3439_v28, %s4619_s20  ;;  %v6911_v28 = vpop.permute.xlu1 %2980 }
 0x6a9   : > { %8199 = vst [vmem:[#allocation19_spill] sm:$0xff] %v6911_v28 }
 0x6ab   : > { %1895 = vperm.xlu1 %4194, %v1729_v53   ;;  %v6904_v15 = vpop.permute.xlu0 %1138  ;;  %v8200_v53 = vld [vmem:[#allocation85_spill] sm:$0xff] }
 0x6ac   : > { %3482 = vrot.lane.b32.xlu0 %v3441_v24, %s4619_s20  ;;  %v2313_v27 = vsub.f32 %v4393_v40, %v8200_v53  ;;  %v4394_v24 = vld [vmem:[%s5396_s19 + $0x178] sm:$0xff] }
 0x6ad   : > { %v8202_v40 = vld [vmem:[#allocation89_spill] sm:$0xff] }
 0x6af   : > { %2424 = vperm.xlu1 %4194, %v2310_v6   ;;  %v6909_v2 = vpop.permute.xlu0 %1153  ;;  %v8201_v6 = vld [vmem:[#allocation87_spill] sm:$0xff] }
 0x6b0   : > { %v2315_v41 = vsub.f32 %v4394_v24, %v8201_v6  ;;  %v8203_v24 = vld [vmem:[#allocation91_spill] sm:$0xff] }
 0x6b3   : > { %2434 = vperm.xlu1 %4194, %v2312_v39   ;;  %v6915_v7 = vpop.permute.xlu0 %1163  ;;  %v4395_v39 = vld [vmem:[%s5396_s19 + $0x188] sm:$0xff] }
 0x6b4   : > { %v2317_v53 = vsub.f32 %v4395_v39, %v8202_v40 }
 0x6b7   : > { %2439 = vperm.xlu1 %4194, %v2313_v27   ;;  %v3304_v30 = vpop.xlane.xlu1 %3303  ;;  %v6919_v58 = vpop.permute.xlu0 %1173  ;;  %v4396_v27 = vld [vmem:[%s5396_s19 + $0x198] sm:$0xff] }
 0x6b8   : > { %v3357_v37 = vmul.f32 0.0051020407, %v3304_v30  ;;  %v2319_v6 = vsub.f32 %v4396_v27, %v8203_v24  ;;  %v4398_v24 = vld [vmem:[%s5396_s19 + $0x1b8] sm:$0xff] }
 0x6ba   : > { %v3371_v26 = vadd.f32 0.001, %v3357_v37  ;;  %v6936_v37 = vld [vmem:[%s5396_s19 + $0x230] sm:$0xff] }
 0x6bb   : > { %2449 = vperm.xlu1 %4194, %v2315_v41   ;;  %v6921_v28 = vpop.xlane.xlu1 %3319  ;;  %v6925_v62 = vpop.permute.xlu0 %1183  ;;  %8204 = vst [vmem:[#allocation30_spill] sm:$0xff] %v6936_v37 }
 0x6bc   : > { %4351 = vrsqrt.f32 %v3371_v26  ;;  %v4397_v26 = vld [vmem:[%s5396_s19 + $0x1a8] sm:$0xff] }
 0x6bd   : > { %v2321_v39 = vsub.f32 %v4397_v26, %v8205_v21  ;;  %v4399_v26 = vld [vmem:[%s5396_s19 + $0x1c0] sm:$0xff] }
 0x6bf   : > { %2459 = vperm.xlu1 %4194, %v2317_v53   ;;  %v6927_v30 = vpop.xlane.xlu1 %3327  ;;  %v6931_v42 = vpop.permute.xlu0 %1193 }
 0x6c3   : > { %2469 = vperm.xlu1 %4194, %v2319_v6   ;;  %v6933_v41 = vpop.xlane.xlu1 %3335  ;;  %v6940_v40 = vpop.permute.xlu0 %1203  ;;  %v8206_v6 = vld [vmem:[#allocation94_spill] sm:$0xff] }
 0x6c4   : > { %v2323_v12 = vsub.f32 %v4398_v24, %v8206_v6  ;;  %v4401_v6 = vld [vmem:[%s4653_s15 + $0x8] sm:$0xff] }
 0x6c6   : > { %v4352_v53 = vpop.eup %4351 }
 0x6c7   : > { %2479 = vperm.xlu1 %4194, %v2321_v39   ;;  %v6942_v35 = vpop.xlane.xlu1 %3343  ;;  %v6945_v27 = vmul.f32 %v4352_v53, %v6936_v37  ;;  %v6949_v38 = vpop.permute.xlu0 %1732  ;;  %v2904_v39 = vsub.f32 %v4399_v26, %v6540_v51  ;;  %v4400_v53 = vld [vmem:[%s4653_s15] sm:$0xff]  ;;  %v613_v37 = vmul.f32 %v4401_v6, %v6829_v50 }
 0x6c8   : > { %v612_v24 = vmul.f32 %v4400_v53, %v6829_v50  ;;  %v2906_v53 = vsub.f32 %v4402_v43, %v6547_v33  ;;  %v4403_v50 = vld [vmem:[%s4653_s15 + $0x20] sm:$0xff] }
 0x6c9   : > { %3514 = vperm.xlu0 %4195, %v6945_v27   ;;  %v616_v6 = vmul.f32 %v4403_v50, %v6650_v16 }
 0x6cb   : > { %2489 = vperm.xlu1 %4194, %v2323_v12   ;;  %v6952_v21 = vpop.xlane.xlu1 %3351  ;;  %v6956_v60 = vpop.permute.xlu0 %1747  ;;  %v3358_v12 = vmul.f32 0.0051020407, %v6784_v61  ;;  %v3359_v61 = vmul.f32 0.0051020407, %v6789_v1 }
 0x6cd   : > { %3529 = vperm.xlu0 %4195, %v6833_v14   ;;  %v3372_v43 = vadd.f32 0.001, %v3358_v12  ;;  %v3373_v12 = vadd.f32 0.001, %v3359_v61  ;;  %v4410_v61 = vld [vmem:[%s4653_s15 + $0x58] sm:$0xff] }
 0x6cf   : > { %v643_v51 = vpop.permute.xlu1 %642  ;;  %3018 = vperm.xlu1 %4194, %v2904_v39   ;;  %v6973_v48 = vpop.permute.xlu0 %1757  ;;  %v617_v39 = vmul.f32 %v4404_v0, %v6650_v16  ;;  %v4406_v0 = vld [vmem:[%s4653_s15 + $0x30] sm:$0xff]  ;;  %4353 = vrsqrt.f32 %v3372_v43  ;;  %v3363_v43 = vmul.f32 0.0051020407, %v6927_v30  ;;  %v3365_v30 = vmul.f32 0.0051020407, %v6933_v41 }
 0x6d0   : > { %v710_v14 = vadd.f32 %v643_v51, %v612_v24  ;;  %v711_v26 = vadd.f32 %v643_v51, %v613_v37  ;;  %v4405_v24 = vld [vmem:[%s5396_s19 + $0x1d8] sm:$0xff]  ;;  %v618_v16 = vmul.f32 %v4406_v0, %v6839_v29  ;;  %4355 = vrsqrt.f32 %v3373_v12 }
 0x6d1   : > { %3539 = vperm.xlu0 %4195, %v6845_v20   ;;  %v2907_v51 = vsub.f32 %v4405_v24, %v6553_v10 }
 0x6d2   : > { %740 = vst [vmem:[%s6968_s23] sm:$0xff] %v710_v14  ;;  %741 = vst.msk [vmem:[%s6968_s23 + $0x8] sm:$0xff] %vm205_vm0, %v711_v26  ;;  %v4407_v14 = vld [vmem:[%s4653_s15 + $0x38] sm:$0xff]  ;;  %v3361_v26 = vmul.f32 0.0051020407, %v6921_v28 }
 0x6d3   : > { %v653_v33 = vpop.permute.xlu1 %652  ;;  %3028 = vperm.xlu1 %4194, %v2906_v53   ;;  %v6986_v50 = vpop.permute.xlu0 %1767  ;;  %v619_v1 = vmul.f32 %v4407_v14, %v6839_v29  ;;  %v4409_v29 = vld [vmem:[%s4653_s15 + $0x50] sm:$0xff] }
 0x6d4   : > { %v714_v37 = vadd.f32 %v653_v33, %v616_v6  ;;  %v715_v20 = vadd.f32 %v653_v33, %v617_v39  ;;  %v4408_v6 = vld [vmem:[%s5396_s19 + $0x1e0] sm:$0xff]  ;;  %v3375_v28 = vadd.f32 0.001, %v3361_v26 }
 0x6d5   : > { %3549 = vperm.xlu0 %4195, %v6857_v31   ;;  %v2908_v39 = vsub.f32 %v4408_v6, %v6545_v44 }
 0x6d6   : > { %744 = vst [vmem:[%s6968_s23 + $0x20] sm:$0xff] %v714_v37  ;;  %745 = vst.msk [vmem:[%s6968_s23 + $0x28] sm:$0xff] %vm205_vm0, %v715_v20  ;;  %v622_v37 = vmul.f32 %v4409_v29, %v6849_v25  ;;  %v623_v20 = vmul.f32 %v4410_v61, %v6849_v25  ;;  %v4412_v25 = vld [vmem:[%s4653_s15 + $0x70] sm:$0xff]  ;;  %4357 = vrsqrt.f32 %v3375_v28  ;;  %v4416_v29 = vld [vmem:[%s4653_s15 + $0x98] sm:$0xff]  ;;  %v3379_v28 = vadd.f32 0.001, %v3365_v30 }
 0x6d7   : > { %v658_v10 = vpop.permute.xlu1 %657  ;;  %3033 = vperm.xlu1 %4194, %v2907_v51   ;;  %v6999_v33 = vpop.permute.xlu0 %1777  ;;  %v4411_v51 = vld [vmem:[%s5396_s19 + $0x1e8] sm:$0xff]  ;;  %v626_v14 = vmul.f32 %v4412_v25, %v6861_v3  ;;  %v7036_v61 = vld [vmem:[%s5396_s19 + $0x238] sm:$0xff]  ;;  %v3428_v25 = vmul.f32 %v6945_v27, %v6671_v56 }
 0x6d8   : > { %v716_v31 = vadd.f32 %v658_v10, %v618_v16  ;;  %v717_v53 = vadd.f32 %v658_v10, %v619_v1  ;;  %v2909_v0 = vsub.f32 %v4411_v51, %v6558_v9  ;;  %v4413_v1 = vld [vmem:[%s4653_s15 + $0x78] sm:$0xff] }
 0x6d9   : > { %3559 = vperm.xlu0 %4195, %v6867_v55   ;;  %v627_v12 = vmul.f32 %v4413_v1, %v6861_v3  ;;  %v4354_v6 = vpop.eup %4353  ;;  %v4418_v1 = vld [vmem:[%s4653_s15 + $0xb0] sm:$0xff]  ;;  %v4419_v30 = vld [vmem:[%s4653_s15 + $0xb8] sm:$0xff] }
 0x6da   : > { %746 = vst [vmem:[%s6968_s23 + $0x30] sm:$0xff] %v716_v31  ;;  %747 = vst.msk [vmem:[%s6968_s23 + $0x38] sm:$0xff] %vm205_vm0, %v717_v53  ;;  %v4414_v31 = vld [vmem:[%s5396_s19 + $0x1f0] sm:$0xff] }
 0x6db   : > { %v668_v44 = vpop.permute.xlu1 %667  ;;  %3038 = vperm.xlu1 %4194, %v2908_v39   ;;  %v7012_v16 = vpop.permute.xlu0 %1787  ;;  %v2910_v53 = vsub.f32 %v4414_v31, %v6550_v34  ;;  %v4415_v39 = vld [vmem:[%s4653_s15 + $0x90] sm:$0xff] }
 0x6dc   : > { %v720_v55 = vadd.f32 %v668_v44, %v622_v37  ;;  %v721_v24 = vadd.f32 %v668_v44, %v623_v20  ;;  %v630_v41 = vmul.f32 %v4415_v39, %v6873_v23  ;;  %v631_v37 = vmul.f32 %v4416_v29, %v6873_v23  ;;  %v4417_v20 = vld [vmem:[%s5396_s19 + $0x8] sm:$0xff]  ;;  %v8207_v44 = vld [vmem:[#allocation26_spill] sm:$0xff] }
 0x6dd   : > { %3569 = vperm.xlu0 %4195, %v6879_v32   ;;  %v3377_v32 = vadd.f32 0.001, %v3363_v43  ;;  %v529_v34 = vsub.f32 %v4417_v20, %v8207_v44  ;;  %v3367_v43 = vmul.f32 0.0051020407, %v6942_v35  ;;  %v635_v35 = vmul.f32 %v4419_v30, %v6883_v49  ;;  %v4422_v44 = vld [vmem:[%s4653_s15 + $0xd8] sm:$0xff]  ;;  %v4424_v30 = vld [vmem:[%s4653_s15 + $0xe0] sm:$0xff] }
 0x6de   : > { %750 = vst [vmem:[%s6968_s23 + $0x50] sm:$0xff] %v720_v55  ;;  %751 = vst.msk [vmem:[%s6968_s23 + $0x58] sm:$0xff] %vm205_vm0, %v721_v24  ;;  %v4356_v24 = vpop.eup %4355 }
 0x6df   : > { %v678_v9 = vpop.permute.xlu1 %677  ;;  %3043 = vperm.xlu1 %4194, %v2909_v0   ;;  %v7025_v3 = vpop.permute.xlu0 %1797  ;;  %4359 = vrsqrt.f32 %v3377_v32  ;;  %v8208_v0 = vmov 1   ;;  %v4420_v32 = vld [vmem:[%s5396_s19 + $0x20] sm:$0xff] }
 0x6e0   : > { %v724_v10 = vadd.f32 %v678_v9, %v626_v14  ;;  %v725_v26 = vadd.f32 %v678_v9, %v627_v12  ;;  %v7047_v14 = vmul.f32 %v4354_v6, %v7036_v61  ;;  %v634_v12 = vmul.f32 %v4418_v1, %v6883_v49  ;;  %v7057_v9 = vld [vmem:[%s5396_s19 + $0x240] sm:$0xff]  ;;  %v4358_v29 = vpop.eup %4357 }
 0x6e1   : > { %3579 = vperm.xlu0 %4195, %v6891_v63   ;;  %4361 = vrsqrt.f32 %v3379_v28  ;;  %v3369_v49 = vmul.f32 0.0051020407, %v6952_v21  ;;  %v7078_v21 = vld [vmem:[%s5396_s19 + $0x250] sm:$0xff] }
 0x6e2   : > { %754 = vst [vmem:[%s6968_s23 + $0x70] sm:$0xff] %v724_v10  ;;  %755 = vst.msk [vmem:[%s6968_s23 + $0x78] sm:$0xff] %vm205_vm0, %v725_v26  ;;  %v8209_v10 = vld [vmem:[#allocation25_spill] sm:$0xff]  ;;  %v3381_v26 = vadd.f32 0.001, %v3367_v43  ;;  %v3429_v39 = vmul.f32 %v7047_v14, %v6572_v36  ;;  %v4423_v28 = vld [vmem:[%s5396_s19 + $0x30] sm:$0xff]  ;;  %v7088_v1 = vmul.f32 %v4358_v29, %v7078_v21 }
 0x6e3   : > { %v688_v63 = vpop.permute.xlu1 %687  ;;  %3048 = vperm.xlu1 %4194, %v2910_v53   ;;  %v7041_v51 = vpop.permute.xlu0 %2326  ;;  %v532_v56 = vsub.f32 %v4420_v32, %v8209_v10  ;;  %v8210_v36 = vld [vmem:[#allocation27_spill] sm:$0xff] }
 0x6e4   : > { %v728_v23 = vadd.f32 %v688_v63, %v630_v41  ;;  %v729_v55 = vadd.f32 %v688_v63, %v631_v37  ;;  %v7068_v41 = vmul.f32 %v4356_v24, %v7057_v9  ;;  %v4421_v37 = vld [vmem:[%s4653_s15 + $0xd0] sm:$0xff]  ;;  %v534_v63 = vsub.f32 %v4423_v28, %v8210_v36  ;;  %v4425_v32 = vld [vmem:[%s4653_s15 + $0xe8] sm:$0xff] }
 0x6e5   : > { %4197 = vset.pattern.permute.xlu0 %v8208_v0  ;;  %v638_v20 = vmul.f32 %v4421_v37, %v6895_v22  ;;  %4363 = vrsqrt.f32 %v3381_v26  ;;  %v1207_v10 = vmul.f32 %v4425_v32, %v6904_v15  ;;  %v8211_v26 = vld [vmem:[#allocation31_spill] sm:$0xff]  ;;  %v3432_v29 = vmul.f32 %v7088_v1, %v6679_v57  ;;  %v7118_v36 = vld [vmem:[%s5396_s19 + $0x270] sm:$0xff] }
 0x6e6   : > { %758 = vst [vmem:[%s6968_s23 + $0x90] sm:$0xff] %v728_v23  ;;  %759 = vst.msk [vmem:[%s6968_s23 + $0x98] sm:$0xff] %vm205_vm0, %v729_v55  ;;  %647 = vperm.xlu0 %4197, %v529_v34   ;;  %v639_v34 = vmul.f32 %v4422_v44, %v6895_v22  ;;  %v3383_v23 = vadd.f32 0.001, %v3369_v49 }
 0x6e7   : > { %v698_v27 = vpop.permute.xlu1 %697  ;;  %3456 = vrot.lane.b32.xlu1 %v3428_v25, %s4619_s20  ;;  %v7063_v6 = vpop.permute.xlu0 %2341  ;;  %v3430_v25 = vmul.f32 %v7068_v41, %v6581_v18 }
 0x6e8   : > { %v732_v31 = vadd.f32 %v698_v27, %v634_v12  ;;  %v733_v53 = vadd.f32 %v698_v27, %v635_v35  ;;  %v1206_v35 = vmul.f32 %v4424_v30, %v6904_v15  ;;  %v4426_v27 = vld [vmem:[%s5396_s19 + $0x40] sm:$0xff]  ;;  %4365 = vrsqrt.f32 %v3383_v23 }
 0x6e9   : > { %v4360_v12 = vpop.eup %4359  ;;  %v536_v49 = vsub.f32 %v4426_v27, %v8211_v26  ;;  %v7138_v27 = vld [vmem:[%s5396_s19 + $0x280] sm:$0xff] }
 0x6ea   : > { %762 = vst [vmem:[%s6968_s23 + $0xb0] sm:$0xff] %v732_v31  ;;  %763 = vst.msk [vmem:[%s6968_s23 + $0xb8] sm:$0xff] %vm205_vm0, %v733_v53  ;;  %662 = vperm.xlu0 %4197, %v532_v56   ;;  %v7098_v56 = vld [vmem:[%s5396_s19 + $0x260] sm:$0xff] }
 0x6eb   : > { %v708_v43 = vpop.permute.xlu1 %707  ;;  %3458 = vrot.lane.b32.xlu1 %v3429_v39, %s4619_s20  ;;  %v7083_v24 = vpop.permute.xlu0 %2351  ;;  %v7108_v37 = vmul.f32 %v4360_v12, %v7098_v56  ;;  %v4432_v26 = vld [vmem:[%s5396_s19 + $0x60] sm:$0xff] }
 0x6ec   : > { %v736_v22 = vadd.f32 %v708_v43, %v638_v20  ;;  %v737_v55 = vadd.f32 %v708_v43, %v639_v34  ;;  %v4362_v53 = vpop.eup %4361  ;;  %v4427_v20 = vld [vmem:[%s4653_s15 + $0x100] sm:$0xff]  ;;  %v4428_v34 = vld [vmem:[%s4653_s15 + $0x108] sm:$0xff]  ;;  %v8212_v43 = vld [vmem:[#allocation37_spill] sm:$0xff] }
 0x6ed   : > { %v1210_v44 = vmul.f32 %v4427_v20, %v6674_v17  ;;  %v1211_v28 = vmul.f32 %v4428_v34, %v6674_v17  ;;  %v7128_v12 = vmul.f32 %v4362_v53, %v7118_v36  ;;  %v4433_v34 = vld [vmem:[%s4653_s15 + $0x130] sm:$0xff] }
 0x6ee   : > { %766 = vst [vmem:[%s6968_s23 + $0xd0] sm:$0xff] %v736_v22  ;;  %767 = vst.msk [vmem:[%s6968_s23 + $0xd8] sm:$0xff] %vm205_vm0, %v737_v55  ;;  %672 = vperm.xlu0 %4197, %v534_v63   ;;  %v4429_v63 = vld [vmem:[%s5396_s19 + $0x50] sm:$0xff] }
 0x6ef   : > { %v1237_v18 = vpop.permute.xlu1 %1236  ;;  %3460 = vrot.lane.b32.xlu1 %v3430_v25, %s4619_s20  ;;  %v7103_v39 = vpop.permute.xlu0 %2361  ;;  %v538_v23 = vsub.f32 %v4429_v63, %v8212_v43  ;;  %v3434_v25 = vmul.f32 %v7108_v37, %v6689_v13  ;;  %v7158_v43 = vld [vmem:[%s5396_s19 + $0x290] sm:$0xff] }
 0x6f0   : > { %v1304_v31 = vadd.f32 %v1237_v18, %v1206_v35  ;;  %v1305_v15 = vadd.f32 %v1237_v18, %v1207_v10  ;;  %v4364_v30 = vpop.eup %4363  ;;  %v4430_v35 = vld [vmem:[%s4653_s15 + $0x110] sm:$0xff]  ;;  %v4431_v10 = vld [vmem:[%s4653_s15 + $0x118] sm:$0xff] }
 0x6f1   : > { %v1212_v32 = vmul.f32 %v4430_v35, %v6909_v2  ;;  %v1213_v18 = vmul.f32 %v4431_v10, %v6909_v2  ;;  %v7148_v20 = vmul.f32 %v4364_v30, %v7138_v27  ;;  %v4436_v10 = vld [vmem:[%s4653_s15 + $0x150] sm:$0xff] }
 0x6f2   : > { %3870 = vst [vmem:[%s6968_s23 + $0xe0] sm:$0xff] %v1304_v31  ;;  %3871 = vst.msk [vmem:[%s6968_s23 + $0xe8] sm:$0xff] %vm205_vm0, %v1305_v15  ;;  %682 = vperm.xlu0 %4197, %v536_v49   ;;  %v8213_v49 = vld [vmem:[#allocation41_spill] sm:$0xff] }
 0x6f3   : > { %v1247_v57 = vpop.permute.xlu1 %1246  ;;  %3464 = vrot.lane.b32.xlu1 %v3432_v29, %s4619_s20  ;;  %v7123_v17 = vpop.permute.xlu0 %2371  ;;  %v540_v31 = vsub.f32 %v4432_v26, %v8213_v49  ;;  %v3436_v29 = vmul.f32 %v7128_v12, %v6698_v8 }
 0x6f4   : > { %v1308_v22 = vadd.f32 %v1247_v57, %v1210_v44  ;;  %v1309_v55 = vadd.f32 %v1247_v57, %v1211_v28  ;;  %v4366_v44 = vpop.eup %4365  ;;  %v1216_v28 = vmul.f32 %v4433_v34, %v6915_v7  ;;  %v4434_v57 = vld [vmem:[%s4653_s15 + $0x138] sm:$0xff] }
 0x6f5   : > { %v1217_v63 = vmul.f32 %v4434_v57, %v6915_v7  ;;  %v3438_v7 = vmul.f32 %v7148_v20, %v6708_v52  ;;  %v4438_v52 = vld [vmem:[%s5396_s19 + $0x90] sm:$0xff] }
 0x6f6   : > { %3874 = vst [vmem:[%s6968_s23 + $0x100] sm:$0xff] %v1308_v22  ;;  %3875 = vst.msk [vmem:[%s6968_s23 + $0x108] sm:$0xff] %vm205_vm0, %v1309_v55  ;;  %692 = vperm.xlu0 %4197, %v538_v23   ;;  %v4435_v23 = vld [vmem:[%s5396_s19 + $0x78] sm:$0xff] }
 0x6f7   : > { %v1252_v13 = vpop.permute.xlu1 %1251  ;;  %3468 = vrot.lane.b32.xlu1 %v3434_v25, %s4619_s20  ;;  %v7143_v2 = vpop.permute.xlu0 %2381  ;;  %v8214_v22 = vld [vmem:[#allocation29_spill] sm:$0xff] }
 0x6f8   : > { %v1310_v15 = vadd.f32 %v1252_v13, %v1212_v32  ;;  %v1311_v53 = vadd.f32 %v1252_v13, %v1213_v18  ;;  %v1123_v55 = vsub.f32 %v4435_v23, %v8214_v22  ;;  %v7168_v32 = vmul.f32 %v4366_v44, %v7158_v43  ;;  %v4437_v13 = vld [vmem:[%s4653_s15 + $0x158] sm:$0xff]  ;;  %v8216_v23 = vld [vmem:[#allocation47_spill] sm:$0xff] }
 0x6f9   : > { %v1220_v18 = vmul.f32 %v4436_v10, %v6919_v58  ;;  %v1221_v26 = vmul.f32 %v4437_v13, %v6919_v58  ;;  %v4439_v58 = vld [vmem:[%s4653_s15 + $0x170] sm:$0xff] }
 0x6fa   : > { %3876 = vst [vmem:[%s6968_s23 + $0x110] sm:$0xff] %v1310_v15  ;;  %3877 = vst.msk [vmem:[%s6968_s23 + $0x118] sm:$0xff] %vm205_vm0, %v1311_v53  ;;  %702 = vperm.xlu0 %4197, %v540_v31   ;;  %v8215_v31 = vld [vmem:[#allocation45_spill] sm:$0xff]  ;;  %v3440_v44 = vmul.f32 %v7168_v32, %v6718_v45  ;;  %v1224_v34 = vmul.f32 %v4439_v58, %v6925_v62  ;;  %v4441_v45 = vld [vmem:[%s5396_s19 + $0xa0] sm:$0xff] }
 0x6fb   : > { %v1262_v8 = vpop.permute.xlu1 %1261  ;;  %3472 = vrot.lane.b32.xlu1 %v3436_v29, %s4619_s20  ;;  %v7163_v35 = vpop.permute.xlu0 %2391  ;;  %v1126_v15 = vsub.f32 %v4438_v52, %v8215_v31  ;;  %v1128_v22 = vsub.f32 %v4441_v45, %v8216_v23  ;;  %v8217_v52 = vld [vmem:[#allocation49_spill] sm:$0xff]  ;;  %v8218_v45 = vld [vmem:[#allocation51_spill] sm:$0xff] }
 0x6fc   : > { %v1314_v25 = vadd.f32 %v1262_v8, %v1216_v28  ;;  %v1315_v30 = vadd.f32 %v1262_v8, %v1217_v63  ;;  %v4440_v28 = vld [vmem:[%s4653_s15 + $0x178] sm:$0xff] }
 0x6fd   : > { %v1225_v57 = vmul.f32 %v4440_v28, %v6925_v62 }
 0x6fe   : > { %3880 = vst [vmem:[%s6968_s23 + $0x130] sm:$0xff] %v1314_v25  ;;  %3881 = vst.msk [vmem:[%s6968_s23 + $0x138] sm:$0xff] %vm205_vm0, %v1315_v30  ;;  %1241 = vperm.xlu0 %4197, %v1123_v55   ;;  %v4442_v30 = vld [vmem:[%s5396_s19 + $0x1f8] sm:$0xff] }
 0x6ff   : > { %v1272_v49 = vpop.permute.xlu1 %1271  ;;  %3476 = vrot.lane.b32.xlu1 %v3438_v7, %s4619_s20  ;;  %v7186_v63 = vpop.permute.xlu0 %2920  ;;  %v2911_v62 = vsub.f32 %v4442_v30, %v6564_v4  ;;  %v4443_v7 = vld [vmem:[%s4653_s15 + $0x190] sm:$0xff]  ;;  %v4451_v30 = vld [vmem:[%s4653_s15 + $0x1c0] sm:$0xff] }
 0x700   : > { %v1318_v53 = vadd.f32 %v1272_v49, %v1220_v18  ;;  %v1319_v29 = vadd.f32 %v1272_v49, %v1221_v26  ;;  %v1228_v10 = vmul.f32 %v4443_v7, %v6931_v42  ;;  %v4444_v18 = vld [vmem:[%s4653_s15 + $0x198] sm:$0xff]  ;;  %v4445_v49 = vld [vmem:[%s5396_s19 + $0xb0] sm:$0xff] }
 0x701   : > { %v1229_v13 = vmul.f32 %v4444_v18, %v6931_v42  ;;  %v1130_v4 = vsub.f32 %v4445_v49, %v8217_v52 }
 0x702   : > { %3884 = vst [vmem:[%s6968_s23 + $0x150] sm:$0xff] %v1318_v53  ;;  %3885 = vst.msk [vmem:[%s6968_s23 + $0x158] sm:$0xff] %vm205_vm0, %v1319_v29  ;;  %1256 = vperm.xlu0 %4197, %v1126_v15   ;;  %v4446_v29 = vld [vmem:[%s5396_s19 + $0x208] sm:$0xff] }
 0x703   : > { %v1282_v8 = vpop.permute.xlu1 %1281  ;;  %3480 = vrot.lane.b32.xlu1 %v3440_v44, %s4619_s20  ;;  %v7205_v31 = vpop.permute.xlu0 %2935  ;;  %v2913_v42 = vsub.f32 %v4446_v29, %v6569_v46  ;;  %v4447_v44 = vld [vmem:[%s4653_s15 + $0x1b0] sm:$0xff]  ;;  %v4456_v29 = vld [vmem:[%s4653_s15 + $0x1e8] sm:$0xff] }
 0x704   : > { %v1322_v55 = vadd.f32 %v1282_v8, %v1224_v34  ;;  %v1323_v25 = vadd.f32 %v1282_v8, %v1225_v57  ;;  %v1232_v58 = vmul.f32 %v4447_v44, %v6940_v40  ;;  %v4448_v34 = vld [vmem:[%s4653_s15 + $0x1b8] sm:$0xff]  ;;  %v4449_v8 = vld [vmem:[%s5396_s19 + $0xc0] sm:$0xff] }
 0x705   : > { %v1233_v28 = vmul.f32 %v4448_v34, %v6940_v40  ;;  %v1132_v46 = vsub.f32 %v4449_v8, %v8218_v45  ;;  %v1800_v40 = vmul.f32 %v4451_v30, %v6949_v38  ;;  %v8220_v34 = vld [vmem:[#allocation52_spill] sm:$0xff]  ;;  %v8222_v30 = vld [vmem:[#allocation57_spill] sm:$0xff] }
 0x706   : > { %3888 = vst [vmem:[%s6968_s23 + $0x170] sm:$0xff] %v1322_v55  ;;  %3889 = vst.msk [vmem:[%s6968_s23 + $0x178] sm:$0xff] %vm205_vm0, %v1323_v25  ;;  %1266 = vperm.xlu0 %4197, %v1128_v22   ;;  %v4450_v55 = vld [vmem:[%s5396_s19 + $0x218] sm:$0xff]  ;;  %v4458_v45 = vld [vmem:[%s4653_s15 + $0x1f0] sm:$0xff] }
 0x707   : > { %v1292_v26 = vpop.permute.xlu1 %1291  ;;  %3053 = vperm.xlu1 %4194, %v2911_v62   ;;  %v2915_v25 = vsub.f32 %v4450_v55, %v6579_v59  ;;  %v4452_v62 = vld [vmem:[%s4653_s15 + $0x1c8] sm:$0xff]  ;;  %v4453_v59 = vld [vmem:[%s5396_s19 + $0xd0] sm:$0xff]  ;;  %v8221_v55 = vmov 0  }
 0x708   : > { %v1326_v15 = vadd.f32 %v1292_v26, %v1228_v10  ;;  %v1327_v53 = vadd.f32 %v1292_v26, %v1229_v13  ;;  %v1801_v7 = vmul.f32 %v4452_v62, %v6949_v38  ;;  %v7224_v10 = vpop.permute.xlu0 %2945  ;;  %v8219_v13 = vld [vmem:[#allocation53_spill] sm:$0xff] }
 0x709   : > { %v1134_v26 = vsub.f32 %v4453_v59, %v8219_v13  ;;  %v4462_v59 = vld [vmem:[%s4653_s15 + $0x218] sm:$0xff] }
 0x70a   : > { %3892 = vst [vmem:[%s6968_s23 + $0x190] sm:$0xff] %v1326_v15  ;;  %3893 = vst.msk [vmem:[%s6968_s23 + $0x198] sm:$0xff] %vm205_vm0, %v1327_v53  ;;  %1276 = vperm.xlu0 %4197, %v1130_v4   ;;  %v4454_v4 = vld [vmem:[%s5396_s19 + $0x228] sm:$0xff]  ;;  %v4455_v15 = vld [vmem:[%s4653_s15 + $0x1e0] sm:$0xff]  ;;  %v1811_v13 = vmul.f32 %v4462_v59, %v6973_v48 }
 0x70b   : > { %v1302_v57 = vpop.permute.xlu1 %1301  ;;  %3063 = vperm.xlu1 %4194, %v2913_v42   ;;  %v2917_v38 = vsub.f32 %v4454_v4, %v6591_v47  ;;  %v1804_v53 = vmul.f32 %v4455_v15, %v6738_v11  ;;  %v1805_v42 = vmul.f32 %v4456_v29, %v6738_v11  ;;  %v1806_v11 = vmul.f32 %v4458_v45, %v6956_v60  ;;  %v8223_v4 = vld [vmem:[#allocation59_spill] sm:$0xff]  ;;  %v4465_v29 = vld [vmem:[%s4653_s15 + $0x238] sm:$0xff]  ;;  %v4467_v45 = vld [vmem:[%s4653_s15 + $0x250] sm:$0xff] }
 0x70c   : > { %v1330_v23 = vadd.f32 %v1302_v57, %v1232_v58  ;;  %v1331_v22 = vadd.f32 %v1302_v57, %v1233_v28  ;;  %v4457_v58 = vld [vmem:[%s5396_s19 + $0xe8] sm:$0xff]  ;;  %v7242_v47 = vpop.permute.xlu0 %2955  ;;  %v4472_v59 = vld [vmem:[%s5396_s19 + $0x140] sm:$0xff] }
 0x70d   : > { %v1717_v28 = vsub.f32 %v4457_v58, %v8220_v34  ;;  %v4466_v58 = vld [vmem:[%s5396_s19 + $0x120] sm:$0xff]  ;;  %v8224_v34 = vld [vmem:[#allocation61_spill] sm:$0xff] }
 0x70e   : > { %3896 = vst [vmem:[%s6968_s23 + $0x1b0] sm:$0xff] %v1330_v23  ;;  %3897 = vst.msk [vmem:[%s6968_s23 + $0x1b8] sm:$0xff] %vm205_vm0, %v1331_v22  ;;  %1286 = vperm.xlu0 %4197, %v1132_v46   ;;  %v4459_v46 = vld [vmem:[%s4653_s15 + $0x1f8] sm:$0xff] }
 0x70f   : > { %v1831_v18 = vpop.permute.xlu1 %1830  ;;  %3073 = vperm.xlu1 %4194, %v2915_v25   ;;  %v1807_v23 = vmul.f32 %v4459_v46, %v6956_v60  ;;  %v4460_v25 = vld [vmem:[%s5396_s19 + $0x100] sm:$0xff] }
 0x710   : > { %v1898_v49 = vadd.f32 %v1831_v18, %v1800_v40  ;;  %v1899_v52 = vadd.f32 %v1831_v18, %v1801_v7  ;;  %v1720_v40 = vsub.f32 %v4460_v25, %v8222_v30  ;;  %v4461_v18 = vld [vmem:[%s4653_s15 + $0x210] sm:$0xff] }
 0x711   : > { %v1810_v60 = vmul.f32 %v4461_v18, %v6973_v48 }
 0x712   : > { %3940 = vst [vmem:[%s6968_s23 + $0x1c0] sm:$0xff] %v1898_v49  ;;  %3941 = vst.msk [vmem:[%s6968_s23 + $0x1c8] sm:$0xff] %vm205_vm0, %v1899_v52  ;;  %1296 = vperm.xlu0 %4197, %v1134_v26   ;;  %v7259_v26 = vpop.permute.xlu0 %2965  ;;  %v4463_v52 = vld [vmem:[%s5396_s19 + $0x110] sm:$0xff] }
 0x713   : > { %v1841_v44 = vpop.permute.xlu1 %1840  ;;  %3083 = vperm.xlu1 %4194, %v2917_v38  }
 0x714   : > { %v1902_v57 = vadd.f32 %v1841_v44, %v1804_v53  ;;  %v1903_v8 = vadd.f32 %v1841_v44, %v1805_v42  ;;  %v4464_v53 = vld [vmem:[%s4653_s15 + $0x230] sm:$0xff]  ;;  %v1815_v42 = vmul.f32 %v4465_v29, %v6986_v50 }
 0x715   : > { %v1814_v48 = vmul.f32 %v4464_v53, %v6986_v50  ;;  %v1818_v50 = vmul.f32 %v4467_v45, %v6999_v33  ;;  %v4475_v53 = vld [vmem:[%s5396_s19 + $0x158] sm:$0xff]  ;;  %v8228_v45 = vld [vmem:[#allocation84_spill] sm:$0xff] }
 0x716   : > { %3944 = vst [vmem:[%s6968_s23 + $0x1e0] sm:$0xff] %v1902_v57  ;;  %3945 = vst.msk [vmem:[%s6968_s23 + $0x1e8] sm:$0xff] %vm205_vm0, %v1903_v8  ;;  %1835 = vperm.xlu0 %4197, %v1717_v28   ;;  %v1724_v28 = vsub.f32 %v4466_v58, %v8224_v34  ;;  %v7276_v57 = vpop.permute.xlu0 %2985  ;;  %v4476_v58 = vld [vmem:[%s4653_s15 + $0x2a0] sm:$0xff]  ;;  %v4477_v34 = vld [vmem:[%s4653_s15 + $0x2a8] sm:$0xff] }
 0x717   : > { %v1846_v22 = vpop.permute.xlu1 %1845  ;;  %4196 = vset.pattern.permute.xlu1 %v8221_v55  ;;  %v8225_v55 = vld [vmem:[#allocation63_spill] sm:$0xff] }
 0x718   : > { %v1904_v62 = vadd.f32 %v1846_v22, %v1806_v11  ;;  %v1905_v7 = vadd.f32 %v1846_v22, %v1807_v23  ;;  %3519 = vperm.xlu1 %4196, %v7047_v14   ;;  %v1722_v14 = vsub.f32 %v4463_v52, %v8223_v4  ;;  %v4468_v11 = vld [vmem:[%s4653_s15 + $0x258] sm:$0xff]  ;;  %v4469_v22 = vld [vmem:[%s5396_s19 + $0x130] sm:$0xff] }
 0x719   : > { %v1819_v46 = vmul.f32 %v4468_v11, %v6999_v33  ;;  %v1726_v25 = vsub.f32 %v4469_v22, %v8225_v55  ;;  %v4471_v33 = vld [vmem:[%s4653_s15 + $0x278] sm:$0xff]  ;;  %v4473_v4 = vld [vmem:[%s4653_s15 + $0x290] sm:$0xff] }
 0x71a   : > { %3946 = vst [vmem:[%s6968_s23 + $0x1f0] sm:$0xff] %v1904_v62  ;;  %3947 = vst.msk [vmem:[%s6968_s23 + $0x1f8] sm:$0xff] %vm205_vm0, %v1905_v7  ;;  %1850 = vperm.xlu0 %4197, %v1720_v40   ;;  %v4470_v40 = vld [vmem:[%s4653_s15 + $0x270] sm:$0xff]  ;;  %v1823_v7 = vmul.f32 %v4471_v33, %v7012_v16  ;;  %v7293_v18 = vpop.permute.xlu0 %3462 }
 0x71b   : > { %v1856_v49 = vpop.permute.xlu1 %1855  ;;  %v1822_v62 = vmul.f32 %v4470_v40, %v7012_v16  ;;  %v1826_v16 = vmul.f32 %v4473_v4, %v7025_v3  ;;  %v4482_v33 = vld [vmem:[%s4653_s15 + $0x2d0] sm:$0xff] }
 0x71c   : > { %v1908_v38 = vadd.f32 %v1856_v49, %v1810_v60  ;;  %v1909_v15 = vadd.f32 %v1856_v49, %v1811_v13  ;;  %3524 = vperm.xlu1 %4196, %v7068_v41   ;;  %v8226_v13 = vld [vmem:[#allocation65_spill] sm:$0xff] }
 0x71e   : > { %3950 = vst [vmem:[%s6968_s23 + $0x210] sm:$0xff] %v1908_v38  ;;  %3951 = vst.msk [vmem:[%s6968_s23 + $0x218] sm:$0xff] %vm205_vm0, %v1909_v15  ;;  %1860 = vperm.xlu0 %4197, %v1722_v14   ;;  %v4474_v14 = vld [vmem:[%s4653_s15 + $0x298] sm:$0xff] }
 0x71f   : > { %v1866_v44 = vpop.permute.xlu1 %1865  ;;  %v1827_v38 = vmul.f32 %v4474_v14, %v7025_v3  ;;  %v2394_v3 = vmul.f32 %v4476_v58, %v7041_v51  ;;  %v4488_v58 = vld [vmem:[%s4653_s15 + $0x310] sm:$0xff] }
 0x720   : > { %v1912_v41 = vadd.f32 %v1866_v44, %v1814_v48  ;;  %v1913_v8 = vadd.f32 %v1866_v44, %v1815_v42  ;;  %3534 = vperm.xlu1 %4196, %v7088_v1   ;;  %v8227_v48 = vld [vmem:[#allocation81_spill] sm:$0xff]  ;;  %v7310_v42 = vpop.permute.xlu0 %3466 }
 0x721   : > { %v2311_v29 = vsub.f32 %v4475_v53, %v8227_v48  ;;  %v4487_v53 = vld [vmem:[%s5396_s19 + $0x1a0] sm:$0xff] }
 0x722   : > { %3954 = vst [vmem:[%s6968_s23 + $0x230] sm:$0xff] %v1912_v41  ;;  %3955 = vst.msk [vmem:[%s6968_s23 + $0x238] sm:$0xff] %vm205_vm0, %v1913_v8  ;;  %1870 = vperm.xlu0 %4197, %v1724_v28   ;;  %v2395_v28 = vmul.f32 %v4477_v34, %v7041_v51  ;;  %v4478_v8 = vld [vmem:[%s5396_s19 + $0x170] sm:$0xff]  ;;  %v4480_v51 = vld [vmem:[%s4653_s15 + $0x2c8] sm:$0xff] }
 0x723   : > { %v1876_v23 = vpop.permute.xlu1 %1875  ;;  %v2399_v22 = vmul.f32 %v4480_v51, %v6776_v5  ;;  %v8231_v48 = vld [vmem:[#allocation90_spill] sm:$0xff]  ;;  %v4489_v34 = vld [vmem:[%s4653_s15 + $0x318] sm:$0xff] }
 0x724   : > { %v1916_v30 = vadd.f32 %v1876_v23, %v1818_v50  ;;  %v1917_v1 = vadd.f32 %v1876_v23, %v1819_v46  ;;  %3544 = vperm.xlu1 %4196, %v7108_v37   ;;  %v1728_v37 = vsub.f32 %v4472_v59, %v8226_v13  ;;  %v2314_v50 = vsub.f32 %v4478_v8, %v8228_v45  ;;  %v4479_v46 = vld [vmem:[%s4653_s15 + $0x2c0] sm:$0xff]  ;;  %v7327_v55 = vpop.permute.xlu0 %3470  ;;  %v4484_v13 = vld [vmem:[%s5396_s19 + $0x190] sm:$0xff] }
 0x725   : > { %v2398_v23 = vmul.f32 %v4479_v46, %v6776_v5  ;;  %v2400_v5 = vmul.f32 %v4482_v33, %v7063_v6  ;;  %v4490_v8 = vld [vmem:[%s5396_s19 + $0x1b0] sm:$0xff] }
 0x726   : > { %3958 = vst [vmem:[%s6968_s23 + $0x250] sm:$0xff] %v1916_v30  ;;  %3959 = vst.msk [vmem:[%s6968_s23 + $0x258] sm:$0xff] %vm205_vm0, %v1917_v1  ;;  %1880 = vperm.xlu0 %4197, %v1726_v25   ;;  %v4481_v30 = vld [vmem:[%s5396_s19 + $0x180] sm:$0xff]  ;;  %v8232_v45 = vld [vmem:[#allocation92_spill] sm:$0xff] }
 0x727   : > { %v1886_v60 = vpop.permute.xlu1 %1885  ;;  %v8229_v1 = vld [vmem:[#allocation86_spill] sm:$0xff]  ;;  %v4491_v46 = vld [vmem:[%s4653_s15 + $0x330] sm:$0xff] }
 0x728   : > { %v1920_v49 = vadd.f32 %v1886_v60, %v1822_v62  ;;  %v1921_v52 = vadd.f32 %v1886_v60, %v1823_v7  ;;  %3554 = vperm.xlu1 %4196, %v7128_v12   ;;  %v4483_v7 = vld [vmem:[%s4653_s15 + $0x2d8] sm:$0xff] }
 0x729   : > { %v2401_v60 = vmul.f32 %v4483_v7, %v7063_v6  ;;  %v4486_v6 = vld [vmem:[%s4653_s15 + $0x2f8] sm:$0xff]  ;;  %v4496_v7 = vld [vmem:[%s5396_s19 + $0x200] sm:$0xff] }
 0x72a   : > { %3962 = vst [vmem:[%s6968_s23 + $0x270] sm:$0xff] %v1920_v49  ;;  %3963 = vst.msk [vmem:[%s6968_s23 + $0x278] sm:$0xff] %vm205_vm0, %v1921_v52  ;;  %1890 = vperm.xlu0 %4197, %v1728_v37   ;;  %v8230_v37 = vld [vmem:[#allocation88_spill] sm:$0xff] }
 0x72b   : > { %v1896_v15 = vpop.permute.xlu1 %1895  ;;  %v2318_v49 = vsub.f32 %v4484_v13, %v8230_v37 }
 0x72c   : > { %v1924_v12 = vadd.f32 %v1896_v15, %v1826_v16  ;;  %v1925_v44 = vadd.f32 %v1896_v15, %v1827_v38  ;;  %3564 = vperm.xlu1 %4196, %v7148_v20   ;;  %v4485_v16 = vld [vmem:[%s4653_s15 + $0x2f0] sm:$0xff]  ;;  %v2405_v38 = vmul.f32 %v4486_v6, %v7083_v24 }
 0x72d   : > { %v2404_v14 = vmul.f32 %v4485_v16, %v7083_v24  ;;  %v2409_v24 = vmul.f32 %v4489_v34, %v7103_v39  ;;  %v4499_v16 = vld [vmem:[%s5396_s19 + $0x210] sm:$0xff] }
 0x72e   : > { %3966 = vst [vmem:[%s6968_s23 + $0x290] sm:$0xff] %v1924_v12  ;;  %3967 = vst.msk [vmem:[%s6968_s23 + $0x298] sm:$0xff] %vm205_vm0, %v1925_v44  ;;  %2429 = vperm.xlu0 %4197, %v2311_v29   ;;  %v2320_v29 = vsub.f32 %v4487_v53, %v8231_v48  ;;  %v4500_v48 = vld [vmem:[%s4653_s15 + $0x380] sm:$0xff] }
 0x72f   : > { %v2425_v41 = vpop.permute.xlu1 %2424 }
 0x730   : > { %v2492_v11 = vadd.f32 %v2425_v41, %v2394_v3  ;;  %v2493_v20 = vadd.f32 %v2425_v41, %v2395_v28  ;;  %3574 = vperm.xlu1 %4196, %v7168_v32   ;;  %v2316_v32 = vsub.f32 %v4481_v30, %v8229_v1  ;;  %v2408_v3 = vmul.f32 %v4488_v58, %v7103_v39  ;;  %v4492_v39 = vld [vmem:[%s4653_s15 + $0x338] sm:$0xff]  ;;  %v4502_v58 = vld [vmem:[%s5396_s19 + $0x220] sm:$0xff] }
 0x731   : > { %v2413_v51 = vmul.f32 %v4492_v39, %v7123_v17 }
 0x732   : > { %4010 = vst [vmem:[%s6968_s23 + $0x2a0] sm:$0xff] %v2492_v11  ;;  %4011 = vst.msk [vmem:[%s6968_s23 + $0x2a8] sm:$0xff] %vm205_vm0, %v2493_v20  ;;  %2444 = vperm.xlu0 %4197, %v2314_v50   ;;  %v2322_v50 = vsub.f32 %v4490_v8, %v8232_v45  ;;  %v4503_v45 = vld [vmem:[%s4653_s15 + $0x3a0] sm:$0xff] }
 0x733   : > { %v2435_v25 = vpop.permute.xlu1 %2434 }
 0x734   : > { %v2496_v40 = vadd.f32 %v2435_v25, %v2398_v23  ;;  %v2497_v62 = vadd.f32 %v2435_v25, %v2399_v22  ;;  %4198 = vset.pattern.permute.xlu1 %v8208_v0  ;;  %v7344_v0 = vpop.permute.xlu0 %3474  ;;  %v2412_v23 = vmul.f32 %v4491_v46, %v7123_v17  ;;  %v4493_v25 = vld [vmem:[%s5396_s19 + $0x1c8] sm:$0xff]  ;;  %v4495_v17 = vld [vmem:[%s4653_s15 + $0x358] sm:$0xff] }
 0x735   : > { %v2905_v30 = vsub.f32 %v4493_v25, %v6542_v54 }
 0x736   : > { %4014 = vst [vmem:[%s6968_s23 + $0x2c0] sm:$0xff] %v2496_v40  ;;  %4015 = vst.msk [vmem:[%s6968_s23 + $0x2c8] sm:$0xff] %vm205_vm0, %v2497_v62  ;;  %2454 = vperm.xlu0 %4197, %v2316_v32   ;;  %v4494_v62 = vld [vmem:[%s4653_s15 + $0x350] sm:$0xff] }
 0x737   : > { %v2440_v59 = vpop.permute.xlu1 %2439  ;;  %v2416_v33 = vmul.f32 %v4494_v62, %v7143_v2 }
 0x738   : > { %v2498_v52 = vadd.f32 %v2440_v59, %v2400_v5  ;;  %v2499_v4 = vadd.f32 %v2440_v59, %v2401_v60  ;;  %v7359_v28 = vpop.permute.xlu0 %3478  ;;  %v2417_v5 = vmul.f32 %v4495_v17, %v7143_v2  ;;  %v2912_v60 = vsub.f32 %v4496_v7, %v6556_v19  ;;  %v4498_v2 = vld [vmem:[%s4653_s15 + $0x378] sm:$0xff] }
 0x73a   : > { %4016 = vst [vmem:[%s6968_s23 + $0x2d0] sm:$0xff] %v2498_v52  ;;  %4017 = vst.msk [vmem:[%s6968_s23 + $0x2d8] sm:$0xff] %vm205_vm0, %v2499_v4  ;;  %2464 = vperm.xlu0 %4197, %v2318_v49   ;;  %v4497_v49 = vld [vmem:[%s4653_s15 + $0x370] sm:$0xff]  ;;  %v2421_v4 = vmul.f32 %v4498_v2, %v7163_v35 }
 0x73b   : > { %v2450_v15 = vpop.permute.xlu1 %2449  ;;  %v2420_v52 = vmul.f32 %v4497_v49, %v7163_v35  ;;  %v4501_v35 = vld [vmem:[%s4653_s15 + $0x388] sm:$0xff]  ;;  %v4509_v2 = vld [vmem:[%s4653_s15 + $0x3d0] sm:$0xff] }
 0x73c   : > { %v2502_v12 = vadd.f32 %v2450_v15, %v2404_v14  ;;  %v2503_v44 = vadd.f32 %v2450_v15, %v2405_v38  ;;  %v7375_v1 = vpop.permute.xlu0 %3482  ;;  %v8233_v14 = vld [vmem:[#allocation20_spill] sm:$0xff] }
 0x73d   : > { %v2914_v6 = vsub.f32 %v4499_v16, %v8233_v14 }
 0x73e   : > { %4020 = vst [vmem:[%s6968_s23 + $0x2f0] sm:$0xff] %v2502_v12  ;;  %4021 = vst.msk [vmem:[%s6968_s23 + $0x2f8] sm:$0xff] %vm205_vm0, %v2503_v44  ;;  %2474 = vperm.xlu0 %4197, %v2320_v29   ;;  %v2988_v29 = vmul.f32 %v4500_v48, %v7186_v63  ;;  %v2989_v12 = vmul.f32 %v4501_v35, %v7186_v63  ;;  %v4504_v63 = vld [vmem:[%s4653_s15 + $0x3a8] sm:$0xff]  ;;  %v4511_v48 = vld [vmem:[%s4653_s15 + $0x3e0] sm:$0xff] }
 0x73f   : > { %v2460_v41 = vpop.permute.xlu1 %2459 }
 0x740   : > { %v2506_v11 = vadd.f32 %v2460_v41, %v2408_v3  ;;  %v2507_v20 = vadd.f32 %v2460_v41, %v2409_v24  ;;  %v8234_v3 = vld [vmem:[#allocation21_spill] sm:$0xff] }
 0x741   : > { %v2916_v34 = vsub.f32 %v4502_v58, %v8234_v3  ;;  %v4513_v58 = vld [vmem:[%s4653_s15 + $0x10] sm:$0xff] }
 0x742   : > { %4024 = vst [vmem:[%s6968_s23 + $0x310] sm:$0xff] %v2506_v11  ;;  %4025 = vst.msk [vmem:[%s6968_s23 + $0x318] sm:$0xff] %vm205_vm0, %v2507_v20  ;;  %2484 = vperm.xlu0 %4197, %v2322_v50   ;;  %v8235_v50 = vld [vmem:[#allocation35_spill] sm:$0xff]  ;;  %v8238_v3 = vld [vmem:[#allocation68_spill] sm:$0xff] }
 0x743   : > { %v2470_v22 = vpop.permute.xlu1 %2469  ;;  %v2992_v11 = vmul.f32 %v4503_v45, %v8235_v50  ;;  %v2993_v20 = vmul.f32 %v4504_v63, %v8235_v50 }
 0x744   : > { %v2510_v32 = vadd.f32 %v2470_v22, %v2412_v23  ;;  %v2511_v40 = vadd.f32 %v2470_v22, %v2413_v51  ;;  %v4505_v22 = vld [vmem:[%s4653_s15 + $0x3b0] sm:$0xff] }
 0x745   : > { %v2994_v25 = vmul.f32 %v4505_v22, %v7205_v31 }
 0x746   : > { %4028 = vst [vmem:[%s6968_s23 + $0x330] sm:$0xff] %v2510_v32  ;;  %4029 = vst.msk [vmem:[%s6968_s23 + $0x338] sm:$0xff] %vm205_vm0, %v2511_v40  ;;  %3023 = vperm.xlu0 %4197, %v2905_v30   ;;  %v4506_v30 = vld [vmem:[%s4653_s15 + $0x3b8] sm:$0xff] }
 0x747   : > { %v2480_v54 = vpop.permute.xlu1 %2479  ;;  %v2995_v32 = vmul.f32 %v4506_v30, %v7205_v31 }
 0x748   : > { %v2514_v59 = vadd.f32 %v2480_v54, %v2416_v33  ;;  %v2515_v13 = vadd.f32 %v2480_v54, %v2417_v5  ;;  %v7386_v37 = vpop.permute.xlu0 %3514  ;;  %v4507_v5 = vld [vmem:[%s4653_s15 + $0x3c0] sm:$0xff] }
 0x749   : > { %v8236_v54 = vld [vmem:[#allocation22_spill] sm:$0xff] }
 0x74a   : > { %4032 = vst [vmem:[%s6968_s23 + $0x350] sm:$0xff] %v2514_v59  ;;  %4033 = vst.msk [vmem:[%s6968_s23 + $0x358] sm:$0xff] %vm205_vm0, %v2515_v13  ;;  %3058 = vperm.xlu0 %4197, %v2912_v60   ;;  %v2996_v7 = vmul.f32 %v4507_v5, %v8236_v54  ;;  %v4508_v60 = vld [vmem:[%s4653_s15 + $0x3c8] sm:$0xff] }
 0x74b   : > { %v2490_v19 = vpop.permute.xlu1 %2489  ;;  %v2997_v59 = vmul.f32 %v4508_v60, %v8236_v54  ;;  %v8241_v60 = vld [vmem:[#allocation71_spill] sm:$0xff] }
 0x74c   : > { %v2518_v38 = vadd.f32 %v2490_v19, %v2420_v52  ;;  %v2519_v15 = vadd.f32 %v2490_v19, %v2421_v4  ;;  %v7397_v53 = vpop.permute.xlu0 %3529  ;;  %v2998_v4 = vmul.f32 %v4509_v2, %v7224_v10  ;;  %v4510_v19 = vld [vmem:[%s4653_s15 + $0x3d8] sm:$0xff] }
 0x74d   : > { %v2999_v16 = vmul.f32 %v4510_v19, %v7224_v10 }
 0x74e   : > { %4036 = vst [vmem:[%s6968_s23 + $0x370] sm:$0xff] %v2518_v38  ;;  %4037 = vst.msk [vmem:[%s6968_s23 + $0x378] sm:$0xff] %vm205_vm0, %v2519_v15  ;;  %3068 = vperm.xlu0 %4197, %v2914_v6  }
 0x74f   : > { %v3019_v44 = vpop.permute.xlu1 %3018 }
 0x750   : > { %v3086_v24 = vadd.f32 %v3019_v44, %v2988_v29  ;;  %v3087_v41 = vadd.f32 %v3019_v44, %v2989_v12  ;;  %v7408_v8 = vpop.permute.xlu0 %3539  ;;  %v8237_v29 = vld [vmem:[#allocation18_spill] sm:$0xff]  ;;  %v4512_v12 = vld [vmem:[%s4653_s15 + $0x3e8] sm:$0xff] }
 0x751   : > { %v3000_v35 = vmul.f32 %v4511_v48, %v8237_v29  ;;  %v3001_v44 = vmul.f32 %v4512_v12, %v8237_v29  ;;  %v4520_v48 = vld [vmem:[%s4653_s15 + $0x88] sm:$0xff] }
 0x752   : > { %4080 = vst [vmem:[%s6968_s23 + $0x380] sm:$0xff] %v3086_v24  ;;  %4081 = vst.msk [vmem:[%s6968_s23 + $0x388] sm:$0xff] %vm205_vm0, %v3087_v41  ;;  %3078 = vperm.xlu0 %4197, %v2916_v34   ;;  %v614_v34 = vmul.f32 %v4513_v58, %v8238_v3  ;;  %v4514_v24 = vld [vmem:[%s4653_s15 + $0x18] sm:$0xff]  ;;  %v4521_v58 = vld [vmem:[%s4653_s15 + $0xa0] sm:$0xff] }
 0x753   : > { %v3029_v46 = vpop.permute.xlu1 %3028  ;;  %v615_v41 = vmul.f32 %v4514_v24, %v8238_v3  ;;  %v8243_v3 = vld [vmem:[#allocation75_spill] sm:$0xff] }
 0x754   : > { %v3090_v23 = vadd.f32 %v3029_v46, %v2992_v11  ;;  %v3091_v39 = vadd.f32 %v3029_v46, %v2993_v20  ;;  %v7417_v51 = vpop.permute.xlu0 %3549  ;;  %v4522_v24 = vld [vmem:[%s4653_s15 + $0xa8] sm:$0xff] }
 0x756   : > { %4084 = vst [vmem:[%s6968_s23 + $0x3a0] sm:$0xff] %v3090_v23  ;;  %4085 = vst.msk [vmem:[%s6968_s23 + $0x3a8] sm:$0xff] %vm205_vm0, %v3091_v39  ;;  %v4515_v23 = vld [vmem:[%s4653_s15 + $0x40] sm:$0xff]  ;;  %v8239_v39 = vld [vmem:[#allocation69_spill] sm:$0xff] }
 0x757   : > { %v3034_v40 = vpop.permute.xlu1 %3033  ;;  %v620_v22 = vmul.f32 %v4515_v23, %v8239_v39  ;;  %v4524_v23 = vld [vmem:[%s4653_s15 + $0xc0] sm:$0xff] }
 0x758   : > { %v3092_v62 = vadd.f32 %v3034_v40, %v2994_v25  ;;  %v3093_v33 = vadd.f32 %v3034_v40, %v2995_v32  ;;  %v7426_v17 = vpop.permute.xlu0 %3559  ;;  %v4516_v25 = vld [vmem:[%s4653_s15 + $0x48] sm:$0xff]  ;;  %v8240_v32 = vld [vmem:[#allocation30_spill] sm:$0xff] }
 0x759   : > { %v621_v30 = vmul.f32 %v4516_v25, %v8239_v39  ;;  %v8244_v39 = vld [vmem:[#allocation77_spill] sm:$0xff]  ;;  %v4525_v25 = vld [vmem:[%s4653_s15 + $0xc8] sm:$0xff] }
 0x75a   : > { %4086 = vst [vmem:[%s6968_s23 + $0x3b0] sm:$0xff] %v3092_v62  ;;  %4087 = vst.msk [vmem:[%s6968_s23 + $0x3b8] sm:$0xff] %vm205_vm0, %v3093_v33 }
 0x75b   : > { %v3039_v31 = vpop.permute.xlu1 %3038 }
 0x75c   : > { %v3094_v13 = vadd.f32 %v3039_v31, %v2996_v7  ;;  %v3095_v49 = vadd.f32 %v3039_v31, %v2997_v59  ;;  %v7435_v52 = vpop.permute.xlu0 %3569  ;;  %v4517_v7 = vld [vmem:[%s4653_s15 + $0x60] sm:$0xff]  ;;  %v4518_v31 = vld [vmem:[%s4653_s15 + $0x68] sm:$0xff] }
 0x75d   : > { %v624_v59 = vmul.f32 %v4517_v7, %v8241_v60  ;;  %v8245_v7 = vld [vmem:[#allocation79_spill] sm:$0xff] }
 0x75e   : > { %4088 = vst [vmem:[%s6968_s23 + $0x3c0] sm:$0xff] %v3094_v13  ;;  %4089 = vst.msk [vmem:[%s6968_s23 + $0x3c8] sm:$0xff] %vm205_vm0, %v3095_v49  ;;  %v625_v13 = vmul.f32 %v4518_v31, %v8241_v60  ;;  %v4529_v31 = vld [vmem:[%s5396_s19 + $0x268] sm:$0xff] }
 0x75f   : > { %v3044_v14 = vpop.permute.xlu1 %3043 }
 0x760   : > { %v3096_v6 = vadd.f32 %v3044_v14, %v2998_v4  ;;  %v3097_v38 = vadd.f32 %v3044_v14, %v2999_v16  ;;  %v7444_v15 = vpop.permute.xlu0 %3579  ;;  %v4519_v14 = vld [vmem:[%s4653_s15 + $0x80] sm:$0xff] }
 0x762   : > { %4090 = vst [vmem:[%s6968_s23 + $0x3d0] sm:$0xff] %v3096_v6  ;;  %4091 = vst.msk [vmem:[%s6968_s23 + $0x3d8] sm:$0xff] %vm205_vm0, %v3097_v38  ;;  %v8242_v6 = vld [vmem:[#allocation73_spill] sm:$0xff] }
 0x763   : > { %v3049_v10 = vpop.permute.xlu1 %3048  ;;  %v628_v38 = vmul.f32 %v4519_v14, %v8242_v6  ;;  %v629_v29 = vmul.f32 %v4520_v48, %v8242_v6  ;;  %v8246_v14 = vld [vmem:[#allocation38_spill] sm:$0xff]  ;;  %v4532_v48 = vld [vmem:[%s5396_s19 + $0x278] sm:$0xff] }
 0x764   : > { %v3098_v45 = vadd.f32 %v3049_v10, %v3000_v35  ;;  %v3099_v50 = vadd.f32 %v3049_v10, %v3001_v44 }
 0x765   : > { %v648_v11 = vpop.permute.xlu0 %647 }
 0x766   : > { %4092 = vst [vmem:[%s6968_s23 + $0x3e0] sm:$0xff] %v3098_v45  ;;  %4093 = vst.msk [vmem:[%s6968_s23 + $0x3e8] sm:$0xff] %vm205_vm0, %v3099_v50  ;;  %v712_v63 = vadd.f32 %v648_v11, %v614_v34  ;;  %v713_v20 = vadd.f32 %v648_v11, %v615_v41  ;;  %v632_v34 = vmul.f32 %v4521_v58, %v8243_v3  ;;  %v4523_v45 = vld [vmem:[%s5396_s19 + $0x248] sm:$0xff] }
 0x767   : > { %v3457_v46 = vpop.permute.xlu1 %3456  ;;  %v633_v41 = vmul.f32 %v4522_v24, %v8243_v3  ;;  %v3501_v50 = vsub.f32 %v4523_v45, %v7293_v18  ;;  %v637_v18 = vmul.f32 %v4525_v25, %v8244_v39  ;;  %v8247_v58 = vld [vmem:[#allocation39_spill] sm:$0xff]  ;;  %v4536_v45 = vld [vmem:[%s4653_s15 + $0x3f0] sm:$0xff] }
 0x768   : > { %742 = vst [vmem:[%s6968_s23 + $0x10] sm:$0xff] %v712_v63  ;;  %743 = vst.msk [vmem:[%s6968_s23 + $0x18] sm:$0xff] %vm205_vm0, %v713_v20  ;;  %v3498_v40 = vsub.f32 %v8240_v32, %v3457_v46  ;;  %v4535_v24 = vld [vmem:[%s5396_s19 + $0x288] sm:$0xff] }
 0x769   : > { %v663_v62 = vpop.permute.xlu0 %662 }
 0x76a   : > { %v718_v33 = vadd.f32 %v663_v62, %v620_v22  ;;  %v719_v5 = vadd.f32 %v663_v62, %v621_v30  ;;  %3612 = vperm.xlu1 %4198, %v3498_v40   ;;  %v636_v22 = vmul.f32 %v4524_v23, %v8244_v39  ;;  %v4526_v30 = vld [vmem:[%s5396_s19 + $0x258] sm:$0xff]  ;;  %v8248_v23 = vld [vmem:[#allocation10_spill] sm:$0xff] }
 0x76b   : > { %v3459_v54 = vpop.permute.xlu1 %3458  ;;  %v3503_v32 = vsub.f32 %v4526_v30, %v7310_v42 }
 0x76c   : > { %748 = vst [vmem:[%s6968_s23 + $0x40] sm:$0xff] %v718_v33  ;;  %749 = vst.msk [vmem:[%s6968_s23 + $0x48] sm:$0xff] %vm205_vm0, %v719_v5  ;;  %v3499_v49 = vsub.f32 %v7036_v61, %v3459_v54  ;;  %v4527_v54 = vld [vmem:[%s4653_s15 + $0xf0] sm:$0xff] }
 0x76d   : > { %v673_v2 = vpop.permute.xlu0 %672  ;;  %v1208_v60 = vmul.f32 %v4527_v54, %v8245_v7 }
 0x76e   : > { %v722_v4 = vadd.f32 %v673_v2, %v624_v59  ;;  %v723_v19 = vadd.f32 %v673_v2, %v625_v13  ;;  %3617 = vperm.xlu0 %4197, %v3499_v49   ;;  %v4528_v59 = vld [vmem:[%s4653_s15 + $0xf8] sm:$0xff]  ;;  %v3505_v13 = vsub.f32 %v4529_v31, %v7327_v55  ;;  %v4544_v31 = vld [vmem:[%s4653_s15 + $0x188] sm:$0xff] }
 0x76f   : > { %v3461_v16 = vpop.permute.xlu1 %3460  ;;  %v1209_v42 = vmul.f32 %v4528_v59, %v8245_v7  ;;  %v8249_v59 = vld [vmem:[#allocation9_spill] sm:$0xff] }
 0x770   : > { %752 = vst [vmem:[%s6968_s23 + $0x60] sm:$0xff] %v722_v4  ;;  %753 = vst.msk [vmem:[%s6968_s23 + $0x68] sm:$0xff] %vm205_vm0, %v723_v19  ;;  %v3500_v61 = vsub.f32 %v7057_v9, %v3461_v16  ;;  %v4530_v16 = vld [vmem:[%s4653_s15 + $0x120] sm:$0xff] }
 0x771   : > { %v683_v35 = vpop.permute.xlu0 %682  ;;  %v1214_v6 = vmul.f32 %v4530_v16, %v8246_v14  ;;  %v4546_v16 = vld [vmem:[%s4653_s15 + $0x438] sm:$0xff] }
 0x772   : > { %v726_v12 = vadd.f32 %v683_v35, %v628_v38  ;;  %v727_v44 = vadd.f32 %v683_v35, %v629_v29  ;;  %3622 = vperm.xlu1 %4198, %v3500_v61   ;;  %v4531_v38 = vld [vmem:[%s4653_s15 + $0x128] sm:$0xff]  ;;  %v3507_v29 = vsub.f32 %v4532_v48, %v7344_v0  ;;  %v4547_v48 = vld [vmem:[%s4653_s15 + $0x1a0] sm:$0xff] }
 0x773   : > { %v3465_v10 = vpop.permute.xlu1 %3464  ;;  %v1215_v55 = vmul.f32 %v4531_v38, %v8246_v14 }
 0x774   : > { %756 = vst [vmem:[%s6968_s23 + $0x80] sm:$0xff] %v726_v12  ;;  %757 = vst.msk [vmem:[%s6968_s23 + $0x88] sm:$0xff] %vm205_vm0, %v727_v44  ;;  %v3502_v9 = vsub.f32 %v7078_v21, %v3465_v10  ;;  %v4533_v10 = vld [vmem:[%s4653_s15 + $0x140] sm:$0xff] }
 0x775   : > { %v693_v11 = vpop.permute.xlu0 %692  ;;  %v1218_v3 = vmul.f32 %v4533_v10, %v8247_v58 }
 0x776   : > { %v730_v63 = vadd.f32 %v693_v11, %v632_v34  ;;  %v731_v20 = vadd.f32 %v693_v11, %v633_v41  ;;  %3632 = vperm.xlu0 %4197, %v3502_v9   ;;  %3627 = vperm.xlu1 %4198, %v3501_v50   ;;  %v4534_v34 = vld [vmem:[%s4653_s15 + $0x148] sm:$0xff]  ;;  %v3509_v41 = vsub.f32 %v4535_v24, %v7359_v28  ;;  %v4537_v11 = vld [vmem:[%s4653_s15 + $0x3f8] sm:$0xff]  ;;  %v4538_v28 = vld [vmem:[%s4653_s15 + $0x160] sm:$0xff] }
 0x777   : > { %v3469_v46 = vpop.permute.xlu1 %3468  ;;  %v1219_v0 = vmul.f32 %v4534_v34, %v8247_v58  ;;  %v3002_v50 = vmul.f32 %v4536_v45, %v7242_v47  ;;  %v1222_v39 = vmul.f32 %v4538_v28, %v8248_v23  ;;  %v4549_v58 = vld [vmem:[%s4653_s15 + $0x450] sm:$0xff]  ;;  %v4550_v34 = vld [vmem:[%s4653_s15 + $0x458] sm:$0xff] }
 0x778   : > { %760 = vst [vmem:[%s6968_s23 + $0xa0] sm:$0xff] %v730_v63  ;;  %761 = vst.msk [vmem:[%s6968_s23 + $0xa8] sm:$0xff] %vm205_vm0, %v731_v20  ;;  %v3504_v21 = vsub.f32 %v7098_v56, %v3469_v46  ;;  %v3003_v63 = vmul.f32 %v4537_v11, %v7242_v47  ;;  %v4551_v45 = vld [vmem:[%s4653_s15 + $0x1d0] sm:$0xff]  ;;  %v4552_v11 = vld [vmem:[%s4653_s15 + $0x1d8] sm:$0xff] }
 0x779   : > { %v703_v40 = vpop.permute.xlu0 %702 }
 0x77a   : > { %v734_v62 = vadd.f32 %v703_v40, %v636_v22  ;;  %v735_v33 = vadd.f32 %v703_v40, %v637_v18  ;;  %3642 = vperm.xlu0 %4197, %v3504_v21   ;;  %3637 = vperm.xlu1 %4198, %v3503_v32   ;;  %v4539_v22 = vld [vmem:[%s4653_s15 + $0x168] sm:$0xff]  ;;  %v4540_v18 = vld [vmem:[%s5396_s19 + $0x298] sm:$0xff]  ;;  %v4541_v40 = vld [vmem:[%s4653_s15 + $0x410] sm:$0xff] }
 0x77b   : > { %v3473_v5 = vpop.permute.xlu1 %3472  ;;  %v1223_v25 = vmul.f32 %v4539_v22, %v8248_v23  ;;  %v3511_v30 = vsub.f32 %v4540_v18, %v7375_v1 }
 0x77c   : > { %764 = vst [vmem:[%s6968_s23 + $0xc0] sm:$0xff] %v734_v62  ;;  %765 = vst.msk [vmem:[%s6968_s23 + $0xc8] sm:$0xff] %vm205_vm0, %v735_v33  ;;  %v3506_v56 = vsub.f32 %v7118_v36, %v3473_v5  ;;  %v3006_v62 = vmul.f32 %v4541_v40, %v7259_v26  ;;  %v4542_v33 = vld [vmem:[%s4653_s15 + $0x418] sm:$0xff] }
 0x77d   : > { %v1242_v49 = vpop.permute.xlu0 %1241  ;;  %v3007_v5 = vmul.f32 %v4542_v33, %v7259_v26  ;;  %v8254_v40 = vld [vmem:[#allocation13_spill] sm:$0xff]  ;;  %v4556_v33 = vld [vmem:[%s4653_s15 + $0x228] sm:$0xff] }
 0x77e   : > { %v1306_v2 = vadd.f32 %v1242_v49, %v1208_v60  ;;  %v1307_v4 = vadd.f32 %v1242_v49, %v1209_v42  ;;  %3652 = vperm.xlu0 %4197, %v3506_v56   ;;  %3647 = vperm.xlu1 %4198, %v3505_v13   ;;  %v4543_v60 = vld [vmem:[%s4653_s15 + $0x180] sm:$0xff]  ;;  %v1227_v13 = vmul.f32 %v4544_v31, %v8249_v59  ;;  %v4558_v31 = vld [vmem:[%s4653_s15 + $0x248] sm:$0xff] }
 0x77f   : > { %v3477_v19 = vpop.permute.xlu1 %3476  ;;  %v1226_v42 = vmul.f32 %v4543_v60, %v8249_v59  ;;  %v4557_v60 = vld [vmem:[%s4653_s15 + $0x240] sm:$0xff]  ;;  %v8255_v59 = vld [vmem:[#allocation7_spill] sm:$0xff] }
 0x780   : > { %3872 = vst [vmem:[%s6968_s23 + $0xf0] sm:$0xff] %v1306_v2  ;;  %3873 = vst.msk [vmem:[%s6968_s23 + $0xf8] sm:$0xff] %vm205_vm0, %v1307_v4  ;;  %v3508_v36 = vsub.f32 %v7138_v27, %v3477_v19  ;;  %v4545_v2 = vld [vmem:[%s4653_s15 + $0x430] sm:$0xff] }
 0x781   : > { %v1257_v61 = vpop.permute.xlu0 %1256  ;;  %v8250_v4 = vld [vmem:[#allocation24_spill] sm:$0xff] }
 0x782   : > { %v1312_v35 = vadd.f32 %v1257_v61, %v1214_v6  ;;  %v1313_v12 = vadd.f32 %v1257_v61, %v1215_v55  ;;  %3662 = vperm.xlu0 %4197, %v3508_v36   ;;  %3657 = vperm.xlu1 %4198, %v3507_v29   ;;  %v3010_v19 = vmul.f32 %v4545_v2, %v8250_v4  ;;  %v8251_v29 = vld [vmem:[#allocation11_spill] sm:$0xff]  ;;  %v4559_v2 = vld [vmem:[%s4653_s15 + $0x260] sm:$0xff] }
 0x783   : > { %v3481_v44 = vpop.permute.xlu1 %3480  ;;  %v3011_v14 = vmul.f32 %v4546_v16, %v8250_v4  ;;  %v1230_v36 = vmul.f32 %v4547_v48, %v8251_v29  ;;  %v4548_v61 = vld [vmem:[%s4653_s15 + $0x1a8] sm:$0xff]  ;;  %v8256_v4 = vld [vmem:[#allocation14_spill] sm:$0xff] }
 0x784   : > { %3878 = vst [vmem:[%s6968_s23 + $0x120] sm:$0xff] %v1312_v35  ;;  %3879 = vst.msk [vmem:[%s6968_s23 + $0x128] sm:$0xff] %vm205_vm0, %v1313_v12  ;;  %v3510_v27 = vsub.f32 %v7158_v43, %v3481_v44  ;;  %v1231_v35 = vmul.f32 %v4548_v61, %v8251_v29  ;;  %v4560_v16 = vld [vmem:[%s4653_s15 + $0x268] sm:$0xff]  ;;  %v4561_v48 = vld [vmem:[%s4653_s15 + $0x280] sm:$0xff] }
 0x785   : > { %v1267_v9 = vpop.permute.xlu0 %1266  ;;  %v8257_v29 = vld [vmem:[#allocation6_spill] sm:$0xff]  ;;  %v4562_v61 = vld [vmem:[%s4653_s15 + $0x288] sm:$0xff] }
 0x786   : > { %v1316_v20 = vadd.f32 %v1267_v9, %v1218_v3  ;;  %v1317_v46 = vadd.f32 %v1267_v9, %v1219_v0  ;;  %3672 = vperm.xlu0 %4197, %v3510_v27   ;;  %3667 = vperm.xlu1 %4198, %v3509_v41   ;;  %v3014_v3 = vmul.f32 %v4549_v58, %v7276_v57  ;;  %v4563_v58 = vld [vmem:[%s4653_s15 + $0x2b0] sm:$0xff] }
 0x787   : > { %v3054_v43 = vpop.permute.xlu1 %3053  ;;  %v3015_v0 = vmul.f32 %v4550_v34, %v7276_v57 }
 0x788   : > { %3882 = vst [vmem:[%s6968_s23 + $0x140] sm:$0xff] %v1316_v20  ;;  %3883 = vst.msk [vmem:[%s6968_s23 + $0x148] sm:$0xff] %vm205_vm0, %v1317_v46  ;;  %v3100_v47 = vadd.f32 %v3054_v43, %v3002_v50  ;;  %v3101_v32 = vadd.f32 %v3054_v43, %v3003_v63  ;;  %v8252_v50 = vld [vmem:[#allocation12_spill] sm:$0xff]  ;;  %v8253_v43 = vld [vmem:[#allocation5_spill] sm:$0xff] }
 0x789   : > { %v1277_v21 = vpop.permute.xlu0 %1276  ;;  %v1802_v9 = vmul.f32 %v4551_v45, %v8252_v50  ;;  %v1803_v63 = vmul.f32 %v4552_v11, %v8252_v50  ;;  %v4565_v50 = vld [vmem:[%s4653_s15 + $0x2e0] sm:$0xff] }
 0x78a   : > { %4094 = vst [vmem:[%s6968_s23 + $0x3f0] sm:$0xff] %v3100_v47  ;;  %4095 = vst.msk [vmem:[%s6968_s23 + $0x3f8] sm:$0xff] %vm205_vm0, %v3101_v32  ;;  %v1320_v1 = vadd.f32 %v1277_v21, %v1222_v39  ;;  %v1321_v54 = vadd.f32 %v1277_v21, %v1223_v25  ;;  %3677 = vperm.xlu1 %4198, %v3511_v30   ;;  %v4553_v39 = vld [vmem:[%s4653_s15 + $0x200] sm:$0xff]  ;;  %v4554_v25 = vld [vmem:[%s4653_s15 + $0x208] sm:$0xff] }
 0x78b   : > { %v3064_v7 = vpop.permute.xlu1 %3063  ;;  %v1808_v22 = vmul.f32 %v4553_v39, %v8253_v43  ;;  %v1809_v18 = vmul.f32 %v4554_v25, %v8253_v43  ;;  %v4555_v21 = vld [vmem:[%s4653_s15 + $0x220] sm:$0xff]  ;;  %v8260_v39 = vld [vmem:[#allocation16_spill] sm:$0xff] }
 0x78c   : > { %3886 = vst [vmem:[%s6968_s23 + $0x160] sm:$0xff] %v1320_v1  ;;  %3887 = vst.msk [vmem:[%s6968_s23 + $0x168] sm:$0xff] %vm205_vm0, %v1321_v54  ;;  %v3104_v26 = vadd.f32 %v3064_v7, %v3006_v62  ;;  %v3105_v56 = vadd.f32 %v3064_v7, %v3007_v5  ;;  %v1812_v62 = vmul.f32 %v4555_v21, %v8254_v40  ;;  %v8261_v21 = vld [vmem:[#allocation4_spill] sm:$0xff] }
 0x78d   : > { %v1287_v49 = vpop.permute.xlu0 %1286  ;;  %v1813_v5 = vmul.f32 %v4556_v33, %v8254_v40 }
 0x78e   : > { %4098 = vst [vmem:[%s6968_s23 + $0x410] sm:$0xff] %v3104_v26  ;;  %4099 = vst.msk [vmem:[%s6968_s23 + $0x418] sm:$0xff] %vm205_vm0, %v3105_v56  ;;  %v1324_v6 = vadd.f32 %v1287_v49, %v1226_v42  ;;  %v1325_v38 = vadd.f32 %v1287_v49, %v1227_v13  ;;  %v1816_v42 = vmul.f32 %v4557_v60, %v8255_v59  ;;  %v8262_v60 = vld [vmem:[#allocation23_spill] sm:$0xff] }
 0x78f   : > { %v3074_v55 = vpop.permute.xlu1 %3073  ;;  %v1817_v13 = vmul.f32 %v4558_v31, %v8255_v59 }
 0x790   : > { %3890 = vst [vmem:[%s6968_s23 + $0x180] sm:$0xff] %v1324_v6  ;;  %3891 = vst.msk [vmem:[%s6968_s23 + $0x188] sm:$0xff] %vm205_vm0, %v1325_v38  ;;  %v3108_v12 = vadd.f32 %v3074_v55, %v3010_v19  ;;  %v3109_v44 = vadd.f32 %v3074_v55, %v3011_v14  ;;  %v1820_v19 = vmul.f32 %v4559_v2, %v8256_v4  ;;  %v8263_v2 = vld [vmem:[#allocation17_spill] sm:$0xff] }
 0x791   : > { %v1297_v10 = vpop.permute.xlu0 %1296  ;;  %v1821_v14 = vmul.f32 %v4560_v16, %v8256_v4 }
 0x792   : > { %4102 = vst [vmem:[%s6968_s23 + $0x430] sm:$0xff] %v3108_v12  ;;  %4103 = vst.msk [vmem:[%s6968_s23 + $0x438] sm:$0xff] %vm205_vm0, %v3109_v44  ;;  %v1328_v24 = vadd.f32 %v1297_v10, %v1230_v36  ;;  %v1329_v41 = vadd.f32 %v1297_v10, %v1231_v35  ;;  %v1824_v36 = vmul.f32 %v4561_v48, %v8257_v29  ;;  %v4575_v48 = vld [vmem:[%s4653_s15 + $0x390] sm:$0xff] }
 0x793   : > { %v3084_v27 = vpop.permute.xlu1 %3083  ;;  %v1825_v35 = vmul.f32 %v4562_v61, %v8257_v29  ;;  %v8264_v29 = vld [vmem:[#allocation34_spill] sm:$0xff]  ;;  %v4576_v61 = vld [vmem:[%s4653_s15 + $0x398] sm:$0xff] }
 0x794   : > { %3894 = vst [vmem:[%s6968_s23 + $0x1a0] sm:$0xff] %v1328_v24  ;;  %3895 = vst.msk [vmem:[%s6968_s23 + $0x1a8] sm:$0xff] %vm205_vm0, %v1329_v41  ;;  %v3112_v57 = vadd.f32 %v3084_v27, %v3014_v3  ;;  %v3113_v20 = vadd.f32 %v3084_v27, %v3015_v0  ;;  %v8258_v3 = vld [vmem:[#allocation33_spill] sm:$0xff] }
 0x795   : > { %v1836_v46 = vpop.permute.xlu0 %1835  ;;  %v2396_v34 = vmul.f32 %v4563_v58, %v8258_v3  ;;  %v4564_v0 = vld [vmem:[%s4653_s15 + $0x2b8] sm:$0xff] }
 0x796   : > { %4106 = vst [vmem:[%s6968_s23 + $0x450] sm:$0xff] %v3112_v57  ;;  %4107 = vst.msk [vmem:[%s6968_s23 + $0x458] sm:$0xff] %vm205_vm0, %v3113_v20  ;;  %v1900_v28 = vadd.f32 %v1836_v46, %v1802_v9  ;;  %v1901_v23 = vadd.f32 %v1836_v46, %v1803_v63  ;;  %v2397_v24 = vmul.f32 %v4564_v0, %v8258_v3  ;;  %v8259_v9 = vld [vmem:[#allocation15_spill] sm:$0xff]  ;;  %v4577_v3 = vld [vmem:[%s4653_s15 + $0x400] sm:$0xff] }
 0x797   : > { %v2402_v11 = vmul.f32 %v4565_v50, %v8259_v9  ;;  %v4566_v63 = vld [vmem:[%s4653_s15 + $0x2e8] sm:$0xff] }
 0x798   : > { %3942 = vst [vmem:[%s6968_s23 + $0x1d0] sm:$0xff] %v1900_v28  ;;  %3943 = vst.msk [vmem:[%s6968_s23 + $0x1d8] sm:$0xff] %vm205_vm0, %v1901_v23  ;;  %v2403_v57 = vmul.f32 %v4566_v63, %v8259_v9  ;;  %v4567_v23 = vld [vmem:[%s4653_s15 + $0x300] sm:$0xff] }
 0x799   : > { %v1851_v30 = vpop.permute.xlu0 %1850  ;;  %v2406_v43 = vmul.f32 %v4567_v23, %v8260_v39  ;;  %v4579_v9 = vld [vmem:[%s4653_s15 + $0x420] sm:$0xff] }
 0x79a   : > { %v1906_v47 = vadd.f32 %v1851_v30, %v1808_v22  ;;  %v1907_v32 = vadd.f32 %v1851_v30, %v1809_v18  ;;  %v4568_v22 = vld [vmem:[%s4653_s15 + $0x308] sm:$0xff] }
 0x79b   : > { %v2407_v25 = vmul.f32 %v4568_v22, %v8260_v39  ;;  %v8267_v22 = vld [vmem:[#allocation19_spill] sm:$0xff] }
 0x79c   : > { %3948 = vst [vmem:[%s6968_s23 + $0x200] sm:$0xff] %v1906_v47  ;;  %3949 = vst.msk [vmem:[%s6968_s23 + $0x208] sm:$0xff] %vm205_vm0, %v1907_v32  ;;  %v4569_v32 = vld [vmem:[%s4653_s15 + $0x320] sm:$0xff] }
 0x79d   : > { %v1861_v1 = vpop.permute.xlu0 %1860  ;;  %v2410_v40 = vmul.f32 %v4569_v32, %v8261_v21 }
 0x79e   : > { %v1910_v54 = vadd.f32 %v1861_v1, %v1812_v62  ;;  %v1911_v7 = vadd.f32 %v1861_v1, %v1813_v5  ;;  %v4570_v62 = vld [vmem:[%s4653_s15 + $0x328] sm:$0xff] }
 0x79f   : > { %v2411_v33 = vmul.f32 %v4570_v62, %v8261_v21 }
 0x7a0   : > { %3952 = vst [vmem:[%s6968_s23 + $0x220] sm:$0xff] %v1910_v54  ;;  %3953 = vst.msk [vmem:[%s6968_s23 + $0x228] sm:$0xff] %vm205_vm0, %v1911_v7  ;;  %v4571_v7 = vld [vmem:[%s4653_s15 + $0x340] sm:$0xff] }
 0x7a1   : > { %v1871_v26 = vpop.permute.xlu0 %1870  ;;  %v2414_v59 = vmul.f32 %v4571_v7, %v8262_v60  ;;  %v4584_v7 = vld [vmem:[%s4653_s15 + $0x468] sm:$0xff] }
 0x7a2   : > { %v1914_v56 = vadd.f32 %v1871_v26, %v1816_v42  ;;  %v1915_v49 = vadd.f32 %v1871_v26, %v1817_v13  ;;  %v4572_v42 = vld [vmem:[%s4653_s15 + $0x348] sm:$0xff] }
 0x7a3   : > { %v2415_v31 = vmul.f32 %v4572_v42, %v8262_v60  ;;  %v3583_v60 = vmul.f32 %v4584_v7, %v7386_v37 }
 0x7a4   : > { %3956 = vst [vmem:[%s6968_s23 + $0x240] sm:$0xff] %v1914_v56  ;;  %3957 = vst.msk [vmem:[%s6968_s23 + $0x248] sm:$0xff] %vm205_vm0, %v1915_v49  ;;  %v4573_v49 = vld [vmem:[%s4653_s15 + $0x360] sm:$0xff] }
 0x7a5   : > { %v1881_v6 = vpop.permute.xlu0 %1880  ;;  %v2418_v4 = vmul.f32 %v4573_v49, %v8263_v2 }
 0x7a6   : > { %v1918_v38 = vadd.f32 %v1881_v6, %v1820_v19  ;;  %v1919_v55 = vadd.f32 %v1881_v6, %v1821_v14  ;;  %v4574_v19 = vld [vmem:[%s4653_s15 + $0x368] sm:$0xff]  ;;  %v3520_v14 = vpop.permute.xlu1 %3519 }
 0x7a7   : > { %v2419_v16 = vmul.f32 %v4574_v19, %v8263_v2 }
 0x7a8   : > { %3960 = vst [vmem:[%s6968_s23 + $0x260] sm:$0xff] %v1918_v38  ;;  %3961 = vst.msk [vmem:[%s6968_s23 + $0x268] sm:$0xff] %vm205_vm0, %v1919_v55 }
 0x7a9   : > { %v1891_v12 = vpop.permute.xlu0 %1890 }
 0x7aa   : > { %v1922_v44 = vadd.f32 %v1891_v12, %v1824_v36  ;;  %v1923_v10 = vadd.f32 %v1891_v12, %v1825_v35  ;;  %v2990_v36 = vmul.f32 %v4575_v48, %v8264_v29  ;;  %v2991_v35 = vmul.f32 %v4576_v61, %v8264_v29  ;;  %v3525_v58 = vpop.permute.xlu1 %3524  ;;  %v4589_v29 = vld [vmem:[%s4653_s15 + $0x490] sm:$0xff]  ;;  %v4590_v61 = vld [vmem:[%s4653_s15 + $0x498] sm:$0xff] }
 0x7ac   : > { %3964 = vst [vmem:[%s6968_s23 + $0x280] sm:$0xff] %v1922_v44  ;;  %3965 = vst.msk [vmem:[%s6968_s23 + $0x288] sm:$0xff] %vm205_vm0, %v1923_v10 }
 0x7ad   : > { %v2430_v41 = vpop.permute.xlu0 %2429 }
 0x7ae   : > { %v2494_v27 = vadd.f32 %v2430_v41, %v2396_v34  ;;  %v2495_v45 = vadd.f32 %v2430_v41, %v2397_v24  ;;  %v8265_v34 = vld [vmem:[#allocation28_spill] sm:$0xff]  ;;  %v4578_v24 = vld [vmem:[%s4653_s15 + $0x408] sm:$0xff] }
 0x7af   : > { %v3004_v0 = vmul.f32 %v4577_v3, %v8265_v34  ;;  %v3005_v41 = vmul.f32 %v4578_v24, %v8265_v34 }
 0x7b0   : > { %4012 = vst [vmem:[%s6968_s23 + $0x2b0] sm:$0xff] %v2494_v27  ;;  %4013 = vst.msk [vmem:[%s6968_s23 + $0x2b8] sm:$0xff] %vm205_vm0, %v2495_v45 }
 0x7b1   : > { %v2445_v20 = vpop.permute.xlu0 %2444 }
 0x7b2   : > { %v2500_v46 = vadd.f32 %v2445_v20, %v2402_v11  ;;  %v2501_v28 = vadd.f32 %v2445_v20, %v2403_v57  ;;  %v8266_v11 = vld [vmem:[#allocation8_spill] sm:$0xff]  ;;  %v4580_v57 = vld [vmem:[%s4653_s15 + $0x428] sm:$0xff] }
 0x7b3   : > { %v3008_v63 = vmul.f32 %v4579_v9, %v8266_v11  ;;  %v3009_v20 = vmul.f32 %v4580_v57, %v8266_v11  ;;  %v4595_v11 = vld [vmem:[%s4653_s15 + $0x4c0] sm:$0xff]  ;;  %v4596_v57 = vld [vmem:[%s4653_s15 + $0x4c8] sm:$0xff] }
 0x7b4   : > { %4018 = vst [vmem:[%s6968_s23 + $0x2e0] sm:$0xff] %v2500_v46  ;;  %4019 = vst.msk [vmem:[%s6968_s23 + $0x2e8] sm:$0xff] %vm205_vm0, %v2501_v28  ;;  %v3535_v46 = vpop.permute.xlu1 %3534 }
 0x7b5   : > { %v2455_v18 = vpop.permute.xlu0 %2454 }
 0x7b6   : > { %v2504_v30 = vadd.f32 %v2455_v18, %v2406_v43  ;;  %v2505_v47 = vadd.f32 %v2455_v18, %v2407_v25  ;;  %v4581_v43 = vld [vmem:[%s4653_s15 + $0x440] sm:$0xff]  ;;  %v4582_v18 = vld [vmem:[%s4653_s15 + $0x448] sm:$0xff] }
 0x7b7   : > { %v3012_v25 = vmul.f32 %v4581_v43, %v8267_v22 }
 0x7b8   : > { %4022 = vst [vmem:[%s6968_s23 + $0x300] sm:$0xff] %v2504_v30  ;;  %4023 = vst.msk [vmem:[%s6968_s23 + $0x308] sm:$0xff] %vm205_vm0, %v2505_v47  ;;  %v3013_v30 = vmul.f32 %v4582_v18, %v8267_v22  ;;  %v4597_v22 = vld [vmem:[%s4653_s15 + $0x4d0] sm:$0xff]  ;;  %v4598_v18 = vld [vmem:[%s4653_s15 + $0x4d8] sm:$0xff] }
 0x7b9   : > { %v2465_v5 = vpop.permute.xlu0 %2464 }
 0x7ba   : > { %v2508_v1 = vadd.f32 %v2465_v5, %v2410_v40  ;;  %v2509_v54 = vadd.f32 %v2465_v5, %v2411_v33  ;;  %v3545_v40 = vpop.permute.xlu1 %3544 }
 0x7bc   : > { %4026 = vst [vmem:[%s6968_s23 + $0x320] sm:$0xff] %v2508_v1  ;;  %4027 = vst.msk [vmem:[%s6968_s23 + $0x328] sm:$0xff] %vm205_vm0, %v2509_v54  ;;  %v4583_v1 = vld [vmem:[%s4653_s15 + $0x460] sm:$0xff] }
 0x7bd   : > { %v2475_v13 = vpop.permute.xlu0 %2474  ;;  %v3582_v54 = vmul.f32 %v4583_v1, %v7386_v37  ;;  %v4587_v37 = vld [vmem:[%s4653_s15 + $0x480] sm:$0xff] }
 0x7be   : > { %v2512_v26 = vadd.f32 %v2475_v13, %v2414_v59  ;;  %v2513_v56 = vadd.f32 %v2475_v13, %v2415_v31  ;;  %v7700_v62 = vpop.permute.xlu1 %3554  ;;  %v4585_v13 = vld [vmem:[%s4653_s15 + $0x470] sm:$0xff] }
 0x7c0   : > { %4030 = vst [vmem:[%s6968_s23 + $0x340] sm:$0xff] %v2512_v26  ;;  %4031 = vst.msk [vmem:[%s6968_s23 + $0x348] sm:$0xff] %vm205_vm0, %v2513_v56  ;;  %v3584_v26 = vmul.f32 %v4585_v13, %v3520_v14  ;;  %v4586_v56 = vld [vmem:[%s4653_s15 + $0x478] sm:$0xff] }
 0x7c1   : > { %v2485_v6 = vpop.permute.xlu0 %2484  ;;  %v3585_v49 = vmul.f32 %v4586_v56, %v3520_v14 }
 0x7c2   : > { %v2516_v38 = vadd.f32 %v2485_v6, %v2418_v4  ;;  %v2517_v55 = vadd.f32 %v2485_v6, %v2419_v16  ;;  %v7702_v33 = vpop.permute.xlu1 %3564  ;;  %v3586_v16 = vmul.f32 %v4587_v37, %v3525_v58  ;;  %v4588_v6 = vld [vmem:[%s4653_s15 + $0x488] sm:$0xff] }
 0x7c4   : > { %4034 = vst [vmem:[%s6968_s23 + $0x360] sm:$0xff] %v2516_v38  ;;  %4035 = vst.msk [vmem:[%s6968_s23 + $0x368] sm:$0xff] %vm205_vm0, %v2517_v55  ;;  %v3587_v38 = vmul.f32 %v4588_v6, %v3525_v58 }
 0x7c5   : > { %v3024_v12 = vpop.permute.xlu0 %3023 }
 0x7c6   : > { %v3088_v44 = vadd.f32 %v3024_v12, %v2990_v36  ;;  %v3089_v10 = vadd.f32 %v3024_v12, %v2991_v35  ;;  %v7704_v5 = vpop.permute.xlu1 %3574  ;;  %v3588_v36 = vmul.f32 %v4589_v29, %v7397_v53  ;;  %v3589_v35 = vmul.f32 %v4590_v61, %v7397_v53  ;;  %v4591_v12 = vld [vmem:[%s4653_s15 + $0x4a0] sm:$0xff]  ;;  %v4593_v53 = vld [vmem:[%s4653_s15 + $0x4b0] sm:$0xff] }
 0x7c8   : > { %4082 = vst [vmem:[%s6968_s23 + $0x390] sm:$0xff] %v3088_v44  ;;  %4083 = vst.msk [vmem:[%s6968_s23 + $0x398] sm:$0xff] %vm205_vm0, %v3089_v10  ;;  %v3590_v44 = vmul.f32 %v4591_v12, %v3535_v46  ;;  %v4592_v10 = vld [vmem:[%s4653_s15 + $0x4a8] sm:$0xff] }
 0x7c9   : > { %v3059_v27 = vpop.permute.xlu0 %3058  ;;  %v3591_v58 = vmul.f32 %v4592_v10, %v3535_v46 }
 0x7ca   : > { %v3102_v45 = vadd.f32 %v3059_v27, %v3004_v0  ;;  %v3103_v50 = vadd.f32 %v3059_v27, %v3005_v41 }
 0x7cc   : > { %4096 = vst [vmem:[%s6968_s23 + $0x400] sm:$0xff] %v3102_v45  ;;  %4097 = vst.msk [vmem:[%s6968_s23 + $0x408] sm:$0xff] %vm205_vm0, %v3103_v50  ;;  %v3592_v45 = vmul.f32 %v4593_v53, %v7408_v8  ;;  %v4594_v50 = vld [vmem:[%s4653_s15 + $0x4b8] sm:$0xff] }
 0x7cd   : > { %v3069_v28 = vpop.permute.xlu0 %3068  ;;  %v3593_v9 = vmul.f32 %v4594_v50, %v7408_v8 }
 0x7ce   : > { %v3106_v23 = vadd.f32 %v3069_v28, %v3008_v63  ;;  %v3107_v39 = vadd.f32 %v3069_v28, %v3009_v20  ;;  %v3594_v63 = vmul.f32 %v4595_v11, %v3545_v40  ;;  %v3595_v20 = vmul.f32 %v4596_v57, %v3545_v40 }
 0x7d0   : > { %4100 = vst [vmem:[%s6968_s23 + $0x420] sm:$0xff] %v3106_v23  ;;  %4101 = vst.msk [vmem:[%s6968_s23 + $0x428] sm:$0xff] %vm205_vm0, %v3107_v39 }
 0x7d1   : > { %v3079_v47 = vpop.permute.xlu0 %3078 }
 0x7d2   : > { %v3110_v32 = vadd.f32 %v3079_v47, %v3012_v25  ;;  %v3111_v21 = vadd.f32 %v3079_v47, %v3013_v30  ;;  %v3596_v25 = vmul.f32 %v4597_v22, %v7417_v51  ;;  %v3597_v30 = vmul.f32 %v4598_v18, %v7417_v51  ;;  %v4599_v47 = vld [vmem:[%s4653_s15 + $0x4e0] sm:$0xff] }
 0x7d4   : > { %4104 = vst [vmem:[%s6968_s23 + $0x440] sm:$0xff] %v3110_v32  ;;  %4105 = vst.msk [vmem:[%s6968_s23 + $0x448] sm:$0xff] %vm205_vm0, %v3111_v21  ;;  %v3598_v32 = vmul.f32 %v4599_v47, %v7700_v62  ;;  %v4600_v21 = vld [vmem:[%s4653_s15 + $0x4e8] sm:$0xff] }
 0x7d5   : > { %v3599_v40 = vmul.f32 %v4600_v21, %v7700_v62 }
 0x7e9   : > { %v3613_v59 = vpop.permute.xlu1 %3612 }
 0x7ea   : > { %v3680_v42 = vadd.f32 %v3613_v59, %v3582_v54  ;;  %v3681_v31 = vadd.f32 %v3613_v59, %v3583_v60 }
 0x7ec   : > { %4150 = vst [vmem:[%s6968_s23 + $0x460] sm:$0xff] %v3680_v42  ;;  %4151 = vst.msk [vmem:[%s6968_s23 + $0x468] sm:$0xff] %vm205_vm0, %v3681_v31  ;;  %v4601_v42 = vld [vmem:[%s4653_s15 + $0x4f0] sm:$0xff]  ;;  %v4602_v31 = vld [vmem:[%s4653_s15 + $0x4f8] sm:$0xff] }
 0x7ed   : > { %v3618_v2 = vpop.permute.xlu0 %3617  ;;  %v3600_v62 = vmul.f32 %v4601_v42, %v7426_v17  ;;  %v3601_v13 = vmul.f32 %v4602_v31, %v7426_v17 }
 0x7ee   : > { %v3682_v4 = vadd.f32 %v3618_v2, %v3584_v26  ;;  %v3683_v19 = vadd.f32 %v3618_v2, %v3585_v49  ;;  %v4603_v26 = vld [vmem:[%s4653_s15 + $0x500] sm:$0xff]  ;;  %v4604_v49 = vld [vmem:[%s4653_s15 + $0x508] sm:$0xff] }
 0x7ef   : > { %v3602_v56 = vmul.f32 %v4603_v26, %v7702_v33  ;;  %v3603_v2 = vmul.f32 %v4604_v49, %v7702_v33 }
 0x7f0   : > { %4152 = vst [vmem:[%s6968_s23 + $0x470] sm:$0xff] %v3682_v4  ;;  %4153 = vst.msk [vmem:[%s6968_s23 + $0x478] sm:$0xff] %vm205_vm0, %v3683_v19 }
 0x7f1   : > { %v3623_v55 = vpop.permute.xlu1 %3622 }
 0x7f2   : > { %v3684_v14 = vadd.f32 %v3623_v55, %v3586_v16  ;;  %v3685_v48 = vadd.f32 %v3623_v55, %v3587_v38  ;;  %v4605_v38 = vld [vmem:[%s4653_s15 + $0x510] sm:$0xff]  ;;  %v4606_v55 = vld [vmem:[%s4653_s15 + $0x518] sm:$0xff] }
 0x7f3   : > { %v3604_v33 = vmul.f32 %v4605_v38, %v7435_v52 }
 0x7f4   : > { %4154 = vst [vmem:[%s6968_s23 + $0x480] sm:$0xff] %v3684_v14  ;;  %4155 = vst.msk [vmem:[%s6968_s23 + $0x488] sm:$0xff] %vm205_vm0, %v3685_v48  ;;  %v3605_v14 = vmul.f32 %v4606_v55, %v7435_v52  ;;  %v4607_v48 = vld [vmem:[%s4653_s15 + $0x520] sm:$0xff] }
 0x7f5   : > { %v3628_v3 = vpop.permute.xlu1 %3627  ;;  %v3633_v34 = vpop.permute.xlu0 %3632  ;;  %v3606_v29 = vmul.f32 %v4607_v48, %v7704_v5 }
 0x7f6   : > { %v3686_v0 = vadd.f32 %v3628_v3, %v3588_v36  ;;  %v3687_v24 = vadd.f32 %v3628_v3, %v3589_v35  ;;  %v3688_v41 = vadd.f32 %v3633_v34, %v3590_v44  ;;  %v3689_v27 = vadd.f32 %v3633_v34, %v3591_v58  ;;  %v4608_v36 = vld [vmem:[%s4653_s15 + $0x528] sm:$0xff]  ;;  %v4609_v3 = vld [vmem:[%s4653_s15 + $0x530] sm:$0xff]  ;;  %v4610_v34 = vld [vmem:[%s4653_s15 + $0x538] sm:$0xff] }
 0x7f7   : > { %v3607_v61 = vmul.f32 %v4608_v36, %v7704_v5  ;;  %v3608_v5 = vmul.f32 %v4609_v3, %v7444_v15 }
 0x7f8   : > { %4156 = vst [vmem:[%s6968_s23 + $0x490] sm:$0xff] %v3686_v0  ;;  %4157 = vst.msk [vmem:[%s6968_s23 + $0x498] sm:$0xff] %vm205_vm0, %v3687_v24  ;;  %v3609_v0 = vmul.f32 %v4610_v34, %v7444_v15 }
 0x7f9   : > { %4158 = vst [vmem:[%s6968_s23 + $0x4a0] sm:$0xff] %v3688_v41  ;;  %4159 = vst.msk [vmem:[%s6968_s23 + $0x4a8] sm:$0xff] %vm205_vm0, %v3689_v27  ;;  %v3638_v46 = vpop.permute.xlu1 %3637  ;;  %v3643_v28 = vpop.permute.xlu0 %3642 }
 0x7fa   : > { %v3690_v8 = vadd.f32 %v3638_v46, %v3592_v45  ;;  %v3691_v23 = vadd.f32 %v3638_v46, %v3593_v9  ;;  %v3692_v39 = vadd.f32 %v3643_v28, %v3594_v63  ;;  %v3693_v43 = vadd.f32 %v3643_v28, %v3595_v20 }
 0x7fc   : > { %4160 = vst [vmem:[%s6968_s23 + $0x4b0] sm:$0xff] %v3690_v8  ;;  %4161 = vst.msk [vmem:[%s6968_s23 + $0x4b8] sm:$0xff] %vm205_vm0, %v3691_v23 }
 0x7fd   : > { %4162 = vst [vmem:[%s6968_s23 + $0x4c0] sm:$0xff] %v3692_v39  ;;  %4163 = vst.msk [vmem:[%s6968_s23 + $0x4c8] sm:$0xff] %vm205_vm0, %v3693_v43  ;;  %v3648_v1 = vpop.permute.xlu1 %3647  ;;  %v3653_v51 = vpop.permute.xlu0 %3652 }
 0x7fe   : > { %v3694_v54 = vadd.f32 %v3648_v1, %v3596_v25  ;;  %v3695_v7 = vadd.f32 %v3648_v1, %v3597_v30  ;;  %v3696_v60 = vadd.f32 %v3653_v51, %v3598_v32  ;;  %v3697_v59 = vadd.f32 %v3653_v51, %v3599_v40 }
 0x800   : > { %4164 = vst [vmem:[%s6968_s23 + $0x4d0] sm:$0xff] %v3694_v54  ;;  %4165 = vst.msk [vmem:[%s6968_s23 + $0x4d8] sm:$0xff] %vm205_vm0, %v3695_v7 }
 0x801   : > { %4166 = vst [vmem:[%s6968_s23 + $0x4e0] sm:$0xff] %v3696_v60  ;;  %4167 = vst.msk [vmem:[%s6968_s23 + $0x4e8] sm:$0xff] %vm205_vm0, %v3697_v59  ;;  %v3658_v4 = vpop.permute.xlu1 %3657  ;;  %v3663_v17 = vpop.permute.xlu0 %3662 }
 0x802   : > { %v3698_v19 = vadd.f32 %v3658_v4, %v3600_v62  ;;  %v3699_v37 = vadd.f32 %v3658_v4, %v3601_v13  ;;  %v3700_v16 = vadd.f32 %v3663_v17, %v3602_v56  ;;  %v3701_v6 = vadd.f32 %v3663_v17, %v3603_v2 }
 0x804   : > { %4168 = vst [vmem:[%s6968_s23 + $0x4f0] sm:$0xff] %v3698_v19  ;;  %4169 = vst.msk [vmem:[%s6968_s23 + $0x4f8] sm:$0xff] %vm205_vm0, %v3699_v37 }
 0x805   : > { %4170 = vst [vmem:[%s6968_s23 + $0x500] sm:$0xff] %v3700_v16  ;;  %4171 = vst.msk [vmem:[%s6968_s23 + $0x508] sm:$0xff] %vm205_vm0, %v3701_v6  ;;  %v3668_v35 = vpop.permute.xlu1 %3667  ;;  %v3673_v12 = vpop.permute.xlu0 %3672 }
 0x806   : > { %v3702_v52 = vadd.f32 %v3668_v35, %v3604_v33  ;;  %v3703_v44 = vadd.f32 %v3668_v35, %v3605_v14  ;;  %v3704_v10 = vadd.f32 %v3673_v12, %v3606_v29  ;;  %v3705_v58 = vadd.f32 %v3673_v12, %v3607_v61 }
 0x808   : > { %4172 = vst [vmem:[%s6968_s23 + $0x510] sm:$0xff] %v3702_v52  ;;  %4173 = vst.msk [vmem:[%s6968_s23 + $0x518] sm:$0xff] %vm205_vm0, %v3703_v44 }
 0x809   : > { %4174 = vst [vmem:[%s6968_s23 + $0x520] sm:$0xff] %v3704_v10  ;;  %4175 = vst.msk [vmem:[%s6968_s23 + $0x528] sm:$0xff] %vm205_vm0, %v3705_v58  ;;  %v3678_v24 = vpop.permute.xlu1 %3677 }
 0x80a   : > { %v3706_v41 = vadd.f32 %v3678_v24, %v3608_v5  ;;  %v3707_v27 = vadd.f32 %v3678_v24, %v3609_v0 }
 0x80c   : > { %4176 = vst [vmem:[%s6968_s23 + $0x530] sm:$0xff] %v3706_v41  ;;  %4177 = vst.msk [vmem:[%s6968_s23 + $0x538] sm:$0xff] %vm205_vm0, %v3707_v27 }
 0x80d PF: > { %s12_s9 = sadd.s32 1, %s4617_s9  }
 0x80e   : > { %p9_p4 = scmp.ge.s32.totalorder %s12_s9, 4  }
 0x810   :  { %11 = sbr.rel (!%p9_p4) target bundleno = 1 (0x1), region = 78 }

</bundles_post_ra>
